<compile_context>
chip_gen: v5e
topology: v5e:2x2
jax: 0.10.0
libtpu: 0.0.40
codegen_flags: <defaults>
</compile_context>

<pallas_src>
import functools

import jax
import jax.numpy as jnp
from jax.experimental import pallas as pl
from jax.experimental.pallas import tpu as pltpu

RATIO = 8          # `ratio` in the PyTorch file
KH = KW = 9        # kernel size
STRIDE = 2         # conv stride
NBW = 5            # distinct W-offsets (kw // 2 for kw in 0..8)


def _conv_unit_kernel(x_ref, w_ref, o_ref, *, Ho, Wo, W2p, CT, GT):
    # x_ref : (4, H2, W2p, CT)     bf16 parity-split input (1 batch, 1 group tile)
    #                              plane p = ph*2 + pw holds x[2*i+ph, 2*j+pw, :]
    # w_ref : (1, KH, KW, CT, GT)  bf16 block-diagonal dense grouped weights
    # o_ref : (1, 1, Ho, Wo, GT)   f32 output tile
    accs = [None] * NBW            # per-W-offset f32 accumulators (values, not scratch)

    for ph in range(2):
        for pw in range(2):
            p = ph * 2 + pw
            for bh in range(NBW):
                kh = 2 * bh + ph
                if kh >= KH:
                    continue
                # Stride-2 tap == offset (bh, bw) in the parity-split tensor.
                # Slice only the free H axis; W stays full width so the merge
                # below is (8,128)-tile aligned (W2p % 8 == 0).  Each distinct
                # patch is sliced once and reused for every valid bw.
                patch = x_ref[p, bh:bh + Ho, :, :].reshape(Ho * W2p, CT)
                for bw in range(NBW):
                    kw = 2 * bw + pw
                    if kw >= KW:
                        continue
                    contrib = jnp.dot(patch, w_ref[0, kh, kw],
                                      preferred_element_type=jnp.float32)
                    accs[bw] = contrib if accs[bw] is None else accs[bw] + contrib

    # Epilogue: combine the bw-shifted accumulators and crop W to Wo.
    out = accs[0].reshape(Ho, W2p, GT)[:, 0:Wo, :]
    for bw in range(1, NBW):
        out = out + accs[bw].reshape(Ho, W2p, GT)[:, bw:bw + Wo, :]
    o_ref[0, 0] = out


def conv_unit_forward(x_nchw, weight, *, group_tile=None):
    """weight: (G, RATIO, KH, KW) exactly like nn.Conv2d(groups=G).weight."""
    N, C, H, W = x_nchw.shape
    assert C % RATIO == 0, "in_channels must be a multiple of ratio=8"
    G = C // RATIO
    assert weight.shape == (G, RATIO, KH, KW)
    assert H >= KH and W >= KW
    assert H % 2 == 0 and W % 2 == 0, "even spatial dims required by parity split"
    Ho = (H - KH) // STRIDE + 1
    Wo = (W - KW) // STRIDE + 1
    H2, W2 = H // 2, W // 2
    W2p = ((W2 + 7) // 8) * 8                 # pad W/2 to a sublane multiple

    # Channel-group tile: aim for contraction dim CT = 128 (GT=16); fall back
    # to the whole group dim when it does not divide evenly (keeps BlockSpec
    # last dims either full or a multiple of 128).
    if group_tile is None:
        group_tile = 16 if G % 16 == 0 else G
    GT = group_tile
    assert G % GT == 0
    NG = G // GT
    CT = GT * RATIO

    # ---- glue (plain JAX): layout prep ----
    x_bf = x_nchw.astype(jnp.bfloat16)        # cast first: halves transpose bytes
    x_nhwc = jnp.transpose(x_bf, (0, 2, 3, 1))
    # x_r[n*4 + ph*2 + pw, i, j, c] = x_nhwc[n, 2*i+ph, 2*j+pw, c]
    x_r = x_nhwc.reshape(N, H2, 2, W2, 2, C).transpose(0, 2, 4, 1, 3, 5)
    x_r = x_r.reshape(N * 4, H2, W2, C)
    if W2p != W2:
        x_r = jnp.pad(x_r, ((0, 0), (0, 0), (0, W2p - W2), (0, 0)))

    # Per-group-tile block-diagonal dense weights: (NG, KH, KW, CT, GT).
    # Off-group entries are exact zeros, so results match the grouped conv.
    w_g = jnp.transpose(weight, (2, 3, 0, 1)).reshape(KH, KW, NG, GT, RATIO)
    eye = jnp.eye(GT, dtype=weight.dtype)
    w_tiled = jnp.einsum('hwngr,gt->nhwgrt', w_g, eye)
    w_tiled = w_tiled.reshape(NG, KH, KW, CT, GT).astype(jnp.bfloat16)

    kernel = functools.partial(_conv_unit_kernel,
                               Ho=Ho, Wo=Wo, W2p=W2p, CT=CT, GT=GT)

    # Explicit VMEM budget (double-buffered blocks + accumulators), v7x-safe cap.
    # TODO(synk): for very large images, add an output-row grid axis (halo'd
    # Element-offset input blocks) instead of growing this limit.
    x_blk = 4 * H2 * W2p * CT * 2
    w_blk = KH * KW * CT * GT * 2
    o_blk = Ho * Wo * GT * 4
    acc_b = NBW * Ho * W2p * max(GT, 128) * 4
    vmem_budget = int(max(2 * (x_blk + w_blk + o_blk) + acc_b + (2 << 20),
                          32 << 20))
    vmem_budget = min(vmem_budget, 64 << 20)

    out5 = pl.pallas_call(
        kernel,
        out_shape=jax.ShapeDtypeStruct((N, NG, Ho, Wo, GT), jnp.float32),
        grid_spec=pltpu.PrefetchScalarGridSpec(
            num_scalar_prefetch=0,
            grid=(N, NG),
            in_specs=[
                pl.BlockSpec((4, H2, W2p, CT), lambda n, g: (n, 0, 0, g)),
                pl.BlockSpec((1, KH, KW, CT, GT), lambda n, g: (g, 0, 0, 0, 0)),
            ],
            out_specs=pl.BlockSpec((1, 1, Ho, Wo, GT),
                                   lambda n, g: (n, g, 0, 0, 0)),
        ),
        compiler_params=pltpu.CompilerParams(
            dimension_semantics=("parallel", "parallel"),
            vmem_limit_bytes=vmem_budget,
        ),
    )(x_r, w_tiled)

    # back to PyTorch NCHW convention: global group index = g_tile*GT + local
    out = jnp.transpose(out5, (0, 1, 4, 2, 3)).reshape(N, G, Ho, Wo)
    return out


if __name__ == "__main__":
    # Small shapes consistent with the module: in_channels multiple of ratio=8,
    # spatial >= 9 for the VALID 9x9 conv.
    N, C, H, W = 2, 16, 16, 16
    G = C // RATIO

    key = jax.random.PRNGKey(0)
    kx, kw_key = jax.random.split(key)
    x = jax.random.normal(kx, (N, C, H, W), dtype=jnp.float32)
    # deterministic synthetic init for Conv2d weight (G, C/groups=8, 9, 9)
    weight = 0.05 * jax.random.normal(kw_key, (G, RATIO, KH, KW), dtype=jnp.float32)

    out = conv_unit_forward(x, weight)
    out = jax.block_until_ready(out)

    # pure-JAX reference (grouped conv) on the same bf16-rounded operands,
    # f32 math -> tight tolerance even though the kernel uses bf16 MXU inputs.
    x_ref = x.astype(jnp.bfloat16).astype(jnp.float32)
    w_ref = weight.astype(jnp.bfloat16).astype(jnp.float32)
    ref = jax.lax.conv_general_dilated(
        x_ref, w_ref,
        window_strides=(STRIDE, STRIDE),
        padding="VALID",
        dimension_numbers=("NCHW", "OIHW", "NCHW"),
        feature_group_count=G,
        precision=jax.lax.Precision.HIGHEST,
    )
    Ho = (H - KH) // STRIDE + 1
    Wo = (W - KW) // STRIDE + 1
    assert out.shape == ref.shape == (N, G, Ho, Wo)
    assert jnp.allclose(out, ref, rtol=1e-3, atol=1e-3), "mismatch vs reference conv"

    print("KERNEL_OK")
</pallas_src>

<mosaic_0001>
module attributes {stable_mosaic.version = 11 : i64} {
  func.func @_conv_unit_kernel(%arg0: i32, %arg1: i32, %arg2: memref<4x8x8x16xbf16, #tpu.memory_space<vmem>>, %arg3: memref<1x9x9x16x2xbf16, #tpu.memory_space<vmem>>, %arg4: memref<1x1x4x4x2xf32, #tpu.memory_space<vmem>>) attributes {dimension_semantics = [#tpu.dimension_semantics<parallel>, #tpu.dimension_semantics<parallel>], iteration_bounds = array<i64: 2, 1>, scalar_prefetch = 0 : i64, scratch_operands = 0 : i64, tpu.core_type = #tpu.core_type<tc>, window_params = [{transform_indices = @transform_0, window_bounds = array<i64: 4, 8, 8, 16>}, {transform_indices = @transform_1, window_bounds = array<i64: 1, 9, 9, 16, 2>}, {transform_indices = @transform_2, window_bounds = array<i64: 1, 1, 4, 4, 2>}]} {
    %c0 = arith.constant 0 : index
    %c0_0 = arith.constant 0 : index
    %c0_1 = arith.constant 0 : index
    %c0_2 = arith.constant 0 : index
    %0 = vector.load %arg2[%c0, %c0_0, %c0_1, %c0_2] : memref<4x8x8x16xbf16, #tpu.memory_space<vmem>>, vector<1x4x8x16xbf16>
    %1 = vector.shape_cast %0 : vector<1x4x8x16xbf16> to vector<4x8x16xbf16>
    %2 = vector.shape_cast %1 : vector<4x8x16xbf16> to vector<32x16xbf16>
    %c0_3 = arith.constant 0 : index
    %c0_4 = arith.constant 0 : index
    %c0_5 = arith.constant 0 : index
    %c0_6 = arith.constant 0 : index
    %c0_7 = arith.constant 0 : index
    %3 = vector.load %arg3[%c0_3, %c0_4, %c0_5, %c0_6, %c0_7] : memref<1x9x9x16x2xbf16, #tpu.memory_space<vmem>>, vector<1x1x1x16x2xbf16>
    %4 = vector.shape_cast %3 : vector<1x1x1x16x2xbf16> to vector<16x2xbf16>
    %cst = arith.constant dense<0.000000e+00> : vector<32x2xf32>
    %5 = tpu.matmul %2, %4, %cst {dimension_numbers = #tpu.dot_dimension_numbers<[1], [0], [0], [1], [0, 0, 1, 1], [], []>} : vector<32x16xbf16>, vector<16x2xbf16>, vector<32x2xf32> -> vector<32x2xf32>
    %c0_8 = arith.constant 0 : index
    %c0_9 = arith.constant 0 : index
    %c2 = arith.constant 2 : index
    %c0_10 = arith.constant 0 : index
    %c0_11 = arith.constant 0 : index
    %6 = vector.load %arg3[%c0_8, %c0_9, %c2, %c0_10, %c0_11] : memref<1x9x9x16x2xbf16, #tpu.memory_space<vmem>>, vector<1x1x1x16x2xbf16>
    %7 = vector.shape_cast %6 : vector<1x1x1x16x2xbf16> to vector<16x2xbf16>
    %cst_12 = arith.constant dense<0.000000e+00> : vector<32x2xf32>
    %8 = tpu.matmul %2, %7, %cst_12 {dimension_numbers = #tpu.dot_dimension_numbers<[1], [0], [0], [1], [0, 0, 1, 1], [], []>} : vector<32x16xbf16>, vector<16x2xbf16>, vector<32x2xf32> -> vector<32x2xf32>
    %c0_13 = arith.constant 0 : index
    %c0_14 = arith.constant 0 : index
    %c4 = arith.constant 4 : index
    %c0_15 = arith.constant 0 : index
    %c0_16 = arith.constant 0 : index
    %9 = vector.load %arg3[%c0_13, %c0_14, %c4, %c0_15, %c0_16] : memref<1x9x9x16x2xbf16, #tpu.memory_space<vmem>>, vector<1x1x1x16x2xbf16>
    %10 = vector.shape_cast %9 : vector<1x1x1x16x2xbf16> to vector<16x2xbf16>
    %cst_17 = arith.constant dense<0.000000e+00> : vector<32x2xf32>
    %11 = tpu.matmul %2, %10, %cst_17 {dimension_numbers = #tpu.dot_dimension_numbers<[1], [0], [0], [1], [0, 0, 1, 1], [], []>} : vector<32x16xbf16>, vector<16x2xbf16>, vector<32x2xf32> -> vector<32x2xf32>
    %c0_18 = arith.constant 0 : index
    %c0_19 = arith.constant 0 : index
    %c6 = arith.constant 6 : index
    %c0_20 = arith.constant 0 : index
    %c0_21 = arith.constant 0 : index
    %12 = vector.load %arg3[%c0_18, %c0_19, %c6, %c0_20, %c0_21] : memref<1x9x9x16x2xbf16, #tpu.memory_space<vmem>>, vector<1x1x1x16x2xbf16>
    %13 = vector.shape_cast %12 : vector<1x1x1x16x2xbf16> to vector<16x2xbf16>
    %cst_22 = arith.constant dense<0.000000e+00> : vector<32x2xf32>
    %14 = tpu.matmul %2, %13, %cst_22 {dimension_numbers = #tpu.dot_dimension_numbers<[1], [0], [0], [1], [0, 0, 1, 1], [], []>} : vector<32x16xbf16>, vector<16x2xbf16>, vector<32x2xf32> -> vector<32x2xf32>
    %c0_23 = arith.constant 0 : index
    %c0_24 = arith.constant 0 : index
    %c8 = arith.constant 8 : index
    %c0_25 = arith.constant 0 : index
    %c0_26 = arith.constant 0 : index
    %15 = vector.load %arg3[%c0_23, %c0_24, %c8, %c0_25, %c0_26] : memref<1x9x9x16x2xbf16, #tpu.memory_space<vmem>>, vector<1x1x1x16x2xbf16>
    %16 = vector.shape_cast %15 : vector<1x1x1x16x2xbf16> to vector<16x2xbf16>
    %cst_27 = arith.constant dense<0.000000e+00> : vector<32x2xf32>
    %17 = tpu.matmul %2, %16, %cst_27 {dimension_numbers = #tpu.dot_dimension_numbers<[1], [0], [0], [1], [0, 0, 1, 1], [], []>} : vector<32x16xbf16>, vector<16x2xbf16>, vector<32x2xf32> -> vector<32x2xf32>
    %c0_28 = arith.constant 0 : index
    %c1 = arith.constant 1 : index
    %c0_29 = arith.constant 0 : index
    %c0_30 = arith.constant 0 : index
    %18 = vector.load %arg2[%c0_28, %c1, %c0_29, %c0_30] : memref<4x8x8x16xbf16, #tpu.memory_space<vmem>>, vector<1x4x8x16xbf16>
    %19 = vector.shape_cast %18 : vector<1x4x8x16xbf16> to vector<4x8x16xbf16>
    %20 = vector.shape_cast %19 : vector<4x8x16xbf16> to vector<32x16xbf16>
    %c0_31 = arith.constant 0 : index
    %c2_32 = arith.constant 2 : index
    %c0_33 = arith.constant 0 : index
    %c0_34 = arith.constant 0 : index
    %c0_35 = arith.constant 0 : index
    %21 = vector.load %arg3[%c0_31, %c2_32, %c0_33, %c0_34, %c0_35] : memref<1x9x9x16x2xbf16, #tpu.memory_space<vmem>>, vector<1x1x1x16x2xbf16>
    %22 = vector.shape_cast %21 : vector<1x1x1x16x2xbf16> to vector<16x2xbf16>
    %cst_36 = arith.constant dense<0.000000e+00> : vector<32x2xf32>
    %23 = tpu.matmul %20, %22, %cst_36 {dimension_numbers = #tpu.dot_dimension_numbers<[1], [0], [0], [1], [0, 0, 1, 1], [], []>} : vector<32x16xbf16>, vector<16x2xbf16>, vector<32x2xf32> -> vector<32x2xf32>
    %24 = arith.addf %5, %23 : vector<32x2xf32>
    %c0_37 = arith.constant 0 : index
    %c2_38 = arith.constant 2 : index
    %c2_39 = arith.constant 2 : index
    %c0_40 = arith.constant 0 : index
    %c0_41 = arith.constant 0 : index
    %25 = vector.load %arg3[%c0_37, %c2_38, %c2_39, %c0_40, %c0_41] : memref<1x9x9x16x2xbf16, #tpu.memory_space<vmem>>, vector<1x1x1x16x2xbf16>
    %26 = vector.shape_cast %25 : vector<1x1x1x16x2xbf16> to vector<16x2xbf16>
    %cst_42 = arith.constant dense<0.000000e+00> : vector<32x2xf32>
    %27 = tpu.matmul %20, %26, %cst_42 {dimension_numbers = #tpu.dot_dimension_numbers<[1], [0], [0], [1], [0, 0, 1, 1], [], []>} : vector<32x16xbf16>, vector<16x2xbf16>, vector<32x2xf32> -> vector<32x2xf32>
    %28 = arith.addf %8, %27 : vector<32x2xf32>
    %c0_43 = arith.constant 0 : index
    %c2_44 = arith.constant 2 : index
    %c4_45 = arith.constant 4 : index
    %c0_46 = arith.constant 0 : index
    %c0_47 = arith.constant 0 : index
    %29 = vector.load %arg3[%c0_43, %c2_44, %c4_45, %c0_46, %c0_47] : memref<1x9x9x16x2xbf16, #tpu.memory_space<vmem>>, vector<1x1x1x16x2xbf16>
    %30 = vector.shape_cast %29 : vector<1x1x1x16x2xbf16> to vector<16x2xbf16>
    %cst_48 = arith.constant dense<0.000000e+00> : vector<32x2xf32>
    %31 = tpu.matmul %20, %30, %cst_48 {dimension_numbers = #tpu.dot_dimension_numbers<[1], [0], [0], [1], [0, 0, 1, 1], [], []>} : vector<32x16xbf16>, vector<16x2xbf16>, vector<32x2xf32> -> vector<32x2xf32>
    %32 = arith.addf %11, %31 : vector<32x2xf32>
    %c0_49 = arith.constant 0 : index
    %c2_50 = arith.constant 2 : index
    %c6_51 = arith.constant 6 : index
    %c0_52 = arith.constant 0 : index
    %c0_53 = arith.constant 0 : index
    %33 = vector.load %arg3[%c0_49, %c2_50, %c6_51, %c0_52, %c0_53] : memref<1x9x9x16x2xbf16, #tpu.memory_space<vmem>>, vector<1x1x1x16x2xbf16>
    %34 = vector.shape_cast %33 : vector<1x1x1x16x2xbf16> to vector<16x2xbf16>
    %cst_54 = arith.constant dense<0.000000e+00> : vector<32x2xf32>
    %35 = tpu.matmul %20, %34, %cst_54 {dimension_numbers = #tpu.dot_dimension_numbers<[1], [0], [0], [1], [0, 0, 1, 1], [], []>} : vector<32x16xbf16>, vector<16x2xbf16>, vector<32x2xf32> -> vector<32x2xf32>
    %36 = arith.addf %14, %35 : vector<32x2xf32>
    %c0_55 = arith.constant 0 : index
    %c2_56 = arith.constant 2 : index
    %c8_57 = arith.constant 8 : index
    %c0_58 = arith.constant 0 : index
    %c0_59 = arith.constant 0 : index
    %37 = vector.load %arg3[%c0_55, %c2_56, %c8_57, %c0_58, %c0_59] : memref<1x9x9x16x2xbf16, #tpu.memory_space<vmem>>, vector<1x1x1x16x2xbf16>
    %38 = vector.shape_cast %37 : vector<1x1x1x16x2xbf16> to vector<16x2xbf16>
    %cst_60 = arith.constant dense<0.000000e+00> : vector<32x2xf32>
    %39 = tpu.matmul %20, %38, %cst_60 {dimension_numbers = #tpu.dot_dimension_numbers<[1], [0], [0], [1], [0, 0, 1, 1], [], []>} : vector<32x16xbf16>, vector<16x2xbf16>, vector<32x2xf32> -> vector<32x2xf32>
    %40 = arith.addf %17, %39 : vector<32x2xf32>
    %c0_61 = arith.constant 0 : index
    %c2_62 = arith.constant 2 : index
    %c0_63 = arith.constant 0 : index
    %c0_64 = arith.constant 0 : index
    %41 = vector.load %arg2[%c0_61, %c2_62, %c0_63, %c0_64] : memref<4x8x8x16xbf16, #tpu.memory_space<vmem>>, vector<1x4x8x16xbf16>
    %42 = vector.shape_cast %41 : vector<1x4x8x16xbf16> to vector<4x8x16xbf16>
    %43 = vector.shape_cast %42 : vector<4x8x16xbf16> to vector<32x16xbf16>
    %c0_65 = arith.constant 0 : index
    %c4_66 = arith.constant 4 : index
    %c0_67 = arith.constant 0 : index
    %c0_68 = arith.constant 0 : index
    %c0_69 = arith.constant 0 : index
    %44 = vector.load %arg3[%c0_65, %c4_66, %c0_67, %c0_68, %c0_69] : memref<1x9x9x16x2xbf16, #tpu.memory_space<vmem>>, vector<1x1x1x16x2xbf16>
    %45 = vector.shape_cast %44 : vector<1x1x1x16x2xbf16> to vector<16x2xbf16>
    %cst_70 = arith.constant dense<0.000000e+00> : vector<32x2xf32>
    %46 = tpu.matmul %43, %45, %cst_70 {dimension_numbers = #tpu.dot_dimension_numbers<[1], [0], [0], [1], [0, 0, 1, 1], [], []>} : vector<32x16xbf16>, vector<16x2xbf16>, vector<32x2xf32> -> vector<32x2xf32>
    %47 = arith.addf %24, %46 : vector<32x2xf32>
    %c0_71 = arith.constant 0 : index
    %c4_72 = arith.constant 4 : index
    %c2_73 = arith.constant 2 : index
    %c0_74 = arith.constant 0 : index
    %c0_75 = arith.constant 0 : index
    %48 = vector.load %arg3[%c0_71, %c4_72, %c2_73, %c0_74, %c0_75] : memref<1x9x9x16x2xbf16, #tpu.memory_space<vmem>>, vector<1x1x1x16x2xbf16>
    %49 = vector.shape_cast %48 : vector<1x1x1x16x2xbf16> to vector<16x2xbf16>
    %cst_76 = arith.constant dense<0.000000e+00> : vector<32x2xf32>
    %50 = tpu.matmul %43, %49, %cst_76 {dimension_numbers = #tpu.dot_dimension_numbers<[1], [0], [0], [1], [0, 0, 1, 1], [], []>} : vector<32x16xbf16>, vector<16x2xbf16>, vector<32x2xf32> -> vector<32x2xf32>
    %51 = arith.addf %28, %50 : vector<32x2xf32>
    %c0_77 = arith.constant 0 : index
    %c4_78 = arith.constant 4 : index
    %c4_79 = arith.constant 4 : index
    %c0_80 = arith.constant 0 : index
    %c0_81 = arith.constant 0 : index
    %52 = vector.load %arg3[%c0_77, %c4_78, %c4_79, %c0_80, %c0_81] : memref<1x9x9x16x2xbf16, #tpu.memory_space<vmem>>, vector<1x1x1x16x2xbf16>
    %53 = vector.shape_cast %52 : vector<1x1x1x16x2xbf16> to vector<16x2xbf16>
    %cst_82 = arith.constant dense<0.000000e+00> : vector<32x2xf32>
    %54 = tpu.matmul %43, %53, %cst_82 {dimension_numbers = #tpu.dot_dimension_numbers<[1], [0], [0], [1], [0, 0, 1, 1], [], []>} : vector<32x16xbf16>, vector<16x2xbf16>, vector<32x2xf32> -> vector<32x2xf32>
    %55 = arith.addf %32, %54 : vector<32x2xf32>
    %c0_83 = arith.constant 0 : index
    %c4_84 = arith.constant 4 : index
    %c6_85 = arith.constant 6 : index
    %c0_86 = arith.constant 0 : index
    %c0_87 = arith.constant 0 : index
    %56 = vector.load %arg3[%c0_83, %c4_84, %c6_85, %c0_86, %c0_87] : memref<1x9x9x16x2xbf16, #tpu.memory_space<vmem>>, vector<1x1x1x16x2xbf16>
    %57 = vector.shape_cast %56 : vector<1x1x1x16x2xbf16> to vector<16x2xbf16>
    %cst_88 = arith.constant dense<0.000000e+00> : vector<32x2xf32>
    %58 = tpu.matmul %43, %57, %cst_88 {dimension_numbers = #tpu.dot_dimension_numbers<[1], [0], [0], [1], [0, 0, 1, 1], [], []>} : vector<32x16xbf16>, vector<16x2xbf16>, vector<32x2xf32> -> vector<32x2xf32>
    %59 = arith.addf %36, %58 : vector<32x2xf32>
    %c0_89 = arith.constant 0 : index
    %c4_90 = arith.constant 4 : index
    %c8_91 = arith.constant 8 : index
    %c0_92 = arith.constant 0 : index
    %c0_93 = arith.constant 0 : index
    %60 = vector.load %arg3[%c0_89, %c4_90, %c8_91, %c0_92, %c0_93] : memref<1x9x9x16x2xbf16, #tpu.memory_space<vmem>>, vector<1x1x1x16x2xbf16>
    %61 = vector.shape_cast %60 : vector<1x1x1x16x2xbf16> to vector<16x2xbf16>
    %cst_94 = arith.constant dense<0.000000e+00> : vector<32x2xf32>
    %62 = tpu.matmul %43, %61, %cst_94 {dimension_numbers = #tpu.dot_dimension_numbers<[1], [0], [0], [1], [0, 0, 1, 1], [], []>} : vector<32x16xbf16>, vector<16x2xbf16>, vector<32x2xf32> -> vector<32x2xf32>
    %63 = arith.addf %40, %62 : vector<32x2xf32>
    %c0_95 = arith.constant 0 : index
    %c3 = arith.constant 3 : index
    %c0_96 = arith.constant 0 : index
    %c0_97 = arith.constant 0 : index
    %64 = vector.load %arg2[%c0_95, %c3, %c0_96, %c0_97] : memref<4x8x8x16xbf16, #tpu.memory_space<vmem>>, vector<1x4x8x16xbf16>
    %65 = vector.shape_cast %64 : vector<1x4x8x16xbf16> to vector<4x8x16xbf16>
    %66 = vector.shape_cast %65 : vector<4x8x16xbf16> to vector<32x16xbf16>
    %c0_98 = arith.constant 0 : index
    %c6_99 = arith.constant 6 : index
    %c0_100 = arith.constant 0 : index
    %c0_101 = arith.constant 0 : index
    %c0_102 = arith.constant 0 : index
    %67 = vector.load %arg3[%c0_98, %c6_99, %c0_100, %c0_101, %c0_102] : memref<1x9x9x16x2xbf16, #tpu.memory_space<vmem>>, vector<1x1x1x16x2xbf16>
    %68 = vector.shape_cast %67 : vector<1x1x1x16x2xbf16> to vector<16x2xbf16>
    %cst_103 = arith.constant dense<0.000000e+00> : vector<32x2xf32>
    %69 = tpu.matmul %66, %68, %cst_103 {dimension_numbers = #tpu.dot_dimension_numbers<[1], [0], [0], [1], [0, 0, 1, 1], [], []>} : vector<32x16xbf16>, vector<16x2xbf16>, vector<32x2xf32> -> vector<32x2xf32>
    %70 = arith.addf %47, %69 : vector<32x2xf32>
    %c0_104 = arith.constant 0 : index
    %c6_105 = arith.constant 6 : index
    %c2_106 = arith.constant 2 : index
    %c0_107 = arith.constant 0 : index
    %c0_108 = arith.constant 0 : index
    %71 = vector.load %arg3[%c0_104, %c6_105, %c2_106, %c0_107, %c0_108] : memref<1x9x9x16x2xbf16, #tpu.memory_space<vmem>>, vector<1x1x1x16x2xbf16>
    %72 = vector.shape_cast %71 : vector<1x1x1x16x2xbf16> to vector<16x2xbf16>
    %cst_109 = arith.constant dense<0.000000e+00> : vector<32x2xf32>
    %73 = tpu.matmul %66, %72, %cst_109 {dimension_numbers = #tpu.dot_dimension_numbers<[1], [0], [0], [1], [0, 0, 1, 1], [], []>} : vector<32x16xbf16>, vector<16x2xbf16>, vector<32x2xf32> -> vector<32x2xf32>
    %74 = arith.addf %51, %73 : vector<32x2xf32>
    %c0_110 = arith.constant 0 : index
    %c6_111 = arith.constant 6 : index
    %c4_112 = arith.constant 4 : index
    %c0_113 = arith.constant 0 : index
    %c0_114 = arith.constant 0 : index
    %75 = vector.load %arg3[%c0_110, %c6_111, %c4_112, %c0_113, %c0_114] : memref<1x9x9x16x2xbf16, #tpu.memory_space<vmem>>, vector<1x1x1x16x2xbf16>
    %76 = vector.shape_cast %75 : vector<1x1x1x16x2xbf16> to vector<16x2xbf16>
    %cst_115 = arith.constant dense<0.000000e+00> : vector<32x2xf32>
    %77 = tpu.matmul %66, %76, %cst_115 {dimension_numbers = #tpu.dot_dimension_numbers<[1], [0], [0], [1], [0, 0, 1, 1], [], []>} : vector<32x16xbf16>, vector<16x2xbf16>, vector<32x2xf32> -> vector<32x2xf32>
    %78 = arith.addf %55, %77 : vector<32x2xf32>
    %c0_116 = arith.constant 0 : index
    %c6_117 = arith.constant 6 : index
    %c6_118 = arith.constant 6 : index
    %c0_119 = arith.constant 0 : index
    %c0_120 = arith.constant 0 : index
    %79 = vector.load %arg3[%c0_116, %c6_117, %c6_118, %c0_119, %c0_120] : memref<1x9x9x16x2xbf16, #tpu.memory_space<vmem>>, vector<1x1x1x16x2xbf16>
    %80 = vector.shape_cast %79 : vector<1x1x1x16x2xbf16> to vector<16x2xbf16>
    %cst_121 = arith.constant dense<0.000000e+00> : vector<32x2xf32>
    %81 = tpu.matmul %66, %80, %cst_121 {dimension_numbers = #tpu.dot_dimension_numbers<[1], [0], [0], [1], [0, 0, 1, 1], [], []>} : vector<32x16xbf16>, vector<16x2xbf16>, vector<32x2xf32> -> vector<32x2xf32>
    %82 = arith.addf %59, %81 : vector<32x2xf32>
    %c0_122 = arith.constant 0 : index
    %c6_123 = arith.constant 6 : index
    %c8_124 = arith.constant 8 : index
    %c0_125 = arith.constant 0 : index
    %c0_126 = arith.constant 0 : index
    %83 = vector.load %arg3[%c0_122, %c6_123, %c8_124, %c0_125, %c0_126] : memref<1x9x9x16x2xbf16, #tpu.memory_space<vmem>>, vector<1x1x1x16x2xbf16>
    %84 = vector.shape_cast %83 : vector<1x1x1x16x2xbf16> to vector<16x2xbf16>
    %cst_127 = arith.constant dense<0.000000e+00> : vector<32x2xf32>
    %85 = tpu.matmul %66, %84, %cst_127 {dimension_numbers = #tpu.dot_dimension_numbers<[1], [0], [0], [1], [0, 0, 1, 1], [], []>} : vector<32x16xbf16>, vector<16x2xbf16>, vector<32x2xf32> -> vector<32x2xf32>
    %86 = arith.addf %63, %85 : vector<32x2xf32>
    %c0_128 = arith.constant 0 : index
    %c4_129 = arith.constant 4 : index
    %c0_130 = arith.constant 0 : index
    %c0_131 = arith.constant 0 : index
    %87 = vector.load %arg2[%c0_128, %c4_129, %c0_130, %c0_131] : memref<4x8x8x16xbf16, #tpu.memory_space<vmem>>, vector<1x4x8x16xbf16>
    %88 = vector.shape_cast %87 : vector<1x4x8x16xbf16> to vector<4x8x16xbf16>
    %89 = vector.shape_cast %88 : vector<4x8x16xbf16> to vector<32x16xbf16>
    %c0_132 = arith.constant 0 : index
    %c8_133 = arith.constant 8 : index
    %c0_134 = arith.constant 0 : index
    %c0_135 = arith.constant 0 : index
    %c0_136 = arith.constant 0 : index
    %90 = vector.load %arg3[%c0_132, %c8_133, %c0_134, %c0_135, %c0_136] : memref<1x9x9x16x2xbf16, #tpu.memory_space<vmem>>, vector<1x1x1x16x2xbf16>
    %91 = vector.shape_cast %90 : vector<1x1x1x16x2xbf16> to vector<16x2xbf16>
    %cst_137 = arith.constant dense<0.000000e+00> : vector<32x2xf32>
    %92 = tpu.matmul %89, %91, %cst_137 {dimension_numbers = #tpu.dot_dimension_numbers<[1], [0], [0], [1], [0, 0, 1, 1], [], []>} : vector<32x16xbf16>, vector<16x2xbf16>, vector<32x2xf32> -> vector<32x2xf32>
    %93 = arith.addf %70, %92 : vector<32x2xf32>
    %c0_138 = arith.constant 0 : index
    %c8_139 = arith.constant 8 : index
    %c2_140 = arith.constant 2 : index
    %c0_141 = arith.constant 0 : index
    %c0_142 = arith.constant 0 : index
    %94 = vector.load %arg3[%c0_138, %c8_139, %c2_140, %c0_141, %c0_142] : memref<1x9x9x16x2xbf16, #tpu.memory_space<vmem>>, vector<1x1x1x16x2xbf16>
    %95 = vector.shape_cast %94 : vector<1x1x1x16x2xbf16> to vector<16x2xbf16>
    %cst_143 = arith.constant dense<0.000000e+00> : vector<32x2xf32>
    %96 = tpu.matmul %89, %95, %cst_143 {dimension_numbers = #tpu.dot_dimension_numbers<[1], [0], [0], [1], [0, 0, 1, 1], [], []>} : vector<32x16xbf16>, vector<16x2xbf16>, vector<32x2xf32> -> vector<32x2xf32>
    %97 = arith.addf %74, %96 : vector<32x2xf32>
    %c0_144 = arith.constant 0 : index
    %c8_145 = arith.constant 8 : index
    %c4_146 = arith.constant 4 : index
    %c0_147 = arith.constant 0 : index
    %c0_148 = arith.constant 0 : index
    %98 = vector.load %arg3[%c0_144, %c8_145, %c4_146, %c0_147, %c0_148] : memref<1x9x9x16x2xbf16, #tpu.memory_space<vmem>>, vector<1x1x1x16x2xbf16>
    %99 = vector.shape_cast %98 : vector<1x1x1x16x2xbf16> to vector<16x2xbf16>
    %cst_149 = arith.constant dense<0.000000e+00> : vector<32x2xf32>
    %100 = tpu.matmul %89, %99, %cst_149 {dimension_numbers = #tpu.dot_dimension_numbers<[1], [0], [0], [1], [0, 0, 1, 1], [], []>} : vector<32x16xbf16>, vector<16x2xbf16>, vector<32x2xf32> -> vector<32x2xf32>
    %101 = arith.addf %78, %100 : vector<32x2xf32>
    %c0_150 = arith.constant 0 : index
    %c8_151 = arith.constant 8 : index
    %c6_152 = arith.constant 6 : index
    %c0_153 = arith.constant 0 : index
    %c0_154 = arith.constant 0 : index
    %102 = vector.load %arg3[%c0_150, %c8_151, %c6_152, %c0_153, %c0_154] : memref<1x9x9x16x2xbf16, #tpu.memory_space<vmem>>, vector<1x1x1x16x2xbf16>
    %103 = vector.shape_cast %102 : vector<1x1x1x16x2xbf16> to vector<16x2xbf16>
    %cst_155 = arith.constant dense<0.000000e+00> : vector<32x2xf32>
    %104 = tpu.matmul %89, %103, %cst_155 {dimension_numbers = #tpu.dot_dimension_numbers<[1], [0], [0], [1], [0, 0, 1, 1], [], []>} : vector<32x16xbf16>, vector<16x2xbf16>, vector<32x2xf32> -> vector<32x2xf32>
    %105 = arith.addf %82, %104 : vector<32x2xf32>
    %c0_156 = arith.constant 0 : index
    %c8_157 = arith.constant 8 : index
    %c8_158 = arith.constant 8 : index
    %c0_159 = arith.constant 0 : index
    %c0_160 = arith.constant 0 : index
    %106 = vector.load %arg3[%c0_156, %c8_157, %c8_158, %c0_159, %c0_160] : memref<1x9x9x16x2xbf16, #tpu.memory_space<vmem>>, vector<1x1x1x16x2xbf16>
    %107 = vector.shape_cast %106 : vector<1x1x1x16x2xbf16> to vector<16x2xbf16>
    %cst_161 = arith.constant dense<0.000000e+00> : vector<32x2xf32>
    %108 = tpu.matmul %89, %107, %cst_161 {dimension_numbers = #tpu.dot_dimension_numbers<[1], [0], [0], [1], [0, 0, 1, 1], [], []>} : vector<32x16xbf16>, vector<16x2xbf16>, vector<32x2xf32> -> vector<32x2xf32>
    %109 = arith.addf %86, %108 : vector<32x2xf32>
    %c1_162 = arith.constant 1 : index
    %c0_163 = arith.constant 0 : index
    %c0_164 = arith.constant 0 : index
    %c0_165 = arith.constant 0 : index
    %110 = vector.load %arg2[%c1_162, %c0_163, %c0_164, %c0_165] : memref<4x8x8x16xbf16, #tpu.memory_space<vmem>>, vector<1x4x8x16xbf16>
    %111 = vector.shape_cast %110 : vector<1x4x8x16xbf16> to vector<4x8x16xbf16>
    %112 = vector.shape_cast %111 : vector<4x8x16xbf16> to vector<32x16xbf16>
    %c0_166 = arith.constant 0 : index
    %c0_167 = arith.constant 0 : index
    %c1_168 = arith.constant 1 : index
    %c0_169 = arith.constant 0 : index
    %c0_170 = arith.constant 0 : index
    %113 = vector.load %arg3[%c0_166, %c0_167, %c1_168, %c0_169, %c0_170] : memref<1x9x9x16x2xbf16, #tpu.memory_space<vmem>>, vector<1x1x1x16x2xbf16>
    %114 = vector.shape_cast %113 : vector<1x1x1x16x2xbf16> to vector<16x2xbf16>
    %cst_171 = arith.constant dense<0.000000e+00> : vector<32x2xf32>
    %115 = tpu.matmul %112, %114, %cst_171 {dimension_numbers = #tpu.dot_dimension_numbers<[1], [0], [0], [1], [0, 0, 1, 1], [], []>} : vector<32x16xbf16>, vector<16x2xbf16>, vector<32x2xf32> -> vector<32x2xf32>
    %116 = arith.addf %93, %115 : vector<32x2xf32>
    %c0_172 = arith.constant 0 : index
    %c0_173 = arith.constant 0 : index
    %c3_174 = arith.constant 3 : index
    %c0_175 = arith.constant 0 : index
    %c0_176 = arith.constant 0 : index
    %117 = vector.load %arg3[%c0_172, %c0_173, %c3_174, %c0_175, %c0_176] : memref<1x9x9x16x2xbf16, #tpu.memory_space<vmem>>, vector<1x1x1x16x2xbf16>
    %118 = vector.shape_cast %117 : vector<1x1x1x16x2xbf16> to vector<16x2xbf16>
    %cst_177 = arith.constant dense<0.000000e+00> : vector<32x2xf32>
    %119 = tpu.matmul %112, %118, %cst_177 {dimension_numbers = #tpu.dot_dimension_numbers<[1], [0], [0], [1], [0, 0, 1, 1], [], []>} : vector<32x16xbf16>, vector<16x2xbf16>, vector<32x2xf32> -> vector<32x2xf32>
    %120 = arith.addf %97, %119 : vector<32x2xf32>
    %c0_178 = arith.constant 0 : index
    %c0_179 = arith.constant 0 : index
    %c5 = arith.constant 5 : index
    %c0_180 = arith.constant 0 : index
    %c0_181 = arith.constant 0 : index
    %121 = vector.load %arg3[%c0_178, %c0_179, %c5, %c0_180, %c0_181] : memref<1x9x9x16x2xbf16, #tpu.memory_space<vmem>>, vector<1x1x1x16x2xbf16>
    %122 = vector.shape_cast %121 : vector<1x1x1x16x2xbf16> to vector<16x2xbf16>
    %cst_182 = arith.constant dense<0.000000e+00> : vector<32x2xf32>
    %123 = tpu.matmul %112, %122, %cst_182 {dimension_numbers = #tpu.dot_dimension_numbers<[1], [0], [0], [1], [0, 0, 1, 1], [], []>} : vector<32x16xbf16>, vector<16x2xbf16>, vector<32x2xf32> -> vector<32x2xf32>
    %124 = arith.addf %101, %123 : vector<32x2xf32>
    %c0_183 = arith.constant 0 : index
    %c0_184 = arith.constant 0 : index
    %c7 = arith.constant 7 : index
    %c0_185 = arith.constant 0 : index
    %c0_186 = arith.constant 0 : index
    %125 = vector.load %arg3[%c0_183, %c0_184, %c7, %c0_185, %c0_186] : memref<1x9x9x16x2xbf16, #tpu.memory_space<vmem>>, vector<1x1x1x16x2xbf16>
    %126 = vector.shape_cast %125 : vector<1x1x1x16x2xbf16> to vector<16x2xbf16>
    %cst_187 = arith.constant dense<0.000000e+00> : vector<32x2xf32>
    %127 = tpu.matmul %112, %126, %cst_187 {dimension_numbers = #tpu.dot_dimension_numbers<[1], [0], [0], [1], [0, 0, 1, 1], [], []>} : vector<32x16xbf16>, vector<16x2xbf16>, vector<32x2xf32> -> vector<32x2xf32>
    %128 = arith.addf %105, %127 : vector<32x2xf32>
    %c1_188 = arith.constant 1 : index
    %c1_189 = arith.constant 1 : index
    %c0_190 = arith.constant 0 : index
    %c0_191 = arith.constant 0 : index
    %129 = vector.load %arg2[%c1_188, %c1_189, %c0_190, %c0_191] : memref<4x8x8x16xbf16, #tpu.memory_space<vmem>>, vector<1x4x8x16xbf16>
    %130 = vector.shape_cast %129 : vector<1x4x8x16xbf16> to vector<4x8x16xbf16>
    %131 = vector.shape_cast %130 : vector<4x8x16xbf16> to vector<32x16xbf16>
    %c0_192 = arith.constant 0 : index
    %c2_193 = arith.constant 2 : index
    %c1_194 = arith.constant 1 : index
    %c0_195 = arith.constant 0 : index
    %c0_196 = arith.constant 0 : index
    %132 = vector.load %arg3[%c0_192, %c2_193, %c1_194, %c0_195, %c0_196] : memref<1x9x9x16x2xbf16, #tpu.memory_space<vmem>>, vector<1x1x1x16x2xbf16>
    %133 = vector.shape_cast %132 : vector<1x1x1x16x2xbf16> to vector<16x2xbf16>
    %cst_197 = arith.constant dense<0.000000e+00> : vector<32x2xf32>
    %134 = tpu.matmul %131, %133, %cst_197 {dimension_numbers = #tpu.dot_dimension_numbers<[1], [0], [0], [1], [0, 0, 1, 1], [], []>} : vector<32x16xbf16>, vector<16x2xbf16>, vector<32x2xf32> -> vector<32x2xf32>
    %135 = arith.addf %116, %134 : vector<32x2xf32>
    %c0_198 = arith.constant 0 : index
    %c2_199 = arith.constant 2 : index
    %c3_200 = arith.constant 3 : index
    %c0_201 = arith.constant 0 : index
    %c0_202 = arith.constant 0 : index
    %136 = vector.load %arg3[%c0_198, %c2_199, %c3_200, %c0_201, %c0_202] : memref<1x9x9x16x2xbf16, #tpu.memory_space<vmem>>, vector<1x1x1x16x2xbf16>
    %137 = vector.shape_cast %136 : vector<1x1x1x16x2xbf16> to vector<16x2xbf16>
    %cst_203 = arith.constant dense<0.000000e+00> : vector<32x2xf32>
    %138 = tpu.matmul %131, %137, %cst_203 {dimension_numbers = #tpu.dot_dimension_numbers<[1], [0], [0], [1], [0, 0, 1, 1], [], []>} : vector<32x16xbf16>, vector<16x2xbf16>, vector<32x2xf32> -> vector<32x2xf32>
    %139 = arith.addf %120, %138 : vector<32x2xf32>
    %c0_204 = arith.constant 0 : index
    %c2_205 = arith.constant 2 : index
    %c5_206 = arith.constant 5 : index
    %c0_207 = arith.constant 0 : index
    %c0_208 = arith.constant 0 : index
    %140 = vector.load %arg3[%c0_204, %c2_205, %c5_206, %c0_207, %c0_208] : memref<1x9x9x16x2xbf16, #tpu.memory_space<vmem>>, vector<1x1x1x16x2xbf16>
    %141 = vector.shape_cast %140 : vector<1x1x1x16x2xbf16> to vector<16x2xbf16>
    %cst_209 = arith.constant dense<0.000000e+00> : vector<32x2xf32>
    %142 = tpu.matmul %131, %141, %cst_209 {dimension_numbers = #tpu.dot_dimension_numbers<[1], [0], [0], [1], [0, 0, 1, 1], [], []>} : vector<32x16xbf16>, vector<16x2xbf16>, vector<32x2xf32> -> vector<32x2xf32>
    %143 = arith.addf %124, %142 : vector<32x2xf32>
    %c0_210 = arith.constant 0 : index
    %c2_211 = arith.constant 2 : index
    %c7_212 = arith.constant 7 : index
    %c0_213 = arith.constant 0 : index
    %c0_214 = arith.constant 0 : index
    %144 = vector.load %arg3[%c0_210, %c2_211, %c7_212, %c0_213, %c0_214] : memref<1x9x9x16x2xbf16, #tpu.memory_space<vmem>>, vector<1x1x1x16x2xbf16>
    %145 = vector.shape_cast %144 : vector<1x1x1x16x2xbf16> to vector<16x2xbf16>
    %cst_215 = arith.constant dense<0.000000e+00> : vector<32x2xf32>
    %146 = tpu.matmul %131, %145, %cst_215 {dimension_numbers = #tpu.dot_dimension_numbers<[1], [0], [0], [1], [0, 0, 1, 1], [], []>} : vector<32x16xbf16>, vector<16x2xbf16>, vector<32x2xf32> -> vector<32x2xf32>
    %147 = arith.addf %128, %146 : vector<32x2xf32>
    %c1_216 = arith.constant 1 : index
    %c2_217 = arith.constant 2 : index
    %c0_218 = arith.constant 0 : index
    %c0_219 = arith.constant 0 : index
    %148 = vector.load %arg2[%c1_216, %c2_217, %c0_218, %c0_219] : memref<4x8x8x16xbf16, #tpu.memory_space<vmem>>, vector<1x4x8x16xbf16>
    %149 = vector.shape_cast %148 : vector<1x4x8x16xbf16> to vector<4x8x16xbf16>
    %150 = vector.shape_cast %149 : vector<4x8x16xbf16> to vector<32x16xbf16>
    %c0_220 = arith.constant 0 : index
    %c4_221 = arith.constant 4 : index
    %c1_222 = arith.constant 1 : index
    %c0_223 = arith.constant 0 : index
    %c0_224 = arith.constant 0 : index
    %151 = vector.load %arg3[%c0_220, %c4_221, %c1_222, %c0_223, %c0_224] : memref<1x9x9x16x2xbf16, #tpu.memory_space<vmem>>, vector<1x1x1x16x2xbf16>
    %152 = vector.shape_cast %151 : vector<1x1x1x16x2xbf16> to vector<16x2xbf16>
    %cst_225 = arith.constant dense<0.000000e+00> : vector<32x2xf32>
    %153 = tpu.matmul %150, %152, %cst_225 {dimension_numbers = #tpu.dot_dimension_numbers<[1], [0], [0], [1], [0, 0, 1, 1], [], []>} : vector<32x16xbf16>, vector<16x2xbf16>, vector<32x2xf32> -> vector<32x2xf32>
    %154 = arith.addf %135, %153 : vector<32x2xf32>
    %c0_226 = arith.constant 0 : index
    %c4_227 = arith.constant 4 : index
    %c3_228 = arith.constant 3 : index
    %c0_229 = arith.constant 0 : index
    %c0_230 = arith.constant 0 : index
    %155 = vector.load %arg3[%c0_226, %c4_227, %c3_228, %c0_229, %c0_230] : memref<1x9x9x16x2xbf16, #tpu.memory_space<vmem>>, vector<1x1x1x16x2xbf16>
    %156 = vector.shape_cast %155 : vector<1x1x1x16x2xbf16> to vector<16x2xbf16>
    %cst_231 = arith.constant dense<0.000000e+00> : vector<32x2xf32>
    %157 = tpu.matmul %150, %156, %cst_231 {dimension_numbers = #tpu.dot_dimension_numbers<[1], [0], [0], [1], [0, 0, 1, 1], [], []>} : vector<32x16xbf16>, vector<16x2xbf16>, vector<32x2xf32> -> vector<32x2xf32>
    %158 = arith.addf %139, %157 : vector<32x2xf32>
    %c0_232 = arith.constant 0 : index
    %c4_233 = arith.constant 4 : index
    %c5_234 = arith.constant 5 : index
    %c0_235 = arith.constant 0 : index
    %c0_236 = arith.constant 0 : index
    %159 = vector.load %arg3[%c0_232, %c4_233, %c5_234, %c0_235, %c0_236] : memref<1x9x9x16x2xbf16, #tpu.memory_space<vmem>>, vector<1x1x1x16x2xbf16>
    %160 = vector.shape_cast %159 : vector<1x1x1x16x2xbf16> to vector<16x2xbf16>
    %cst_237 = arith.constant dense<0.000000e+00> : vector<32x2xf32>
    %161 = tpu.matmul %150, %160, %cst_237 {dimension_numbers = #tpu.dot_dimension_numbers<[1], [0], [0], [1], [0, 0, 1, 1], [], []>} : vector<32x16xbf16>, vector<16x2xbf16>, vector<32x2xf32> -> vector<32x2xf32>
    %162 = arith.addf %143, %161 : vector<32x2xf32>
    %c0_238 = arith.constant 0 : index
    %c4_239 = arith.constant 4 : index
    %c7_240 = arith.constant 7 : index
    %c0_241 = arith.constant 0 : index
    %c0_242 = arith.constant 0 : index
    %163 = vector.load %arg3[%c0_238, %c4_239, %c7_240, %c0_241, %c0_242] : memref<1x9x9x16x2xbf16, #tpu.memory_space<vmem>>, vector<1x1x1x16x2xbf16>
    %164 = vector.shape_cast %163 : vector<1x1x1x16x2xbf16> to vector<16x2xbf16>
    %cst_243 = arith.constant dense<0.000000e+00> : vector<32x2xf32>
    %165 = tpu.matmul %150, %164, %cst_243 {dimension_numbers = #tpu.dot_dimension_numbers<[1], [0], [0], [1], [0, 0, 1, 1], [], []>} : vector<32x16xbf16>, vector<16x2xbf16>, vector<32x2xf32> -> vector<32x2xf32>
    %166 = arith.addf %147, %165 : vector<32x2xf32>
    %c1_244 = arith.constant 1 : index
    %c3_245 = arith.constant 3 : index
    %c0_246 = arith.constant 0 : index
    %c0_247 = arith.constant 0 : index
    %167 = vector.load %arg2[%c1_244, %c3_245, %c0_246, %c0_247] : memref<4x8x8x16xbf16, #tpu.memory_space<vmem>>, vector<1x4x8x16xbf16>
    %168 = vector.shape_cast %167 : vector<1x4x8x16xbf16> to vector<4x8x16xbf16>
    %169 = vector.shape_cast %168 : vector<4x8x16xbf16> to vector<32x16xbf16>
    %c0_248 = arith.constant 0 : index
    %c6_249 = arith.constant 6 : index
    %c1_250 = arith.constant 1 : index
    %c0_251 = arith.constant 0 : index
    %c0_252 = arith.constant 0 : index
    %170 = vector.load %arg3[%c0_248, %c6_249, %c1_250, %c0_251, %c0_252] : memref<1x9x9x16x2xbf16, #tpu.memory_space<vmem>>, vector<1x1x1x16x2xbf16>
    %171 = vector.shape_cast %170 : vector<1x1x1x16x2xbf16> to vector<16x2xbf16>
    %cst_253 = arith.constant dense<0.000000e+00> : vector<32x2xf32>
    %172 = tpu.matmul %169, %171, %cst_253 {dimension_numbers = #tpu.dot_dimension_numbers<[1], [0], [0], [1], [0, 0, 1, 1], [], []>} : vector<32x16xbf16>, vector<16x2xbf16>, vector<32x2xf32> -> vector<32x2xf32>
    %173 = arith.addf %154, %172 : vector<32x2xf32>
    %c0_254 = arith.constant 0 : index
    %c6_255 = arith.constant 6 : index
    %c3_256 = arith.constant 3 : index
    %c0_257 = arith.constant 0 : index
    %c0_258 = arith.constant 0 : index
    %174 = vector.load %arg3[%c0_254, %c6_255, %c3_256, %c0_257, %c0_258] : memref<1x9x9x16x2xbf16, #tpu.memory_space<vmem>>, vector<1x1x1x16x2xbf16>
    %175 = vector.shape_cast %174 : vector<1x1x1x16x2xbf16> to vector<16x2xbf16>
    %cst_259 = arith.constant dense<0.000000e+00> : vector<32x2xf32>
    %176 = tpu.matmul %169, %175, %cst_259 {dimension_numbers = #tpu.dot_dimension_numbers<[1], [0], [0], [1], [0, 0, 1, 1], [], []>} : vector<32x16xbf16>, vector<16x2xbf16>, vector<32x2xf32> -> vector<32x2xf32>
    %177 = arith.addf %158, %176 : vector<32x2xf32>
    %c0_260 = arith.constant 0 : index
    %c6_261 = arith.constant 6 : index
    %c5_262 = arith.constant 5 : index
    %c0_263 = arith.constant 0 : index
    %c0_264 = arith.constant 0 : index
    %178 = vector.load %arg3[%c0_260, %c6_261, %c5_262, %c0_263, %c0_264] : memref<1x9x9x16x2xbf16, #tpu.memory_space<vmem>>, vector<1x1x1x16x2xbf16>
    %179 = vector.shape_cast %178 : vector<1x1x1x16x2xbf16> to vector<16x2xbf16>
    %cst_265 = arith.constant dense<0.000000e+00> : vector<32x2xf32>
    %180 = tpu.matmul %169, %179, %cst_265 {dimension_numbers = #tpu.dot_dimension_numbers<[1], [0], [0], [1], [0, 0, 1, 1], [], []>} : vector<32x16xbf16>, vector<16x2xbf16>, vector<32x2xf32> -> vector<32x2xf32>
    %181 = arith.addf %162, %180 : vector<32x2xf32>
    %c0_266 = arith.constant 0 : index
    %c6_267 = arith.constant 6 : index
    %c7_268 = arith.constant 7 : index
    %c0_269 = arith.constant 0 : index
    %c0_270 = arith.constant 0 : index
    %182 = vector.load %arg3[%c0_266, %c6_267, %c7_268, %c0_269, %c0_270] : memref<1x9x9x16x2xbf16, #tpu.memory_space<vmem>>, vector<1x1x1x16x2xbf16>
    %183 = vector.shape_cast %182 : vector<1x1x1x16x2xbf16> to vector<16x2xbf16>
    %cst_271 = arith.constant dense<0.000000e+00> : vector<32x2xf32>
    %184 = tpu.matmul %169, %183, %cst_271 {dimension_numbers = #tpu.dot_dimension_numbers<[1], [0], [0], [1], [0, 0, 1, 1], [], []>} : vector<32x16xbf16>, vector<16x2xbf16>, vector<32x2xf32> -> vector<32x2xf32>
    %185 = arith.addf %166, %184 : vector<32x2xf32>
    %c1_272 = arith.constant 1 : index
    %c4_273 = arith.constant 4 : index
    %c0_274 = arith.constant 0 : index
    %c0_275 = arith.constant 0 : index
    %186 = vector.load %arg2[%c1_272, %c4_273, %c0_274, %c0_275] : memref<4x8x8x16xbf16, #tpu.memory_space<vmem>>, vector<1x4x8x16xbf16>
    %187 = vector.shape_cast %186 : vector<1x4x8x16xbf16> to vector<4x8x16xbf16>
    %188 = vector.shape_cast %187 : vector<4x8x16xbf16> to vector<32x16xbf16>
    %c0_276 = arith.constant 0 : index
    %c8_277 = arith.constant 8 : index
    %c1_278 = arith.constant 1 : index
    %c0_279 = arith.constant 0 : index
    %c0_280 = arith.constant 0 : index
    %189 = vector.load %arg3[%c0_276, %c8_277, %c1_278, %c0_279, %c0_280] : memref<1x9x9x16x2xbf16, #tpu.memory_space<vmem>>, vector<1x1x1x16x2xbf16>
    %190 = vector.shape_cast %189 : vector<1x1x1x16x2xbf16> to vector<16x2xbf16>
    %cst_281 = arith.constant dense<0.000000e+00> : vector<32x2xf32>
    %191 = tpu.matmul %188, %190, %cst_281 {dimension_numbers = #tpu.dot_dimension_numbers<[1], [0], [0], [1], [0, 0, 1, 1], [], []>} : vector<32x16xbf16>, vector<16x2xbf16>, vector<32x2xf32> -> vector<32x2xf32>
    %192 = arith.addf %173, %191 : vector<32x2xf32>
    %c0_282 = arith.constant 0 : index
    %c8_283 = arith.constant 8 : index
    %c3_284 = arith.constant 3 : index
    %c0_285 = arith.constant 0 : index
    %c0_286 = arith.constant 0 : index
    %193 = vector.load %arg3[%c0_282, %c8_283, %c3_284, %c0_285, %c0_286] : memref<1x9x9x16x2xbf16, #tpu.memory_space<vmem>>, vector<1x1x1x16x2xbf16>
    %194 = vector.shape_cast %193 : vector<1x1x1x16x2xbf16> to vector<16x2xbf16>
    %cst_287 = arith.constant dense<0.000000e+00> : vector<32x2xf32>
    %195 = tpu.matmul %188, %194, %cst_287 {dimension_numbers = #tpu.dot_dimension_numbers<[1], [0], [0], [1], [0, 0, 1, 1], [], []>} : vector<32x16xbf16>, vector<16x2xbf16>, vector<32x2xf32> -> vector<32x2xf32>
    %196 = arith.addf %177, %195 : vector<32x2xf32>
    %c0_288 = arith.constant 0 : index
    %c8_289 = arith.constant 8 : index
    %c5_290 = arith.constant 5 : index
    %c0_291 = arith.constant 0 : index
    %c0_292 = arith.constant 0 : index
    %197 = vector.load %arg3[%c0_288, %c8_289, %c5_290, %c0_291, %c0_292] : memref<1x9x9x16x2xbf16, #tpu.memory_space<vmem>>, vector<1x1x1x16x2xbf16>
    %198 = vector.shape_cast %197 : vector<1x1x1x16x2xbf16> to vector<16x2xbf16>
    %cst_293 = arith.constant dense<0.000000e+00> : vector<32x2xf32>
    %199 = tpu.matmul %188, %198, %cst_293 {dimension_numbers = #tpu.dot_dimension_numbers<[1], [0], [0], [1], [0, 0, 1, 1], [], []>} : vector<32x16xbf16>, vector<16x2xbf16>, vector<32x2xf32> -> vector<32x2xf32>
    %200 = arith.addf %181, %199 : vector<32x2xf32>
    %c0_294 = arith.constant 0 : index
    %c8_295 = arith.constant 8 : index
    %c7_296 = arith.constant 7 : index
    %c0_297 = arith.constant 0 : index
    %c0_298 = arith.constant 0 : index
    %201 = vector.load %arg3[%c0_294, %c8_295, %c7_296, %c0_297, %c0_298] : memref<1x9x9x16x2xbf16, #tpu.memory_space<vmem>>, vector<1x1x1x16x2xbf16>
    %202 = vector.shape_cast %201 : vector<1x1x1x16x2xbf16> to vector<16x2xbf16>
    %cst_299 = arith.constant dense<0.000000e+00> : vector<32x2xf32>
    %203 = tpu.matmul %188, %202, %cst_299 {dimension_numbers = #tpu.dot_dimension_numbers<[1], [0], [0], [1], [0, 0, 1, 1], [], []>} : vector<32x16xbf16>, vector<16x2xbf16>, vector<32x2xf32> -> vector<32x2xf32>
    %204 = arith.addf %185, %203 : vector<32x2xf32>
    %c2_300 = arith.constant 2 : index
    %c0_301 = arith.constant 0 : index
    %c0_302 = arith.constant 0 : index
    %c0_303 = arith.constant 0 : index
    %205 = vector.load %arg2[%c2_300, %c0_301, %c0_302, %c0_303] : memref<4x8x8x16xbf16, #tpu.memory_space<vmem>>, vector<1x4x8x16xbf16>
    %206 = vector.shape_cast %205 : vector<1x4x8x16xbf16> to vector<4x8x16xbf16>
    %207 = vector.shape_cast %206 : vector<4x8x16xbf16> to vector<32x16xbf16>
    %c0_304 = arith.constant 0 : index
    %c1_305 = arith.constant 1 : index
    %c0_306 = arith.constant 0 : index
    %c0_307 = arith.constant 0 : index
    %c0_308 = arith.constant 0 : index
    %208 = vector.load %arg3[%c0_304, %c1_305, %c0_306, %c0_307, %c0_308] : memref<1x9x9x16x2xbf16, #tpu.memory_space<vmem>>, vector<1x1x1x16x2xbf16>
    %209 = vector.shape_cast %208 : vector<1x1x1x16x2xbf16> to vector<16x2xbf16>
    %cst_309 = arith.constant dense<0.000000e+00> : vector<32x2xf32>
    %210 = tpu.matmul %207, %209, %cst_309 {dimension_numbers = #tpu.dot_dimension_numbers<[1], [0], [0], [1], [0, 0, 1, 1], [], []>} : vector<32x16xbf16>, vector<16x2xbf16>, vector<32x2xf32> -> vector<32x2xf32>
    %211 = arith.addf %192, %210 : vector<32x2xf32>
    %c0_310 = arith.constant 0 : index
    %c1_311 = arith.constant 1 : index
    %c2_312 = arith.constant 2 : index
    %c0_313 = arith.constant 0 : index
    %c0_314 = arith.constant 0 : index
    %212 = vector.load %arg3[%c0_310, %c1_311, %c2_312, %c0_313, %c0_314] : memref<1x9x9x16x2xbf16, #tpu.memory_space<vmem>>, vector<1x1x1x16x2xbf16>
    %213 = vector.shape_cast %212 : vector<1x1x1x16x2xbf16> to vector<16x2xbf16>
    %cst_315 = arith.constant dense<0.000000e+00> : vector<32x2xf32>
    %214 = tpu.matmul %207, %213, %cst_315 {dimension_numbers = #tpu.dot_dimension_numbers<[1], [0], [0], [1], [0, 0, 1, 1], [], []>} : vector<32x16xbf16>, vector<16x2xbf16>, vector<32x2xf32> -> vector<32x2xf32>
    %215 = arith.addf %196, %214 : vector<32x2xf32>
    %c0_316 = arith.constant 0 : index
    %c1_317 = arith.constant 1 : index
    %c4_318 = arith.constant 4 : index
    %c0_319 = arith.constant 0 : index
    %c0_320 = arith.constant 0 : index
    %216 = vector.load %arg3[%c0_316, %c1_317, %c4_318, %c0_319, %c0_320] : memref<1x9x9x16x2xbf16, #tpu.memory_space<vmem>>, vector<1x1x1x16x2xbf16>
    %217 = vector.shape_cast %216 : vector<1x1x1x16x2xbf16> to vector<16x2xbf16>
    %cst_321 = arith.constant dense<0.000000e+00> : vector<32x2xf32>
    %218 = tpu.matmul %207, %217, %cst_321 {dimension_numbers = #tpu.dot_dimension_numbers<[1], [0], [0], [1], [0, 0, 1, 1], [], []>} : vector<32x16xbf16>, vector<16x2xbf16>, vector<32x2xf32> -> vector<32x2xf32>
    %219 = arith.addf %200, %218 : vector<32x2xf32>
    %c0_322 = arith.constant 0 : index
    %c1_323 = arith.constant 1 : index
    %c6_324 = arith.constant 6 : index
    %c0_325 = arith.constant 0 : index
    %c0_326 = arith.constant 0 : index
    %220 = vector.load %arg3[%c0_322, %c1_323, %c6_324, %c0_325, %c0_326] : memref<1x9x9x16x2xbf16, #tpu.memory_space<vmem>>, vector<1x1x1x16x2xbf16>
    %221 = vector.shape_cast %220 : vector<1x1x1x16x2xbf16> to vector<16x2xbf16>
    %cst_327 = arith.constant dense<0.000000e+00> : vector<32x2xf32>
    %222 = tpu.matmul %207, %221, %cst_327 {dimension_numbers = #tpu.dot_dimension_numbers<[1], [0], [0], [1], [0, 0, 1, 1], [], []>} : vector<32x16xbf16>, vector<16x2xbf16>, vector<32x2xf32> -> vector<32x2xf32>
    %223 = arith.addf %204, %222 : vector<32x2xf32>
    %c0_328 = arith.constant 0 : index
    %c1_329 = arith.constant 1 : index
    %c8_330 = arith.constant 8 : index
    %c0_331 = arith.constant 0 : index
    %c0_332 = arith.constant 0 : index
    %224 = vector.load %arg3[%c0_328, %c1_329, %c8_330, %c0_331, %c0_332] : memref<1x9x9x16x2xbf16, #tpu.memory_space<vmem>>, vector<1x1x1x16x2xbf16>
    %225 = vector.shape_cast %224 : vector<1x1x1x16x2xbf16> to vector<16x2xbf16>
    %cst_333 = arith.constant dense<0.000000e+00> : vector<32x2xf32>
    %226 = tpu.matmul %207, %225, %cst_333 {dimension_numbers = #tpu.dot_dimension_numbers<[1], [0], [0], [1], [0, 0, 1, 1], [], []>} : vector<32x16xbf16>, vector<16x2xbf16>, vector<32x2xf32> -> vector<32x2xf32>
    %227 = arith.addf %109, %226 : vector<32x2xf32>
    %c2_334 = arith.constant 2 : index
    %c1_335 = arith.constant 1 : index
    %c0_336 = arith.constant 0 : index
    %c0_337 = arith.constant 0 : index
    %228 = vector.load %arg2[%c2_334, %c1_335, %c0_336, %c0_337] : memref<4x8x8x16xbf16, #tpu.memory_space<vmem>>, vector<1x4x8x16xbf16>
    %229 = vector.shape_cast %228 : vector<1x4x8x16xbf16> to vector<4x8x16xbf16>
    %230 = vector.shape_cast %229 : vector<4x8x16xbf16> to vector<32x16xbf16>
    %c0_338 = arith.constant 0 : index
    %c3_339 = arith.constant 3 : index
    %c0_340 = arith.constant 0 : index
    %c0_341 = arith.constant 0 : index
    %c0_342 = arith.constant 0 : index
    %231 = vector.load %arg3[%c0_338, %c3_339, %c0_340, %c0_341, %c0_342] : memref<1x9x9x16x2xbf16, #tpu.memory_space<vmem>>, vector<1x1x1x16x2xbf16>
    %232 = vector.shape_cast %231 : vector<1x1x1x16x2xbf16> to vector<16x2xbf16>
    %cst_343 = arith.constant dense<0.000000e+00> : vector<32x2xf32>
    %233 = tpu.matmul %230, %232, %cst_343 {dimension_numbers = #tpu.dot_dimension_numbers<[1], [0], [0], [1], [0, 0, 1, 1], [], []>} : vector<32x16xbf16>, vector<16x2xbf16>, vector<32x2xf32> -> vector<32x2xf32>
    %234 = arith.addf %211, %233 : vector<32x2xf32>
    %c0_344 = arith.constant 0 : index
    %c3_345 = arith.constant 3 : index
    %c2_346 = arith.constant 2 : index
    %c0_347 = arith.constant 0 : index
    %c0_348 = arith.constant 0 : index
    %235 = vector.load %arg3[%c0_344, %c3_345, %c2_346, %c0_347, %c0_348] : memref<1x9x9x16x2xbf16, #tpu.memory_space<vmem>>, vector<1x1x1x16x2xbf16>
    %236 = vector.shape_cast %235 : vector<1x1x1x16x2xbf16> to vector<16x2xbf16>
    %cst_349 = arith.constant dense<0.000000e+00> : vector<32x2xf32>
    %237 = tpu.matmul %230, %236, %cst_349 {dimension_numbers = #tpu.dot_dimension_numbers<[1], [0], [0], [1], [0, 0, 1, 1], [], []>} : vector<32x16xbf16>, vector<16x2xbf16>, vector<32x2xf32> -> vector<32x2xf32>
    %238 = arith.addf %215, %237 : vector<32x2xf32>
    %c0_350 = arith.constant 0 : index
    %c3_351 = arith.constant 3 : index
    %c4_352 = arith.constant 4 : index
    %c0_353 = arith.constant 0 : index
    %c0_354 = arith.constant 0 : index
    %239 = vector.load %arg3[%c0_350, %c3_351, %c4_352, %c0_353, %c0_354] : memref<1x9x9x16x2xbf16, #tpu.memory_space<vmem>>, vector<1x1x1x16x2xbf16>
    %240 = vector.shape_cast %239 : vector<1x1x1x16x2xbf16> to vector<16x2xbf16>
    %cst_355 = arith.constant dense<0.000000e+00> : vector<32x2xf32>
    %241 = tpu.matmul %230, %240, %cst_355 {dimension_numbers = #tpu.dot_dimension_numbers<[1], [0], [0], [1], [0, 0, 1, 1], [], []>} : vector<32x16xbf16>, vector<16x2xbf16>, vector<32x2xf32> -> vector<32x2xf32>
    %242 = arith.addf %219, %241 : vector<32x2xf32>
    %c0_356 = arith.constant 0 : index
    %c3_357 = arith.constant 3 : index
    %c6_358 = arith.constant 6 : index
    %c0_359 = arith.constant 0 : index
    %c0_360 = arith.constant 0 : index
    %243 = vector.load %arg3[%c0_356, %c3_357, %c6_358, %c0_359, %c0_360] : memref<1x9x9x16x2xbf16, #tpu.memory_space<vmem>>, vector<1x1x1x16x2xbf16>
    %244 = vector.shape_cast %243 : vector<1x1x1x16x2xbf16> to vector<16x2xbf16>
    %cst_361 = arith.constant dense<0.000000e+00> : vector<32x2xf32>
    %245 = tpu.matmul %230, %244, %cst_361 {dimension_numbers = #tpu.dot_dimension_numbers<[1], [0], [0], [1], [0, 0, 1, 1], [], []>} : vector<32x16xbf16>, vector<16x2xbf16>, vector<32x2xf32> -> vector<32x2xf32>
    %246 = arith.addf %223, %245 : vector<32x2xf32>
    %c0_362 = arith.constant 0 : index
    %c3_363 = arith.constant 3 : index
    %c8_364 = arith.constant 8 : index
    %c0_365 = arith.constant 0 : index
    %c0_366 = arith.constant 0 : index
    %247 = vector.load %arg3[%c0_362, %c3_363, %c8_364, %c0_365, %c0_366] : memref<1x9x9x16x2xbf16, #tpu.memory_space<vmem>>, vector<1x1x1x16x2xbf16>
    %248 = vector.shape_cast %247 : vector<1x1x1x16x2xbf16> to vector<16x2xbf16>
    %cst_367 = arith.constant dense<0.000000e+00> : vector<32x2xf32>
    %249 = tpu.matmul %230, %248, %cst_367 {dimension_numbers = #tpu.dot_dimension_numbers<[1], [0], [0], [1], [0, 0, 1, 1], [], []>} : vector<32x16xbf16>, vector<16x2xbf16>, vector<32x2xf32> -> vector<32x2xf32>
    %250 = arith.addf %227, %249 : vector<32x2xf32>
    %c2_368 = arith.constant 2 : index
    %c2_369 = arith.constant 2 : index
    %c0_370 = arith.constant 0 : index
    %c0_371 = arith.constant 0 : index
    %251 = vector.load %arg2[%c2_368, %c2_369, %c0_370, %c0_371] : memref<4x8x8x16xbf16, #tpu.memory_space<vmem>>, vector<1x4x8x16xbf16>
    %252 = vector.shape_cast %251 : vector<1x4x8x16xbf16> to vector<4x8x16xbf16>
    %253 = vector.shape_cast %252 : vector<4x8x16xbf16> to vector<32x16xbf16>
    %c0_372 = arith.constant 0 : index
    %c5_373 = arith.constant 5 : index
    %c0_374 = arith.constant 0 : index
    %c0_375 = arith.constant 0 : index
    %c0_376 = arith.constant 0 : index
    %254 = vector.load %arg3[%c0_372, %c5_373, %c0_374, %c0_375, %c0_376] : memref<1x9x9x16x2xbf16, #tpu.memory_space<vmem>>, vector<1x1x1x16x2xbf16>
    %255 = vector.shape_cast %254 : vector<1x1x1x16x2xbf16> to vector<16x2xbf16>
    %cst_377 = arith.constant dense<0.000000e+00> : vector<32x2xf32>
    %256 = tpu.matmul %253, %255, %cst_377 {dimension_numbers = #tpu.dot_dimension_numbers<[1], [0], [0], [1], [0, 0, 1, 1], [], []>} : vector<32x16xbf16>, vector<16x2xbf16>, vector<32x2xf32> -> vector<32x2xf32>
    %257 = arith.addf %234, %256 : vector<32x2xf32>
    %c0_378 = arith.constant 0 : index
    %c5_379 = arith.constant 5 : index
    %c2_380 = arith.constant 2 : index
    %c0_381 = arith.constant 0 : index
    %c0_382 = arith.constant 0 : index
    %258 = vector.load %arg3[%c0_378, %c5_379, %c2_380, %c0_381, %c0_382] : memref<1x9x9x16x2xbf16, #tpu.memory_space<vmem>>, vector<1x1x1x16x2xbf16>
    %259 = vector.shape_cast %258 : vector<1x1x1x16x2xbf16> to vector<16x2xbf16>
    %cst_383 = arith.constant dense<0.000000e+00> : vector<32x2xf32>
    %260 = tpu.matmul %253, %259, %cst_383 {dimension_numbers = #tpu.dot_dimension_numbers<[1], [0], [0], [1], [0, 0, 1, 1], [], []>} : vector<32x16xbf16>, vector<16x2xbf16>, vector<32x2xf32> -> vector<32x2xf32>
    %261 = arith.addf %238, %260 : vector<32x2xf32>
    %c0_384 = arith.constant 0 : index
    %c5_385 = arith.constant 5 : index
    %c4_386 = arith.constant 4 : index
    %c0_387 = arith.constant 0 : index
    %c0_388 = arith.constant 0 : index
    %262 = vector.load %arg3[%c0_384, %c5_385, %c4_386, %c0_387, %c0_388] : memref<1x9x9x16x2xbf16, #tpu.memory_space<vmem>>, vector<1x1x1x16x2xbf16>
    %263 = vector.shape_cast %262 : vector<1x1x1x16x2xbf16> to vector<16x2xbf16>
    %cst_389 = arith.constant dense<0.000000e+00> : vector<32x2xf32>
    %264 = tpu.matmul %253, %263, %cst_389 {dimension_numbers = #tpu.dot_dimension_numbers<[1], [0], [0], [1], [0, 0, 1, 1], [], []>} : vector<32x16xbf16>, vector<16x2xbf16>, vector<32x2xf32> -> vector<32x2xf32>
    %265 = arith.addf %242, %264 : vector<32x2xf32>
    %c0_390 = arith.constant 0 : index
    %c5_391 = arith.constant 5 : index
    %c6_392 = arith.constant 6 : index
    %c0_393 = arith.constant 0 : index
    %c0_394 = arith.constant 0 : index
    %266 = vector.load %arg3[%c0_390, %c5_391, %c6_392, %c0_393, %c0_394] : memref<1x9x9x16x2xbf16, #tpu.memory_space<vmem>>, vector<1x1x1x16x2xbf16>
    %267 = vector.shape_cast %266 : vector<1x1x1x16x2xbf16> to vector<16x2xbf16>
    %cst_395 = arith.constant dense<0.000000e+00> : vector<32x2xf32>
    %268 = tpu.matmul %253, %267, %cst_395 {dimension_numbers = #tpu.dot_dimension_numbers<[1], [0], [0], [1], [0, 0, 1, 1], [], []>} : vector<32x16xbf16>, vector<16x2xbf16>, vector<32x2xf32> -> vector<32x2xf32>
    %269 = arith.addf %246, %268 : vector<32x2xf32>
    %c0_396 = arith.constant 0 : index
    %c5_397 = arith.constant 5 : index
    %c8_398 = arith.constant 8 : index
    %c0_399 = arith.constant 0 : index
    %c0_400 = arith.constant 0 : index
    %270 = vector.load %arg3[%c0_396, %c5_397, %c8_398, %c0_399, %c0_400] : memref<1x9x9x16x2xbf16, #tpu.memory_space<vmem>>, vector<1x1x1x16x2xbf16>
    %271 = vector.shape_cast %270 : vector<1x1x1x16x2xbf16> to vector<16x2xbf16>
    %cst_401 = arith.constant dense<0.000000e+00> : vector<32x2xf32>
    %272 = tpu.matmul %253, %271, %cst_401 {dimension_numbers = #tpu.dot_dimension_numbers<[1], [0], [0], [1], [0, 0, 1, 1], [], []>} : vector<32x16xbf16>, vector<16x2xbf16>, vector<32x2xf32> -> vector<32x2xf32>
    %273 = arith.addf %250, %272 : vector<32x2xf32>
    %c2_402 = arith.constant 2 : index
    %c3_403 = arith.constant 3 : index
    %c0_404 = arith.constant 0 : index
    %c0_405 = arith.constant 0 : index
    %274 = vector.load %arg2[%c2_402, %c3_403, %c0_404, %c0_405] : memref<4x8x8x16xbf16, #tpu.memory_space<vmem>>, vector<1x4x8x16xbf16>
    %275 = vector.shape_cast %274 : vector<1x4x8x16xbf16> to vector<4x8x16xbf16>
    %276 = vector.shape_cast %275 : vector<4x8x16xbf16> to vector<32x16xbf16>
    %c0_406 = arith.constant 0 : index
    %c7_407 = arith.constant 7 : index
    %c0_408 = arith.constant 0 : index
    %c0_409 = arith.constant 0 : index
    %c0_410 = arith.constant 0 : index
    %277 = vector.load %arg3[%c0_406, %c7_407, %c0_408, %c0_409, %c0_410] : memref<1x9x9x16x2xbf16, #tpu.memory_space<vmem>>, vector<1x1x1x16x2xbf16>
    %278 = vector.shape_cast %277 : vector<1x1x1x16x2xbf16> to vector<16x2xbf16>
    %cst_411 = arith.constant dense<0.000000e+00> : vector<32x2xf32>
    %279 = tpu.matmul %276, %278, %cst_411 {dimension_numbers = #tpu.dot_dimension_numbers<[1], [0], [0], [1], [0, 0, 1, 1], [], []>} : vector<32x16xbf16>, vector<16x2xbf16>, vector<32x2xf32> -> vector<32x2xf32>
    %280 = arith.addf %257, %279 : vector<32x2xf32>
    %c0_412 = arith.constant 0 : index
    %c7_413 = arith.constant 7 : index
    %c2_414 = arith.constant 2 : index
    %c0_415 = arith.constant 0 : index
    %c0_416 = arith.constant 0 : index
    %281 = vector.load %arg3[%c0_412, %c7_413, %c2_414, %c0_415, %c0_416] : memref<1x9x9x16x2xbf16, #tpu.memory_space<vmem>>, vector<1x1x1x16x2xbf16>
    %282 = vector.shape_cast %281 : vector<1x1x1x16x2xbf16> to vector<16x2xbf16>
    %cst_417 = arith.constant dense<0.000000e+00> : vector<32x2xf32>
    %283 = tpu.matmul %276, %282, %cst_417 {dimension_numbers = #tpu.dot_dimension_numbers<[1], [0], [0], [1], [0, 0, 1, 1], [], []>} : vector<32x16xbf16>, vector<16x2xbf16>, vector<32x2xf32> -> vector<32x2xf32>
    %284 = arith.addf %261, %283 : vector<32x2xf32>
    %c0_418 = arith.constant 0 : index
    %c7_419 = arith.constant 7 : index
    %c4_420 = arith.constant 4 : index
    %c0_421 = arith.constant 0 : index
    %c0_422 = arith.constant 0 : index
    %285 = vector.load %arg3[%c0_418, %c7_419, %c4_420, %c0_421, %c0_422] : memref<1x9x9x16x2xbf16, #tpu.memory_space<vmem>>, vector<1x1x1x16x2xbf16>
    %286 = vector.shape_cast %285 : vector<1x1x1x16x2xbf16> to vector<16x2xbf16>
    %cst_423 = arith.constant dense<0.000000e+00> : vector<32x2xf32>
    %287 = tpu.matmul %276, %286, %cst_423 {dimension_numbers = #tpu.dot_dimension_numbers<[1], [0], [0], [1], [0, 0, 1, 1], [], []>} : vector<32x16xbf16>, vector<16x2xbf16>, vector<32x2xf32> -> vector<32x2xf32>
    %288 = arith.addf %265, %287 : vector<32x2xf32>
    %c0_424 = arith.constant 0 : index
    %c7_425 = arith.constant 7 : index
    %c6_426 = arith.constant 6 : index
    %c0_427 = arith.constant 0 : index
    %c0_428 = arith.constant 0 : index
    %289 = vector.load %arg3[%c0_424, %c7_425, %c6_426, %c0_427, %c0_428] : memref<1x9x9x16x2xbf16, #tpu.memory_space<vmem>>, vector<1x1x1x16x2xbf16>
    %290 = vector.shape_cast %289 : vector<1x1x1x16x2xbf16> to vector<16x2xbf16>
    %cst_429 = arith.constant dense<0.000000e+00> : vector<32x2xf32>
    %291 = tpu.matmul %276, %290, %cst_429 {dimension_numbers = #tpu.dot_dimension_numbers<[1], [0], [0], [1], [0, 0, 1, 1], [], []>} : vector<32x16xbf16>, vector<16x2xbf16>, vector<32x2xf32> -> vector<32x2xf32>
    %292 = arith.addf %269, %291 : vector<32x2xf32>
    %c0_430 = arith.constant 0 : index
    %c7_431 = arith.constant 7 : index
    %c8_432 = arith.constant 8 : index
    %c0_433 = arith.constant 0 : index
    %c0_434 = arith.constant 0 : index
    %293 = vector.load %arg3[%c0_430, %c7_431, %c8_432, %c0_433, %c0_434] : memref<1x9x9x16x2xbf16, #tpu.memory_space<vmem>>, vector<1x1x1x16x2xbf16>
    %294 = vector.shape_cast %293 : vector<1x1x1x16x2xbf16> to vector<16x2xbf16>
    %cst_435 = arith.constant dense<0.000000e+00> : vector<32x2xf32>
    %295 = tpu.matmul %276, %294, %cst_435 {dimension_numbers = #tpu.dot_dimension_numbers<[1], [0], [0], [1], [0, 0, 1, 1], [], []>} : vector<32x16xbf16>, vector<16x2xbf16>, vector<32x2xf32> -> vector<32x2xf32>
    %296 = arith.addf %273, %295 : vector<32x2xf32>
    %c3_436 = arith.constant 3 : index
    %c0_437 = arith.constant 0 : index
    %c0_438 = arith.constant 0 : index
    %c0_439 = arith.constant 0 : index
    %297 = vector.load %arg2[%c3_436, %c0_437, %c0_438, %c0_439] : memref<4x8x8x16xbf16, #tpu.memory_space<vmem>>, vector<1x4x8x16xbf16>
    %298 = vector.shape_cast %297 : vector<1x4x8x16xbf16> to vector<4x8x16xbf16>
    %299 = vector.shape_cast %298 : vector<4x8x16xbf16> to vector<32x16xbf16>
    %c0_440 = arith.constant 0 : index
    %c1_441 = arith.constant 1 : index
    %c1_442 = arith.constant 1 : index
    %c0_443 = arith.constant 0 : index
    %c0_444 = arith.constant 0 : index
    %300 = vector.load %arg3[%c0_440, %c1_441, %c1_442, %c0_443, %c0_444] : memref<1x9x9x16x2xbf16, #tpu.memory_space<vmem>>, vector<1x1x1x16x2xbf16>
    %301 = vector.shape_cast %300 : vector<1x1x1x16x2xbf16> to vector<16x2xbf16>
    %cst_445 = arith.constant dense<0.000000e+00> : vector<32x2xf32>
    %302 = tpu.matmul %299, %301, %cst_445 {dimension_numbers = #tpu.dot_dimension_numbers<[1], [0], [0], [1], [0, 0, 1, 1], [], []>} : vector<32x16xbf16>, vector<16x2xbf16>, vector<32x2xf32> -> vector<32x2xf32>
    %303 = arith.addf %280, %302 : vector<32x2xf32>
    %c0_446 = arith.constant 0 : index
    %c1_447 = arith.constant 1 : index
    %c3_448 = arith.constant 3 : index
    %c0_449 = arith.constant 0 : index
    %c0_450 = arith.constant 0 : index
    %304 = vector.load %arg3[%c0_446, %c1_447, %c3_448, %c0_449, %c0_450] : memref<1x9x9x16x2xbf16, #tpu.memory_space<vmem>>, vector<1x1x1x16x2xbf16>
    %305 = vector.shape_cast %304 : vector<1x1x1x16x2xbf16> to vector<16x2xbf16>
    %cst_451 = arith.constant dense<0.000000e+00> : vector<32x2xf32>
    %306 = tpu.matmul %299, %305, %cst_451 {dimension_numbers = #tpu.dot_dimension_numbers<[1], [0], [0], [1], [0, 0, 1, 1], [], []>} : vector<32x16xbf16>, vector<16x2xbf16>, vector<32x2xf32> -> vector<32x2xf32>
    %307 = arith.addf %284, %306 : vector<32x2xf32>
    %c0_452 = arith.constant 0 : index
    %c1_453 = arith.constant 1 : index
    %c5_454 = arith.constant 5 : index
    %c0_455 = arith.constant 0 : index
    %c0_456 = arith.constant 0 : index
    %308 = vector.load %arg3[%c0_452, %c1_453, %c5_454, %c0_455, %c0_456] : memref<1x9x9x16x2xbf16, #tpu.memory_space<vmem>>, vector<1x1x1x16x2xbf16>
    %309 = vector.shape_cast %308 : vector<1x1x1x16x2xbf16> to vector<16x2xbf16>
    %cst_457 = arith.constant dense<0.000000e+00> : vector<32x2xf32>
    %310 = tpu.matmul %299, %309, %cst_457 {dimension_numbers = #tpu.dot_dimension_numbers<[1], [0], [0], [1], [0, 0, 1, 1], [], []>} : vector<32x16xbf16>, vector<16x2xbf16>, vector<32x2xf32> -> vector<32x2xf32>
    %311 = arith.addf %288, %310 : vector<32x2xf32>
    %c0_458 = arith.constant 0 : index
    %c1_459 = arith.constant 1 : index
    %c7_460 = arith.constant 7 : index
    %c0_461 = arith.constant 0 : index
    %c0_462 = arith.constant 0 : index
    %312 = vector.load %arg3[%c0_458, %c1_459, %c7_460, %c0_461, %c0_462] : memref<1x9x9x16x2xbf16, #tpu.memory_space<vmem>>, vector<1x1x1x16x2xbf16>
    %313 = vector.shape_cast %312 : vector<1x1x1x16x2xbf16> to vector<16x2xbf16>
    %cst_463 = arith.constant dense<0.000000e+00> : vector<32x2xf32>
    %314 = tpu.matmul %299, %313, %cst_463 {dimension_numbers = #tpu.dot_dimension_numbers<[1], [0], [0], [1], [0, 0, 1, 1], [], []>} : vector<32x16xbf16>, vector<16x2xbf16>, vector<32x2xf32> -> vector<32x2xf32>
    %315 = arith.addf %292, %314 : vector<32x2xf32>
    %c3_464 = arith.constant 3 : index
    %c1_465 = arith.constant 1 : index
    %c0_466 = arith.constant 0 : index
    %c0_467 = arith.constant 0 : index
    %316 = vector.load %arg2[%c3_464, %c1_465, %c0_466, %c0_467] : memref<4x8x8x16xbf16, #tpu.memory_space<vmem>>, vector<1x4x8x16xbf16>
    %317 = vector.shape_cast %316 : vector<1x4x8x16xbf16> to vector<4x8x16xbf16>
    %318 = vector.shape_cast %317 : vector<4x8x16xbf16> to vector<32x16xbf16>
    %c0_468 = arith.constant 0 : index
    %c3_469 = arith.constant 3 : index
    %c1_470 = arith.constant 1 : index
    %c0_471 = arith.constant 0 : index
    %c0_472 = arith.constant 0 : index
    %319 = vector.load %arg3[%c0_468, %c3_469, %c1_470, %c0_471, %c0_472] : memref<1x9x9x16x2xbf16, #tpu.memory_space<vmem>>, vector<1x1x1x16x2xbf16>
    %320 = vector.shape_cast %319 : vector<1x1x1x16x2xbf16> to vector<16x2xbf16>
    %cst_473 = arith.constant dense<0.000000e+00> : vector<32x2xf32>
    %321 = tpu.matmul %318, %320, %cst_473 {dimension_numbers = #tpu.dot_dimension_numbers<[1], [0], [0], [1], [0, 0, 1, 1], [], []>} : vector<32x16xbf16>, vector<16x2xbf16>, vector<32x2xf32> -> vector<32x2xf32>
    %322 = arith.addf %303, %321 : vector<32x2xf32>
    %c0_474 = arith.constant 0 : index
    %c3_475 = arith.constant 3 : index
    %c3_476 = arith.constant 3 : index
    %c0_477 = arith.constant 0 : index
    %c0_478 = arith.constant 0 : index
    %323 = vector.load %arg3[%c0_474, %c3_475, %c3_476, %c0_477, %c0_478] : memref<1x9x9x16x2xbf16, #tpu.memory_space<vmem>>, vector<1x1x1x16x2xbf16>
    %324 = vector.shape_cast %323 : vector<1x1x1x16x2xbf16> to vector<16x2xbf16>
    %cst_479 = arith.constant dense<0.000000e+00> : vector<32x2xf32>
    %325 = tpu.matmul %318, %324, %cst_479 {dimension_numbers = #tpu.dot_dimension_numbers<[1], [0], [0], [1], [0, 0, 1, 1], [], []>} : vector<32x16xbf16>, vector<16x2xbf16>, vector<32x2xf32> -> vector<32x2xf32>
    %326 = arith.addf %307, %325 : vector<32x2xf32>
    %c0_480 = arith.constant 0 : index
    %c3_481 = arith.constant 3 : index
    %c5_482 = arith.constant 5 : index
    %c0_483 = arith.constant 0 : index
    %c0_484 = arith.constant 0 : index
    %327 = vector.load %arg3[%c0_480, %c3_481, %c5_482, %c0_483, %c0_484] : memref<1x9x9x16x2xbf16, #tpu.memory_space<vmem>>, vector<1x1x1x16x2xbf16>
    %328 = vector.shape_cast %327 : vector<1x1x1x16x2xbf16> to vector<16x2xbf16>
    %cst_485 = arith.constant dense<0.000000e+00> : vector<32x2xf32>
    %329 = tpu.matmul %318, %328, %cst_485 {dimension_numbers = #tpu.dot_dimension_numbers<[1], [0], [0], [1], [0, 0, 1, 1], [], []>} : vector<32x16xbf16>, vector<16x2xbf16>, vector<32x2xf32> -> vector<32x2xf32>
    %330 = arith.addf %311, %329 : vector<32x2xf32>
    %c0_486 = arith.constant 0 : index
    %c3_487 = arith.constant 3 : index
    %c7_488 = arith.constant 7 : index
    %c0_489 = arith.constant 0 : index
    %c0_490 = arith.constant 0 : index
    %331 = vector.load %arg3[%c0_486, %c3_487, %c7_488, %c0_489, %c0_490] : memref<1x9x9x16x2xbf16, #tpu.memory_space<vmem>>, vector<1x1x1x16x2xbf16>
    %332 = vector.shape_cast %331 : vector<1x1x1x16x2xbf16> to vector<16x2xbf16>
    %cst_491 = arith.constant dense<0.000000e+00> : vector<32x2xf32>
    %333 = tpu.matmul %318, %332, %cst_491 {dimension_numbers = #tpu.dot_dimension_numbers<[1], [0], [0], [1], [0, 0, 1, 1], [], []>} : vector<32x16xbf16>, vector<16x2xbf16>, vector<32x2xf32> -> vector<32x2xf32>
    %334 = arith.addf %315, %333 : vector<32x2xf32>
    %c3_492 = arith.constant 3 : index
    %c2_493 = arith.constant 2 : index
    %c0_494 = arith.constant 0 : index
    %c0_495 = arith.constant 0 : index
    %335 = vector.load %arg2[%c3_492, %c2_493, %c0_494, %c0_495] : memref<4x8x8x16xbf16, #tpu.memory_space<vmem>>, vector<1x4x8x16xbf16>
    %336 = vector.shape_cast %335 : vector<1x4x8x16xbf16> to vector<4x8x16xbf16>
    %337 = vector.shape_cast %336 : vector<4x8x16xbf16> to vector<32x16xbf16>
    %c0_496 = arith.constant 0 : index
    %c5_497 = arith.constant 5 : index
    %c1_498 = arith.constant 1 : index
    %c0_499 = arith.constant 0 : index
    %c0_500 = arith.constant 0 : index
    %338 = vector.load %arg3[%c0_496, %c5_497, %c1_498, %c0_499, %c0_500] : memref<1x9x9x16x2xbf16, #tpu.memory_space<vmem>>, vector<1x1x1x16x2xbf16>
    %339 = vector.shape_cast %338 : vector<1x1x1x16x2xbf16> to vector<16x2xbf16>
    %cst_501 = arith.constant dense<0.000000e+00> : vector<32x2xf32>
    %340 = tpu.matmul %337, %339, %cst_501 {dimension_numbers = #tpu.dot_dimension_numbers<[1], [0], [0], [1], [0, 0, 1, 1], [], []>} : vector<32x16xbf16>, vector<16x2xbf16>, vector<32x2xf32> -> vector<32x2xf32>
    %341 = arith.addf %322, %340 : vector<32x2xf32>
    %c0_502 = arith.constant 0 : index
    %c5_503 = arith.constant 5 : index
    %c3_504 = arith.constant 3 : index
    %c0_505 = arith.constant 0 : index
    %c0_506 = arith.constant 0 : index
    %342 = vector.load %arg3[%c0_502, %c5_503, %c3_504, %c0_505, %c0_506] : memref<1x9x9x16x2xbf16, #tpu.memory_space<vmem>>, vector<1x1x1x16x2xbf16>
    %343 = vector.shape_cast %342 : vector<1x1x1x16x2xbf16> to vector<16x2xbf16>
    %cst_507 = arith.constant dense<0.000000e+00> : vector<32x2xf32>
    %344 = tpu.matmul %337, %343, %cst_507 {dimension_numbers = #tpu.dot_dimension_numbers<[1], [0], [0], [1], [0, 0, 1, 1], [], []>} : vector<32x16xbf16>, vector<16x2xbf16>, vector<32x2xf32> -> vector<32x2xf32>
    %345 = arith.addf %326, %344 : vector<32x2xf32>
    %c0_508 = arith.constant 0 : index
    %c5_509 = arith.constant 5 : index
    %c5_510 = arith.constant 5 : index
    %c0_511 = arith.constant 0 : index
    %c0_512 = arith.constant 0 : index
    %346 = vector.load %arg3[%c0_508, %c5_509, %c5_510, %c0_511, %c0_512] : memref<1x9x9x16x2xbf16, #tpu.memory_space<vmem>>, vector<1x1x1x16x2xbf16>
    %347 = vector.shape_cast %346 : vector<1x1x1x16x2xbf16> to vector<16x2xbf16>
    %cst_513 = arith.constant dense<0.000000e+00> : vector<32x2xf32>
    %348 = tpu.matmul %337, %347, %cst_513 {dimension_numbers = #tpu.dot_dimension_numbers<[1], [0], [0], [1], [0, 0, 1, 1], [], []>} : vector<32x16xbf16>, vector<16x2xbf16>, vector<32x2xf32> -> vector<32x2xf32>
    %349 = arith.addf %330, %348 : vector<32x2xf32>
    %c0_514 = arith.constant 0 : index
    %c5_515 = arith.constant 5 : index
    %c7_516 = arith.constant 7 : index
    %c0_517 = arith.constant 0 : index
    %c0_518 = arith.constant 0 : index
    %350 = vector.load %arg3[%c0_514, %c5_515, %c7_516, %c0_517, %c0_518] : memref<1x9x9x16x2xbf16, #tpu.memory_space<vmem>>, vector<1x1x1x16x2xbf16>
    %351 = vector.shape_cast %350 : vector<1x1x1x16x2xbf16> to vector<16x2xbf16>
    %cst_519 = arith.constant dense<0.000000e+00> : vector<32x2xf32>
    %352 = tpu.matmul %337, %351, %cst_519 {dimension_numbers = #tpu.dot_dimension_numbers<[1], [0], [0], [1], [0, 0, 1, 1], [], []>} : vector<32x16xbf16>, vector<16x2xbf16>, vector<32x2xf32> -> vector<32x2xf32>
    %353 = arith.addf %334, %352 : vector<32x2xf32>
    %c3_520 = arith.constant 3 : index
    %c3_521 = arith.constant 3 : index
    %c0_522 = arith.constant 0 : index
    %c0_523 = arith.constant 0 : index
    %354 = vector.load %arg2[%c3_520, %c3_521, %c0_522, %c0_523] : memref<4x8x8x16xbf16, #tpu.memory_space<vmem>>, vector<1x4x8x16xbf16>
    %355 = vector.shape_cast %354 : vector<1x4x8x16xbf16> to vector<4x8x16xbf16>
    %356 = vector.shape_cast %355 : vector<4x8x16xbf16> to vector<32x16xbf16>
    %c0_524 = arith.constant 0 : index
    %c7_525 = arith.constant 7 : index
    %c1_526 = arith.constant 1 : index
    %c0_527 = arith.constant 0 : index
    %c0_528 = arith.constant 0 : index
    %357 = vector.load %arg3[%c0_524, %c7_525, %c1_526, %c0_527, %c0_528] : memref<1x9x9x16x2xbf16, #tpu.memory_space<vmem>>, vector<1x1x1x16x2xbf16>
    %358 = vector.shape_cast %357 : vector<1x1x1x16x2xbf16> to vector<16x2xbf16>
    %cst_529 = arith.constant dense<0.000000e+00> : vector<32x2xf32>
    %359 = tpu.matmul %356, %358, %cst_529 {dimension_numbers = #tpu.dot_dimension_numbers<[1], [0], [0], [1], [0, 0, 1, 1], [], []>} : vector<32x16xbf16>, vector<16x2xbf16>, vector<32x2xf32> -> vector<32x2xf32>
    %360 = arith.addf %341, %359 : vector<32x2xf32>
    %c0_530 = arith.constant 0 : index
    %c7_531 = arith.constant 7 : index
    %c3_532 = arith.constant 3 : index
    %c0_533 = arith.constant 0 : index
    %c0_534 = arith.constant 0 : index
    %361 = vector.load %arg3[%c0_530, %c7_531, %c3_532, %c0_533, %c0_534] : memref<1x9x9x16x2xbf16, #tpu.memory_space<vmem>>, vector<1x1x1x16x2xbf16>
    %362 = vector.shape_cast %361 : vector<1x1x1x16x2xbf16> to vector<16x2xbf16>
    %cst_535 = arith.constant dense<0.000000e+00> : vector<32x2xf32>
    %363 = tpu.matmul %356, %362, %cst_535 {dimension_numbers = #tpu.dot_dimension_numbers<[1], [0], [0], [1], [0, 0, 1, 1], [], []>} : vector<32x16xbf16>, vector<16x2xbf16>, vector<32x2xf32> -> vector<32x2xf32>
    %364 = arith.addf %345, %363 : vector<32x2xf32>
    %c0_536 = arith.constant 0 : index
    %c7_537 = arith.constant 7 : index
    %c5_538 = arith.constant 5 : index
    %c0_539 = arith.constant 0 : index
    %c0_540 = arith.constant 0 : index
    %365 = vector.load %arg3[%c0_536, %c7_537, %c5_538, %c0_539, %c0_540] : memref<1x9x9x16x2xbf16, #tpu.memory_space<vmem>>, vector<1x1x1x16x2xbf16>
    %366 = vector.shape_cast %365 : vector<1x1x1x16x2xbf16> to vector<16x2xbf16>
    %cst_541 = arith.constant dense<0.000000e+00> : vector<32x2xf32>
    %367 = tpu.matmul %356, %366, %cst_541 {dimension_numbers = #tpu.dot_dimension_numbers<[1], [0], [0], [1], [0, 0, 1, 1], [], []>} : vector<32x16xbf16>, vector<16x2xbf16>, vector<32x2xf32> -> vector<32x2xf32>
    %368 = arith.addf %349, %367 : vector<32x2xf32>
    %c0_542 = arith.constant 0 : index
    %c7_543 = arith.constant 7 : index
    %c7_544 = arith.constant 7 : index
    %c0_545 = arith.constant 0 : index
    %c0_546 = arith.constant 0 : index
    %369 = vector.load %arg3[%c0_542, %c7_543, %c7_544, %c0_545, %c0_546] : memref<1x9x9x16x2xbf16, #tpu.memory_space<vmem>>, vector<1x1x1x16x2xbf16>
    %370 = vector.shape_cast %369 : vector<1x1x1x16x2xbf16> to vector<16x2xbf16>
    %cst_547 = arith.constant dense<0.000000e+00> : vector<32x2xf32>
    %371 = tpu.matmul %356, %370, %cst_547 {dimension_numbers = #tpu.dot_dimension_numbers<[1], [0], [0], [1], [0, 0, 1, 1], [], []>} : vector<32x16xbf16>, vector<16x2xbf16>, vector<32x2xf32> -> vector<32x2xf32>
    %372 = arith.addf %353, %371 : vector<32x2xf32>
    %373 = vector.shape_cast %360 : vector<32x2xf32> to vector<4x8x2xf32>
    %374 = vector.extract_strided_slice %373 {offsets = [0, 0, 0], sizes = [4, 4, 2], strides = [1, 1, 1]} : vector<4x8x2xf32> to vector<4x4x2xf32>
    %375 = vector.shape_cast %364 : vector<32x2xf32> to vector<4x8x2xf32>
    %376 = vector.extract_strided_slice %375 {offsets = [0, 1, 0], sizes = [4, 4, 2], strides = [1, 1, 1]} : vector<4x8x2xf32> to vector<4x4x2xf32>
    %377 = arith.addf %374, %376 : vector<4x4x2xf32>
    %378 = vector.shape_cast %368 : vector<32x2xf32> to vector<4x8x2xf32>
    %379 = vector.extract_strided_slice %378 {offsets = [0, 2, 0], sizes = [4, 4, 2], strides = [1, 1, 1]} : vector<4x8x2xf32> to vector<4x4x2xf32>
    %380 = arith.addf %377, %379 : vector<4x4x2xf32>
    %381 = vector.shape_cast %372 : vector<32x2xf32> to vector<4x8x2xf32>
    %382 = vector.extract_strided_slice %381 {offsets = [0, 3, 0], sizes = [4, 4, 2], strides = [1, 1, 1]} : vector<4x8x2xf32> to vector<4x4x2xf32>
    %383 = arith.addf %380, %382 : vector<4x4x2xf32>
    %384 = vector.shape_cast %296 : vector<32x2xf32> to vector<4x8x2xf32>
    %385 = vector.extract_strided_slice %384 {offsets = [0, 4, 0], sizes = [4, 4, 2], strides = [1, 1, 1]} : vector<4x8x2xf32> to vector<4x4x2xf32>
    %386 = arith.addf %383, %385 : vector<4x4x2xf32>
    %c0_548 = arith.constant 0 : index
    %c0_549 = arith.constant 0 : index
    %c0_550 = arith.constant 0 : index
    %c0_551 = arith.constant 0 : index
    %c0_552 = arith.constant 0 : index
    %387 = vector.load %arg4[%c0_548, %c0_549, %c0_550, %c0_551, %c0_552] : memref<1x1x4x4x2xf32, #tpu.memory_space<vmem>>, vector<1x1x4x4x2xf32>
    %388 = vector.shape_cast %387 : vector<1x1x4x4x2xf32> to vector<4x4x2xf32>
    %389 = vector.shape_cast %386 : vector<4x4x2xf32> to vector<1x1x4x4x2xf32>
    tpu.vector_store %arg4[%c0_548, %c0_549, %c0_550, %c0_551, %c0_552], %389 {strides = array<i32>} : memref<1x1x4x4x2xf32, #tpu.memory_space<vmem>>, vector<1x1x4x4x2xf32>,
    return
  }
  func.func @transform_0(%arg0: i32, %arg1: i32) -> (i32, i32, i32, i32) {
    %c0_i32 = arith.constant 0 : i32
    %c0_i32_0 = arith.constant 0 : i32
    %c0_i32_1 = arith.constant 0 : i32
    return %arg0, %c0_i32, %c0_i32_0, %arg1 : i32, i32, i32, i32
  }
  func.func @transform_1(%arg0: i32, %arg1: i32) -> (i32, i32, i32, i32, i32) {
    %c0_i32 = arith.constant 0 : i32
    %c0_i32_0 = arith.constant 0 : i32
    %c0_i32_1 = arith.constant 0 : i32
    %c0_i32_2 = arith.constant 0 : i32
    %c0_i32_3 = arith.constant 0 : i32
    return %arg1, %c0_i32, %c0_i32_0, %c0_i32_1, %c0_i32_2 : i32, i32, i32, i32, i32
  }
  func.func @transform_2(%arg0: i32, %arg1: i32) -> (i32, i32, i32, i32, i32) {
    %c0_i32 = arith.constant 0 : i32
    %c0_i32_0 = arith.constant 0 : i32
    %c0_i32_1 = arith.constant 0 : i32
    %c0_i32_2 = arith.constant 0 : i32
    return %arg0, %arg1, %c0_i32, %c0_i32_0, %c0_i32_1 : i32, i32, i32, i32, i32
  }
}

</mosaic_0001>

<bundles_post_ra>
// kernel: tpu_custom_call.1
= control target key start
LH: loop header
LB: loop body
LE: loop exit
PB: predicated region body
PF: predicated region fallthrough
CT: control target
= control target key end

     0   :  { %s4360_s9 = smov 0   ;;  %s4362_s10 = smov 0   ;;  %s5202_s0 = inlined_call_operand.vmem [shape: bf16[8,8,8,16], index: 0, kind: input, shape index: {}]   ;;  %s5203_s1 = inlined_call_operand.vmem [shape: bf16[1,9,9,16,2], index: 1, kind: input, shape index: {}]   ;;  %s5204_s2 = inlined_call_operand.vmem [shape: f32[2,1,4,4,2], index: 2, kind: output, shape index: {}]  }
   0x1   :  { %s4364_s11 = smov 0  }
   0x2 LB: > { %s24_s12 = sadd.s32 1, %s4339_s10  ;;  %p3311_p0 = scmp.ge.s32.totalorder %s4343_s11, 1  ;;  %s4343_s11 = sphi %s4364_s11, %s12_s11   ;;  %s4339_s10 = sphi %s4362_s10, %s5218_s10   ;;  %s4335_s9 = sphi %s4360_s9, %s5217_s9  }
   0x3   : > { %p26_p1 = scmp.ge.s32.totalorder %s24_s12, 2  ;;  %p143_p2 = scmp.lt.s32.totalorder %s4343_s11, 3 }
   0x5   : > { %s5220_s12 = smov (%p26_p1, %s24_s12), 0  ;;  %p144_p3 = pnand %p3311_p0, %p143_p2 }
   0x7   : > { %147 = sbr.rel (%p144_p3) target bundleno = 804 (0x324), region = 28 }
   0xc   : > { %v4188_v0 = vld [vmem:[%s5203_s1 + $0x90] sm:$0xff]  ;;  %v4189_v1 = vld [vmem:[%s5203_s1 + $0xa0] sm:$0xff]  ;;  %s3312_s19 = sshll.u32 %s4335_s9, 2  ;;  %vm245_vm0 = vcmask 130048   ;;  %v4217_v40 = vld [vmem:[%s5203_s1 + $0x18] sm:$0xff]  ;;  %p193_p5 = scmp.lt.s32.totalorder %s4335_s9, 1 }
   0xd   : > { %v4182_v2 = vld [vmem:[%s5203_s1 + $0x10] sm:$0xff]  ;;  %p179_p4 = scmp.lt.s32.totalorder %s3312_s19, 7  ;;  %v4181_v3 = vld [vmem:[%s5203_s1] sm:$0xff]  ;;  %259 = vmatpush.bf16.msra.mxu0 %v4188_v0  ;;  %4296 = vmatpush.bf16.msra.mxu1 %v4188_v0  ;;  %v4218_v41 = vld [vmem:[%s5203_s1 + $0x28] sm:$0xff]  ;;  %vm3196_vm1 = vcmask 11264  }
   0xe   : > { %v4190_v4 = vld [vmem:[%s5203_s1 + $0xb0] sm:$0xff]  ;;  %v4191_v5 = vld [vmem:[%s5203_s1 + $0xc0] sm:$0xff]  ;;  %328 = vmatpush.bf16.msra.mxu2 %v4189_v1  ;;  %353 = vmatpush.bf16.msra.mxu3 %v4182_v2  ;;  %v4216_v49 = vld [vmem:[%s5203_s1 + $0x8] sm:$0xff]  ;;  %s5224_s9 = smov (!%p193_p5, %s4335_s9), 1 }
   0xf   : > { %v4184_v6 = vld [vmem:[%s5203_s1 + $0x30] sm:$0xff]  ;;  %s5222_s19 = smov (!%p179_p4, %s3312_s19), 7  ;;  %v4183_v7 = vld [vmem:[%s5203_s1 + $0x20] sm:$0xff]  ;;  %v4219_v50 = vld [vmem:[%s5203_s1 + $0x38] sm:$0xff] }
  0x10   : > { %s4177_s28 = sshll.u32 %s5222_s19, 5  ;;  %v4192_v8 = vld [vmem:[%s5203_s1 + $0xd0] sm:$0xff]  ;;  %v4195_v12 = vld [vmem:[%s5203_s1 + $0x120] sm:$0xff] }
  0x11   : > { %300 = vmatpush.bf16.msrb.mxu1 %v4181_v3  ;;  %381 = vmatpush.bf16.msrb.mxu0 %v4190_v4  ;;  %s4405_s3 = scalar_lea.vmem %s5202_s0, %s4177_s28  ;;  %v4196_v13 = vld [vmem:[%s5203_s1 + $0x130] sm:$0xff]  ;;  %v4185_v15 = vld [vmem:[%s5203_s1 + $0x40] sm:$0xff] }
  0x12   : > { %434 = vmatpush.bf16.msrb.mxu2 %v4191_v5  ;;  %459 = vmatpush.bf16.msrb.mxu3 %v4184_v6  ;;  %v4186_v9 = vld [vmem:[%s4405_s3 + $0x4] sm:$0xff]  ;;  %v4187_v10 = vld [vmem:[%s4405_s3 + $0xc] sm:$0xff]  ;;  %v4201_v30 = vld [vmem:[%s4405_s3 + $0x14] sm:$0xff] }
  0x13   : > { %v4179_v11 = vld [vmem:[%s4405_s3] sm:$0xff]  ;;  %3343 = vmatmul.msk.bf16.vlgmr.msra.gmra.mxu0 %vm245_vm0, %v4186_v9  ;;  %3344 = vmatmul.msk.bf16.vlgmr.msra.gmra.mxu1 %vm245_vm0, %v4187_v10  ;;  %v4180_v14 = vld [vmem:[%s4405_s3 + $0x8] sm:$0xff]  ;;  %v4202_v18 = vld [vmem:[%s5203_s1 + $0x1b0] sm:$0xff] }
  0x14   : > { %3365 = vmatmul.msk.bf16.vlgmr.msra.gmra.mxu2 %vm245_vm0, %v4186_v9  ;;  %3371 = vmatmul.msk.bf16.vlgmr.msra.gmra.mxu3 %vm245_vm0, %v4179_v11  ;;  %v4197_v16 = vld [vmem:[%s5203_s1 + $0x140] sm:$0xff]  ;;  %v4198_v19 = vld [vmem:[%s5203_s1 + $0x150] sm:$0xff]  ;;  %v4193_v21 = vld [vmem:[%s4405_s3 + $0x8] sm:$0xff] }
  0x15   : > { %406 = vmatpush.bf16.msra.mxu1 %v4183_v7  ;;  %487 = vmatpush.bf16.msra.mxu0 %v4192_v8  ;;  %v4199_v17 = vld [vmem:[%s5203_s1 + $0x160] sm:$0xff]  ;;  %v4206_v23 = vld [vmem:[%s5203_s1 + $0x1f0] sm:$0xff]  ;;  %v4208_v59 = vld [vmem:[%s4405_s3 + $0x18] sm:$0xff] }
  0x16   : > { %561 = vmatpush.bf16.msra.mxu2 %v4195_v12  ;;  %593 = vmatpush.bf16.msra.mxu3 %v4196_v13  ;;  %v4203_v20 = vld [vmem:[%s5203_s1 + $0x1c0] sm:$0xff]  ;;  %v4194_v24 = vld [vmem:[%s4405_s3 + $0x10] sm:$0xff]  ;;  %v4223_v6 = vld [vmem:[%s5203_s1 + $0xa8] sm:$0xff] }
  0x17   : > { %v4205_v22 = vld [vmem:[%s5203_s1 + $0x1e0] sm:$0xff]  ;;  %v4204_v25 = vld [vmem:[%s5203_s1 + $0x1d0] sm:$0xff]  ;;  %v4224_v7 = vld [vmem:[%s5203_s1 + $0xb8] sm:$0xff] }
  0x18   : > { %v4209_v26 = vld [vmem:[%s5203_s1 + $0x240] sm:$0xff]  ;;  %v4200_v27 = vld [vmem:[%s4405_s3 + $0xc] sm:$0xff] }
  0x19   : > { %v4211_v28 = vld [vmem:[%s5203_s1 + $0x260] sm:$0xff]  ;;  %v4212_v29 = vld [vmem:[%s5203_s1 + $0x270] sm:$0xff] }
  0x1a   : > { %v4210_v31 = vld [vmem:[%s5203_s1 + $0x250] sm:$0xff]  ;;  %v4213_v32 = vld [vmem:[%s5203_s1 + $0x280] sm:$0xff] }
  0x1b   : > { %v4207_v44 = vld [vmem:[%s4405_s3 + $0x10] sm:$0xff] }
  0x23   : > { %3357 = vmatmul.msk.bf16.vlgmr.msrb.gmra.mxu1 %vm245_vm0, %v4179_v11  ;;  %3379 = vmatmul.msk.bf16.vlgmr.msrb.gmra.mxu0 %vm245_vm0, %v4186_v9 }
  0x24   : > { %3366 = vmatmul.msk.bf16.gmra.mxu2 %vm245_vm0, %v4187_v10  ;;  %3372 = vmatmul.msk.bf16.gmra.mxu3 %vm245_vm0, %v4180_v14 }
  0x25   : > { %512 = vmatpush.bf16.msrb.mxu1 %v4185_v15  ;;  %625 = vmatpush.bf16.msrb.mxu0 %v4197_v16  ;;  %v4225_v15 = vld [vmem:[%s5203_s1 + $0xc8] sm:$0xff] }
  0x33   : > { %3358 = vmatmul.msk.bf16.gmra.mxu1 %vm245_vm0, %v4180_v14  ;;  %3380 = vmatmul.msk.bf16.gmra.mxu0 %vm245_vm0, %v4187_v10 }
  0x34   : > { %3393 = vmatmul.msk.bf16.vlgmr.msrb.gmra.mxu2 %vm245_vm0, %v4186_v9  ;;  %3399 = vmatmul.msk.bf16.vlgmr.msrb.gmra.mxu3 %vm245_vm0, %v4179_v11 }
  0x35   : > { %689 = vmatpush.bf16.msrb.mxu2 %v4199_v17  ;;  %742 = vmatpush.bf16.msrb.mxu3 %v4202_v18 }
  0x43   : > { %3385 = vmatmul.msk.bf16.vlgmr.msra.gmra.mxu1 %vm245_vm0, %v4179_v11  ;;  %3407 = vmatmul.msk.bf16.vlgmr.msra.gmra.mxu0 %vm245_vm0, %v4186_v9 }
  0x44   : > { %3394 = vmatmul.msk.bf16.gmra.mxu2 %vm245_vm0, %v4187_v10  ;;  %3400 = vmatmul.msk.bf16.gmra.mxu3 %vm245_vm0, %v4180_v14 }
  0x45   : > { %657 = vmatpush.bf16.msra.mxu1 %v4198_v19  ;;  %774 = vmatpush.bf16.msra.mxu0 %v4203_v20 }
  0x53   : > { %3386 = vmatmul.msk.bf16.gmra.mxu1 %vm245_vm0, %v4180_v14  ;;  %3408 = vmatmul.msk.bf16.gmra.mxu0 %vm245_vm0, %v4187_v10 }
  0x54   : > { %3433 = vmatmul.msk.bf16.vlgmr.msra.gmra.mxu2 %vm245_vm0, %v4193_v21  ;;  %3441 = vmatmul.msk.bf16.vlgmr.msra.gmra.mxu3 %vm245_vm0, %v4193_v21 }
  0x55   : > { %838 = vmatpush.bf16.msra.mxu2 %v4205_v22  ;;  %870 = vmatpush.bf16.msra.mxu3 %v4206_v23 }
  0x63   : > { %3413 = vmatmul.msk.bf16.vlgmr.msrb.gmra.mxu1 %vm245_vm0, %v4179_v11  ;;  %3449 = vmatmul.msk.bf16.vlgmr.msrb.gmra.mxu0 %vm245_vm0, %v4193_v21 }
  0x64   : > { %3434 = vmatmul.msk.bf16.gmra.mxu2 %vm245_vm0, %v4194_v24  ;;  %3442 = vmatmul.msk.bf16.gmra.mxu3 %vm245_vm0, %v4194_v24 }
  0x65   : > { %806 = vmatpush.bf16.msrb.mxu1 %v4204_v25  ;;  %923 = vmatpush.bf16.msrb.mxu0 %v4209_v26 }
  0x73   : > { %3414 = vmatmul.msk.bf16.gmra.mxu1 %vm245_vm0, %v4180_v14  ;;  %3450 = vmatmul.msk.bf16.gmra.mxu0 %vm245_vm0, %v4194_v24  ;;  %v4222_v14 = vld [vmem:[%s5203_s1 + $0x98] sm:$0xff] }
  0x74   : > { %3465 = vmatmul.msk.bf16.vlgmr.msrb.gmra.mxu2 %vm245_vm0, %v4193_v21  ;;  %3485 = vmatmul.msk.bf16.vlgmr.msrb.gmra.mxu3 %vm245_vm0, %v4200_v27 }
  0x75   : > { %987 = vmatpush.bf16.msrb.mxu2 %v4211_v28  ;;  %1019 = vmatpush.bf16.msrb.mxu3 %v4212_v29 }
  0x83   : > { %3457 = vmatmul.msk.bf16.vlgmr.msra.gmra.mxu1 %vm245_vm0, %v4193_v21  ;;  %3493 = vmatmul.msk.bf16.vlgmr.msra.gmra.mxu0 %vm245_vm0, %v4200_v27 }
  0x84   : > { %3466 = vmatmul.msk.bf16.gmra.mxu2 %vm245_vm0, %v4194_v24  ;;  %3486 = vmatmul.msk.bf16.gmra.mxu3 %vm245_vm0, %v4201_v30 }
  0x85   : > { %955 = vmatpush.bf16.msra.mxu1 %v4210_v31  ;;  %1051 = vmatpush.bf16.msra.mxu0 %v4213_v32 }
  0x90   : > { %v261_v33 = vpop.f32.mrf.mxu0  ;;  %v266_v34 = vpop.f32.mrf.mxu1 }
  0x93   : > { %3458 = vmatmul.msk.bf16.gmra.mxu1 %vm245_vm0, %v4194_v24  ;;  %3494 = vmatmul.msk.bf16.gmra.mxu0 %vm245_vm0, %v4201_v30 }
  0x94   : > { %3509 = vmatmul.msk.bf16.vlgmr.msra.gmra.mxu2 %vm245_vm0, %v4200_v27  ;;  %3517 = vmatmul.msk.bf16.vlgmr.msra.gmra.mxu3 %vm245_vm0, %v4200_v27 }
  0x95   : > { %1136 = vmatpush.bf16.msra.mxu2 %v4217_v40  ;;  %1168 = vmatpush.bf16.msra.mxu3 %v4218_v41 }
  0x97   : > { %v330_v35 = vpop.f32.mrf.mxu2  ;;  %v355_v36 = vpop.f32.mrf.mxu3 }
  0x98   : > { %v4505_v37 = vadd.f32 %v355_v36, %v330_v35  ;;  %v263_v38 = vpop.f32.mrf.mxu0  ;;  %v268_v39 = vpop.f32.mrf.mxu1  ;;  %v4229_v36 = vld [vmem:[%s5203_s1 + $0x138] sm:$0xff] }
  0x9f   : > { %v332_v42 = vpop.f32.mrf.mxu2  ;;  %v357_v43 = vpop.f32.mrf.mxu3 }
  0xa0   : > { %v4514_v45 = vadd.f32 %v357_v43, %v332_v42  ;;  %v302_v46 = vpop.f32.mrf.mxu1  ;;  %v383_v47 = vpop.f32.mrf.mxu0 }
  0xa1   : > { %v4516_v48 = vadd.f32 %v302_v46, %v261_v33 }
  0xa3   : > { %3501 = vmatmul.msk.bf16.vlgmr.msrb.gmra.mxu1 %vm245_vm0, %v4200_v27  ;;  %3537 = vmatmul.msk.bf16.vlgmr.msrb.gmra.mxu0 %vm245_vm0, %v4207_v44  ;;  %v4214_v27 = vld [vmem:[%s4405_s3 + $0x20] sm:$0xff] }
  0xa4   : > { %3510 = vmatmul.msk.bf16.gmra.mxu2 %vm245_vm0, %v4201_v30  ;;  %3518 = vmatmul.msk.bf16.gmra.mxu3 %vm245_vm0, %v4201_v30 }
  0xa5   : > { %1104 = vmatpush.bf16.msrb.mxu1 %v4216_v49  ;;  %1200 = vmatpush.bf16.msrb.mxu0 %v4219_v50 }
  0xa7   : > { %v335_v51 = vpop.f32.mrf.mxu2  ;;  %v360_v52 = vpop.f32.mrf.mxu3 }
  0xa8   : > { %v4528_v53 = vadd.f32 %v360_v52, %v335_v51  ;;  %v304_v54 = vpop.f32.mrf.mxu1  ;;  %v385_v55 = vpop.f32.mrf.mxu0 }
  0xa9   : > { %v4530_v56 = vadd.f32 %v304_v54, %v263_v38  ;;  %v4230_v38 = vld [vmem:[%s5203_s1 + $0x148] sm:$0xff] }
  0xaf   : > { %v337_v57 = vpop.f32.mrf.mxu2  ;;  %v362_v58 = vpop.f32.mrf.mxu3 }
  0xb0   : > { %v4533_v60 = vadd.f32 %v362_v58, %v337_v57  ;;  %v307_v61 = vpop.f32.mrf.mxu1  ;;  %v388_v62 = vpop.f32.mrf.mxu0 }
  0xb1   : > { %v4535_v63 = vadd.f32 %v307_v61, %v266_v34 }
  0xb3   : > { %3502 = vmatmul.msk.bf16.gmra.mxu1 %vm245_vm0, %v4201_v30  ;;  %3538 = vmatmul.msk.bf16.gmra.mxu0 %vm245_vm0, %v4208_v59 }
  0xb4   : > { %3553 = vmatmul.msk.bf16.vlgmr.msrb.gmra.mxu2 %vm245_vm0, %v4207_v44  ;;  %3561 = vmatmul.msk.bf16.vlgmr.msrb.gmra.mxu3 %vm245_vm0, %v4207_v44 }
  0xb5   : > { %1285 = vmatpush.bf16.msrb.mxu2 %v4223_v6  ;;  %1317 = vmatpush.bf16.msrb.mxu3 %v4224_v7 }
  0xb7   : > { %v436_v0 = vpop.f32.mrf.mxu2  ;;  %v461_v1 = vpop.f32.mrf.mxu3 }
  0xb8   : > { %v4541_v2 = vadd.f32 %v461_v1, %v436_v0  ;;  %v309_v3 = vpop.f32.mrf.mxu1  ;;  %v390_v4 = vpop.f32.mrf.mxu0 }
  0xb9   : > { %v4543_v5 = vadd.f32 %v309_v3, %v268_v39  ;;  %v4220_v3 = vld [vmem:[%s4405_s3 + $0x24] sm:$0xff] }
  0xbf   : > { %v438_v8 = vpop.f32.mrf.mxu2  ;;  %v463_v9 = vpop.f32.mrf.mxu3 }
  0xc0   : > { %v4551_v10 = vadd.f32 %v463_v9, %v438_v8  ;;  %v408_v11 = vpop.f32.mrf.mxu1  ;;  %v489_v12 = vpop.f32.mrf.mxu0 }
  0xc1   : > { %v409_v13 = vadd.f32 %v408_v11, %v383_v47 }
  0xc3   : > { %3545 = vmatmul.msk.bf16.vlgmr.msra.gmra.mxu1 %vm245_vm0, %v4207_v44  ;;  %3569 = vmatmul.msk.bf16.vlgmr.msra.gmra.mxu0 %vm245_vm0, %v4207_v44  ;;  %v4215_v44 = vld [vmem:[%s4405_s3 + $0x28] sm:$0xff] }
  0xc4   : > { %3554 = vmatmul.msk.bf16.gmra.mxu2 %vm245_vm0, %v4208_v59  ;;  %3562 = vmatmul.msk.bf16.gmra.mxu3 %vm245_vm0, %v4208_v59 }
  0xc5   : > { %1253 = vmatpush.bf16.msra.mxu1 %v4222_v14  ;;  %1349 = vmatpush.bf16.msra.mxu0 %v4225_v15 }
  0xc7   : > { %v441_v16 = vpop.f32.mrf.mxu2  ;;  %v466_v17 = vpop.f32.mrf.mxu3 }
  0xc8   : > { %v4563_v18 = vadd.f32 %v466_v17, %v441_v16  ;;  %v410_v19 = vpop.f32.mrf.mxu1  ;;  %v491_v20 = vpop.f32.mrf.mxu0 }
  0xc9   : > { %v411_v21 = vadd.f32 %v410_v19, %v385_v55 }
  0xcf   : > { %v443_v22 = vpop.f32.mrf.mxu2  ;;  %v468_v23 = vpop.f32.mrf.mxu3 }
  0xd0   : > { %v4565_v24 = vadd.f32 %v468_v23, %v443_v22  ;;  %v413_v25 = vpop.f32.mrf.mxu1  ;;  %v494_v26 = vpop.f32.mrf.mxu0 }
  0xd1   : > { %v414_v28 = vadd.f32 %v413_v25, %v388_v62  ;;  %v4234_v25 = vld [vmem:[%s5203_s1 + $0x1b8] sm:$0xff] }
  0xd3   : > { %3546 = vmatmul.msk.bf16.gmra.mxu1 %vm245_vm0, %v4208_v59  ;;  %3570 = vmatmul.msk.bf16.gmra.mxu0 %vm245_vm0, %v4208_v59 }
  0xd4   : > { %3597 = vmatmul.msk.bf16.vlgmr.msra.gmra.mxu2 %vm245_vm0, %v4214_v27  ;;  %3605 = vmatmul.msk.bf16.vlgmr.msra.gmra.mxu3 %vm245_vm0, %v4214_v27 }
  0xd5   : > { %1434 = vmatpush.bf16.msra.mxu2 %v4229_v36  ;;  %1466 = vmatpush.bf16.msra.mxu3 %v4230_v38 }
  0xd7   : > { %v563_v29 = vpop.f32.mrf.mxu2  ;;  %v595_v30 = vpop.f32.mrf.mxu3 }
  0xd8   : > { %v573_v31 = vadd.f32 %v563_v29, %v4516_v48  ;;  %v4574_v32 = vadd.f32 %v595_v30, %v4505_v37  ;;  %v415_v33 = vpop.f32.mrf.mxu1  ;;  %v496_v34 = vpop.f32.mrf.mxu0  ;;  %v4228_v48 = vld [vmem:[%s5203_s1 + $0x128] sm:$0xff] }
  0xd9   : > { %v416_v35 = vadd.f32 %v415_v33, %v390_v4 }
  0xdf   : > { %v565_v39 = vpop.f32.mrf.mxu2  ;;  %v597_v40 = vpop.f32.mrf.mxu3 }
  0xe0   : > { %v574_v41 = vadd.f32 %v565_v39, %v4530_v56  ;;  %v4584_v37 = vadd.f32 %v597_v40, %v4514_v45  ;;  %v514_v42 = vpop.f32.mrf.mxu1  ;;  %v627_v43 = vpop.f32.mrf.mxu0  ;;  %v4231_v45 = vld [vmem:[%s5203_s1 + $0x158] sm:$0xff] }
  0xe1   : > { %v515_v46 = vadd.f32 %v514_v42, %v489_v12  ;;  %v4587_v47 = vadd.f32 %v627_v43, %v409_v13  ;;  %v4235_v12 = vld [vmem:[%s5203_s1 + $0x1c8] sm:$0xff]  ;;  %v4236_v13 = vld [vmem:[%s5203_s1 + $0x1d8] sm:$0xff] }
  0xe3   : > { %3589 = vmatmul.msk.bf16.vlgmr.msrb.gmra.mxu1 %vm245_vm0, %v4214_v27  ;;  %3613 = vmatmul.msk.bf16.vlgmr.msrb.gmra.mxu0 %vm245_vm0, %v4214_v27 }
  0xe4   : > { %3598 = vmatmul.msk.bf16.gmra.mxu2 %vm245_vm0, %v4215_v44  ;;  %3606 = vmatmul.msk.bf16.gmra.mxu3 %vm245_vm0, %v4215_v44 }
  0xe5   : > { %1402 = vmatpush.bf16.msrb.mxu1 %v4228_v48  ;;  %1498 = vmatpush.bf16.msrb.mxu0 %v4231_v45 }
  0xe7   : > { %v568_v49 = vpop.f32.mrf.mxu2  ;;  %v600_v50 = vpop.f32.mrf.mxu3 }
  0xe8   : > { %v575_v51 = vadd.f32 %v568_v49, %v4535_v63  ;;  %v4601_v52 = vadd.f32 %v600_v50, %v4528_v53  ;;  %v516_v54 = vpop.f32.mrf.mxu1  ;;  %v629_v55 = vpop.f32.mrf.mxu0  ;;  %v4241_v50 = vld [vmem:[%s5203_s1 + $0x258] sm:$0xff] }
  0xe9   : > { %v517_v56 = vadd.f32 %v516_v54, %v491_v20  ;;  %v4603_v57 = vadd.f32 %v629_v55, %v411_v21  ;;  %v4221_v21 = vld [vmem:[%s4405_s3 + $0x2c] sm:$0xff] }
  0xef   : > { %v570_v58 = vpop.f32.mrf.mxu2  ;;  %v602_v59 = vpop.f32.mrf.mxu3 }
  0xf0   : > { %v576_v61 = vadd.f32 %v570_v58, %v4543_v5  ;;  %v4607_v62 = vadd.f32 %v602_v59, %v4533_v60  ;;  %v519_v0 = vpop.f32.mrf.mxu1  ;;  %v632_v1 = vpop.f32.mrf.mxu0  ;;  %v4227_v59 = vld [vmem:[%s4405_s3 + $0x30] sm:$0xff] }
  0xf1   : > { %v520_v4 = vadd.f32 %v519_v0, %v494_v26  ;;  %v4610_v63 = vadd.f32 %v632_v1, %v414_v28  ;;  %v4237_v26 = vld [vmem:[%s5203_s1 + $0x1e8] sm:$0xff]  ;;  %v4243_v1 = vld [vmem:[%s5203_s1 + $0x278] sm:$0xff] }
  0xf2   : > { %v4240_v0 = vld [vmem:[%s5203_s1 + $0x248] sm:$0xff] }
  0xf3   : > { %3590 = vmatmul.msk.bf16.gmra.mxu1 %vm245_vm0, %v4215_v44  ;;  %3614 = vmatmul.msk.bf16.gmra.mxu0 %vm245_vm0, %v4215_v44 }
  0xf4   : > { %3641 = vmatmul.msk.bf16.vlgmr.msrb.gmra.mxu2 %vm245_vm0, %v4220_v3  ;;  %3649 = vmatmul.msk.bf16.vlgmr.msrb.gmra.mxu3 %vm245_vm0, %v4220_v3 }
  0xf5   : > { %1583 = vmatpush.bf16.msrb.mxu2 %v4235_v12  ;;  %1615 = vmatpush.bf16.msrb.mxu3 %v4236_v13 }
  0xf7   : > { %v691_v53 = vpop.f32.mrf.mxu2  ;;  %v744_v6 = vpop.f32.mrf.mxu3 }
  0xf8   : > { %v701_v5 = vadd.f32 %v691_v53, %v515_v46  ;;  %v4616_v60 = vadd.f32 %v744_v6, %v573_v31  ;;  %v521_v7 = vpop.f32.mrf.mxu1  ;;  %v634_v8 = vpop.f32.mrf.mxu0 }
  0xf9   : > { %v522_v9 = vadd.f32 %v521_v7, %v496_v34  ;;  %v4618_v11 = vadd.f32 %v634_v8, %v416_v35 }
  0xff   : > { %v693_v14 = vpop.f32.mrf.mxu2  ;;  %v746_v15 = vpop.f32.mrf.mxu3 }
 0x100   : > { %v702_v16 = vadd.f32 %v693_v14, %v517_v56  ;;  %v4626_v17 = vadd.f32 %v746_v15, %v574_v41  ;;  %v659_v19 = vpop.f32.mrf.mxu1  ;;  %v776_v20 = vpop.f32.mrf.mxu0  ;;  %v4226_v41 = vld [vmem:[%s4405_s3 + $0x28] sm:$0xff] }
 0x101   : > { %v669_v22 = vadd.f32 %v659_v19, %v4541_v2  ;;  %v4631_v23 = vadd.f32 %v776_v20, %v4574_v32 }
 0x103   : > { %3633 = vmatmul.msk.bf16.vlgmr.msra.gmra.mxu1 %vm245_vm0, %v4220_v3  ;;  %3657 = vmatmul.msk.bf16.vlgmr.msra.gmra.mxu0 %vm245_vm0, %v4220_v3 }
 0x104   : > { %3642 = vmatmul.msk.bf16.gmra.mxu2 %vm245_vm0, %v4221_v21  ;;  %3650 = vmatmul.msk.bf16.gmra.mxu3 %vm245_vm0, %v4221_v21 }
 0x105   : > { %1551 = vmatpush.bf16.msra.mxu1 %v4234_v25  ;;  %1647 = vmatpush.bf16.msra.mxu0 %v4237_v26 }
 0x107   : > { %v696_v2 = vpop.f32.mrf.mxu2  ;;  %v749_v27 = vpop.f32.mrf.mxu3 }
 0x108   : > { %v703_v28 = vadd.f32 %v696_v2, %v520_v4  ;;  %v4643_v29 = vadd.f32 %v749_v27, %v575_v51  ;;  %v661_v30 = vpop.f32.mrf.mxu1  ;;  %v778_v31 = vpop.f32.mrf.mxu0  ;;  %v4242_v51 = vld [vmem:[%s5203_s1 + $0x268] sm:$0xff]  ;;  %v4247_v27 = vld [vmem:[%s5203_s1 + $0x58] sm:$0xff] }
 0x109   : > { %v670_v32 = vadd.f32 %v661_v30, %v4551_v10  ;;  %v4647_v33 = vadd.f32 %v778_v31, %v4584_v37 }
 0x10f   : > { %v698_v34 = vpop.f32.mrf.mxu2  ;;  %v751_v35 = vpop.f32.mrf.mxu3 }
 0x110   : > { %v704_v36 = vadd.f32 %v698_v34, %v522_v9  ;;  %v4649_v38 = vadd.f32 %v751_v35, %v576_v61  ;;  %v664_v39 = vpop.f32.mrf.mxu1  ;;  %v781_v40 = vpop.f32.mrf.mxu0  ;;  %v4233_v35 = vld [vmem:[%s4405_s3 + $0x34] sm:$0xff] }
 0x111   : > { %v671_v42 = vadd.f32 %v664_v39, %v4563_v18  ;;  %v4654_v43 = vadd.f32 %v781_v40, %v4601_v52  ;;  %v4246_v39 = vld [vmem:[%s5203_s1 + $0x48] sm:$0xff]  ;;  %v4249_v40 = vld [vmem:[%s5203_s1 + $0x78] sm:$0xff] }
 0x113   : > { %3634 = vmatmul.msk.bf16.gmra.mxu1 %vm245_vm0, %v4221_v21  ;;  %3658 = vmatmul.msk.bf16.gmra.mxu0 %vm245_vm0, %v4221_v21 }
 0x114   : > { %3685 = vmatmul.msk.bf16.vlgmr.msra.gmra.mxu2 %vm245_vm0, %v4226_v41  ;;  %3693 = vmatmul.msk.bf16.vlgmr.msra.gmra.mxu3 %vm245_vm0, %v4226_v41 }
 0x115   : > { %1732 = vmatpush.bf16.msra.mxu2 %v4241_v50  ;;  %1764 = vmatpush.bf16.msra.mxu3 %v4242_v51 }
 0x117   : > { %v840_v10 = vpop.f32.mrf.mxu2  ;;  %v872_v37 = vpop.f32.mrf.mxu3 }
 0x118   : > { %v850_v44 = vadd.f32 %v840_v10, %v669_v22  ;;  %v4660_v46 = vadd.f32 %v872_v37, %v701_v5  ;;  %v666_v48 = vpop.f32.mrf.mxu1  ;;  %v783_v45 = vpop.f32.mrf.mxu0 }
 0x119   : > { %v672_v18 = vadd.f32 %v666_v48, %v4565_v24  ;;  %v4664_v49 = vadd.f32 %v783_v45, %v4607_v62 }
 0x11f   : > { %v842_v52 = vpop.f32.mrf.mxu2  ;;  %v874_v54 = vpop.f32.mrf.mxu3 }
 0x120   : > { %v851_v55 = vadd.f32 %v842_v52, %v670_v32  ;;  %v4672_v56 = vadd.f32 %v874_v54, %v702_v16  ;;  %v808_v58 = vpop.f32.mrf.mxu1  ;;  %v925_v24 = vpop.f32.mrf.mxu0  ;;  %v4232_v16 = vld [vmem:[%s4405_s3 + $0x2c] sm:$0xff] }
 0x121   : > { %v818_v61 = vadd.f32 %v808_v58, %v4587_v47  ;;  %v4677_v62 = vadd.f32 %v925_v24, %v4616_v60 }
 0x123   : > { %3677 = vmatmul.msk.bf16.vlgmr.msrb.gmra.mxu1 %vm245_vm0, %v4226_v41  ;;  %3701 = vmatmul.msk.bf16.vlgmr.msrb.gmra.mxu0 %vm245_vm0, %v4226_v41 }
 0x124   : > { %3686 = vmatmul.msk.bf16.gmra.mxu2 %vm245_vm0, %v4227_v59  ;;  %3694 = vmatmul.msk.bf16.gmra.mxu3 %vm245_vm0, %v4227_v59 }
 0x125   : > { %1700 = vmatpush.bf16.msrb.mxu1 %v4240_v0  ;;  %1796 = vmatpush.bf16.msrb.mxu0 %v4243_v1 }
 0x127   : > { %v845_v47 = vpop.f32.mrf.mxu2  ;;  %v877_v3 = vpop.f32.mrf.mxu3 }
 0x128   : > { %v852_v4 = vadd.f32 %v845_v47, %v671_v42  ;;  %v4689_v53 = vadd.f32 %v877_v3, %v703_v28  ;;  %v810_v6 = vpop.f32.mrf.mxu1  ;;  %v927_v5 = vpop.f32.mrf.mxu0  ;;  %v4248_v28 = vld [vmem:[%s5203_s1 + $0x68] sm:$0xff]  ;;  %v4253_v3 = vld [vmem:[%s5203_s1 + $0xd8] sm:$0xff] }
 0x129   : > { %v819_v60 = vadd.f32 %v810_v6, %v4603_v57  ;;  %v4693_v7 = vadd.f32 %v927_v5, %v4626_v17 }
 0x12f   : > { %v847_v8 = vpop.f32.mrf.mxu2  ;;  %v879_v9 = vpop.f32.mrf.mxu3 }
 0x130   : > { %v853_v12 = vadd.f32 %v847_v8, %v672_v18  ;;  %v4695_v13 = vadd.f32 %v879_v9, %v704_v36  ;;  %v813_v14 = vpop.f32.mrf.mxu1  ;;  %v930_v15 = vpop.f32.mrf.mxu0 }
 0x131   : > { %v820_v19 = vadd.f32 %v813_v14, %v4610_v63  ;;  %v4700_v20 = vadd.f32 %v930_v15, %v4643_v29  ;;  %v4250_v14 = vld [vmem:[%s5203_s1 + $0x88] sm:$0xff]  ;;  %v4255_v15 = vld [vmem:[%s5203_s1 + $0xf8] sm:$0xff] }
 0x133   : > { %3678 = vmatmul.msk.bf16.gmra.mxu1 %vm245_vm0, %v4227_v59  ;;  %3702 = vmatmul.msk.bf16.gmra.mxu0 %vm245_vm0, %v4227_v59 }
 0x134   : > { %3729 = vmatmul.msk.bf16.vlgmr.msrb.gmra.mxu2 %vm245_vm0, %v4232_v16  ;;  %3737 = vmatmul.msk.bf16.vlgmr.msrb.gmra.mxu3 %vm245_vm0, %v4232_v16 }
 0x135   : > { %1881 = vmatpush.bf16.msrb.mxu2 %v4247_v27  ;;  %1913 = vmatpush.bf16.msrb.mxu3 %v4248_v28 }
 0x137   : > { %v989_v57 = vpop.f32.mrf.mxu2  ;;  %v1021_v17 = vpop.f32.mrf.mxu3 }
 0x138   : > { %v999_v21 = vadd.f32 %v989_v57, %v818_v61  ;;  %v4706_v22 = vadd.f32 %v1021_v17, %v850_v44  ;;  %v815_v25 = vpop.f32.mrf.mxu1  ;;  %v932_v26 = vpop.f32.mrf.mxu0 }
 0x139   : > { %v821_v63 = vadd.f32 %v815_v25, %v4618_v11  ;;  %v4710_v2 = vadd.f32 %v932_v26, %v4649_v38 }
 0x13f   : > { %v991_v29 = vpop.f32.mrf.mxu2  ;;  %v1023_v30 = vpop.f32.mrf.mxu3 }
 0x140   : > { %v1000_v31 = vadd.f32 %v991_v29, %v819_v60  ;;  %v4718_v32 = vadd.f32 %v1023_v30, %v851_v55  ;;  %v957_v34 = vpop.f32.mrf.mxu1  ;;  %v1053_v11 = vpop.f32.mrf.mxu0  ;;  %v4238_v55 = vld [vmem:[%s4405_s3 + $0x30] sm:$0xff] }
 0x141   : > { %v967_v36 = vadd.f32 %v957_v34, %v4631_v23  ;;  %v4723_v38 = vadd.f32 %v1053_v11, %v4660_v46 }
 0x143   : > { %3721 = vmatmul.msk.bf16.vlgmr.msra.gmra.mxu1 %vm245_vm0, %v4232_v16  ;;  %3745 = vmatmul.msk.bf16.vlgmr.msra.gmra.mxu0 %vm245_vm0, %v4232_v16 }
 0x144   : > { %3730 = vmatmul.msk.bf16.gmra.mxu2 %vm245_vm0, %v4233_v35  ;;  %3738 = vmatmul.msk.bf16.gmra.mxu3 %vm245_vm0, %v4233_v35 }
 0x145   : > { %1849 = vmatpush.bf16.msra.mxu1 %v4246_v39  ;;  %1945 = vmatpush.bf16.msra.mxu0 %v4249_v40 }
 0x147   : > { %v994_v23 = vpop.f32.mrf.mxu2  ;;  %v1026_v41 = vpop.f32.mrf.mxu3 }
 0x148   : > { %v1001_v42 = vadd.f32 %v994_v23, %v820_v19  ;;  %v4735_v10 = vadd.f32 %v1026_v41, %v852_v4  ;;  %v959_v37 = vpop.f32.mrf.mxu1  ;;  %v1055_v44 = vpop.f32.mrf.mxu0  ;;  %v4254_v4 = vld [vmem:[%s5203_s1 + $0xe8] sm:$0xff]  ;;  %v4257_v41 = vld [vmem:[%s5203_s1 + $0x118] sm:$0xff] }
 0x149   : > { %v968_v46 = vadd.f32 %v959_v37, %v4647_v33  ;;  %v4739_v48 = vadd.f32 %v1055_v44, %v4672_v56 }
 0x14f   : > { %v996_v45 = vpop.f32.mrf.mxu2  ;;  %v1028_v18 = vpop.f32.mrf.mxu3 }
 0x150   : > { %v1002_v50 = vadd.f32 %v996_v45, %v821_v63  ;;  %v4741_v51 = vadd.f32 %v1028_v18, %v853_v12  ;;  %v962_v52 = vpop.f32.mrf.mxu1  ;;  %v1058_v54 = vpop.f32.mrf.mxu0 }
 0x151   : > { %v969_v58 = vadd.f32 %v962_v52, %v4654_v43  ;;  %v4746_v24 = vadd.f32 %v1058_v54, %v4689_v53  ;;  %v4256_v52 = vld [vmem:[%s5203_s1 + $0x108] sm:$0xff]  ;;  %v4261_v54 = vld [vmem:[%s5203_s1 + $0x178] sm:$0xff] }
 0x153   : > { %3722 = vmatmul.msk.bf16.gmra.mxu1 %vm245_vm0, %v4233_v35  ;;  %3746 = vmatmul.msk.bf16.gmra.mxu0 %vm245_vm0, %v4233_v35 }
 0x154   : > { %3773 = vmatmul.msk.bf16.vlgmr.msra.gmra.mxu2 %vm245_vm0, %v4238_v55  ;;  %3781 = vmatmul.msk.bf16.vlgmr.msra.gmra.mxu3 %vm245_vm0, %v4238_v55 }
 0x155   : > { %2030 = vmatpush.bf16.msra.mxu2 %v4253_v3  ;;  %2062 = vmatpush.bf16.msra.mxu3 %v4254_v4 }
 0x157   : > { %v1138_v33 = vpop.f32.mrf.mxu2  ;;  %v1170_v56 = vpop.f32.mrf.mxu3 }
 0x158   : > { %v1148_v59 = vadd.f32 %v1138_v33, %v967_v36  ;;  %v1180_v61 = vadd.f32 %v1170_v56, %v999_v21  ;;  %v964_v0 = vpop.f32.mrf.mxu1  ;;  %v1060_v1 = vpop.f32.mrf.mxu0 }
 0x159   : > { %v970_v43 = vadd.f32 %v964_v0, %v4664_v49  ;;  %v4754_v47 = vadd.f32 %v1060_v1, %v4695_v13  ;;  %v4239_v49 = vld [vmem:[%s4405_s3 + $0x38] sm:$0xff] }
 0x15f   : > { %v1140_v53 = vpop.f32.mrf.mxu2  ;;  %v1172_v6 = vpop.f32.mrf.mxu3 }
 0x160   : > { %v1149_v5 = vadd.f32 %v1140_v53, %v968_v46  ;;  %v1181_v60 = vadd.f32 %v1172_v6, %v1000_v31  ;;  %v1106_v8 = vpop.f32.mrf.mxu1  ;;  %v1202_v9 = vpop.f32.mrf.mxu0  ;;  %v4778_v31 = vld [vmem:[%s4405_s3 + $0x40] sm:$0xff] }
 0x161   : > { %v1116_v12 = vadd.f32 %v1106_v8, %v4677_v62  ;;  %v1212_v13 = vadd.f32 %v1202_v9, %v4706_v22 }
 0x163   : > { %3765 = vmatmul.msk.bf16.vlgmr.msrb.gmra.mxu1 %vm245_vm0, %v4238_v55  ;;  %3789 = vmatmul.msk.bf16.vlgmr.msrb.gmra.mxu0 %vm245_vm0, %v4238_v55 }
 0x164   : > { %3774 = vmatmul.msk.bf16.gmra.mxu2 %vm245_vm0, %v4239_v49  ;;  %3782 = vmatmul.msk.bf16.gmra.mxu3 %vm245_vm0, %v4239_v49 }
 0x165   : > { %1977 = vmatpush.bf16.msrb.mxu1 %v4250_v14  ;;  %2094 = vmatpush.bf16.msrb.mxu0 %v4255_v15 }
 0x167   : > { %v1143_v62 = vpop.f32.mrf.mxu2  ;;  %v1175_v16 = vpop.f32.mrf.mxu3 }
 0x168   : > { %v1150_v19 = vadd.f32 %v1143_v62, %v969_v58  ;;  %v1182_v57 = vadd.f32 %v1175_v16, %v1001_v42  ;;  %v1108_v17 = vpop.f32.mrf.mxu1  ;;  %v1204_v21 = vpop.f32.mrf.mxu0  ;;  %v4260_v42 = vld [vmem:[%s5203_s1 + $0x168] sm:$0xff] }
 0x169   : > { %v1117_v22 = vadd.f32 %v1108_v17, %v4693_v7  ;;  %v1213_v25 = vadd.f32 %v1204_v21, %v4718_v32  ;;  %v4264_v17 = vld [vmem:[%s5203_s1 + $0x1a8] sm:$0xff] }
 0x16f   : > { %v1145_v26 = vpop.f32.mrf.mxu2  ;;  %v1177_v63 = vpop.f32.mrf.mxu3 }
 0x170   : > { %v1151_v27 = vadd.f32 %v1145_v26, %v970_v43  ;;  %v1183_v28 = vadd.f32 %v1177_v63, %v1002_v50  ;;  %v1111_v29 = vpop.f32.mrf.mxu1  ;;  %v1207_v30 = vpop.f32.mrf.mxu0  ;;  %v4797_v50 = vld [vmem:[%s4405_s3 + $0x48] sm:$0xff] }
 0x171   : > { %v1118_v34 = vadd.f32 %v1111_v29, %v4700_v20  ;;  %v1214_v11 = vadd.f32 %v1207_v30, %v4735_v10 }
 0x173   : > { %3766 = vmatmul.msk.bf16.gmra.mxu1 %vm245_vm0, %v4239_v49  ;;  %3790 = vmatmul.msk.bf16.gmra.mxu0 %vm245_vm0, %v4239_v49 }
 0x174   : > { %3817 = vmatmul.msk.bf16.vlgmr.msrb.gmra.mxu2 %vm245_vm0, %v4778_v31  ;;  %3825 = vmatmul.msk.bf16.vlgmr.msrb.gmra.mxu3 %vm245_vm0, %v4778_v31 }
 0x175   : > { %2158 = vmatpush.bf16.msrb.mxu2 %v4257_v41  ;;  %2211 = vmatpush.bf16.msrb.mxu3 %v4260_v42 }
 0x177   : > { %v1287_v7 = vpop.f32.mrf.mxu2  ;;  %v1319_v32 = vpop.f32.mrf.mxu3 }
 0x178   : > { %v1297_v35 = vadd.f32 %v1287_v7, %v1148_v59  ;;  %v1329_v36 = vadd.f32 %v1319_v32, %v1180_v61  ;;  %v1113_v39 = vpop.f32.mrf.mxu1  ;;  %v1209_v40 = vpop.f32.mrf.mxu0 }
 0x179   : > { %v1119_v20 = vadd.f32 %v1113_v39, %v4710_v2  ;;  %v1215_v23 = vadd.f32 %v1209_v40, %v4741_v51 }
 0x17f   : > { %v1289_v10 = vpop.f32.mrf.mxu2  ;;  %v1321_v37 = vpop.f32.mrf.mxu3 }
 0x180   : > { %v1298_v44 = vadd.f32 %v1289_v10, %v1149_v5  ;;  %v1330_v46 = vadd.f32 %v1321_v37, %v1181_v60  ;;  %v1255_v45 = vpop.f32.mrf.mxu1  ;;  %v1351_v18 = vpop.f32.mrf.mxu0  ;;  %v4814_v60 = vld [vmem:[%s4405_s3 + $0x44] sm:$0xff] }
 0x181   : > { %v1265_v2 = vadd.f32 %v1255_v45, %v1116_v12  ;;  %v1361_v51 = vadd.f32 %v1351_v18, %v1212_v13 }
 0x183   : > { %3809 = vmatmul.msk.bf16.vlgmr.msra.gmra.mxu1 %vm245_vm0, %v4778_v31  ;;  %3833 = vmatmul.msk.bf16.vlgmr.msra.gmra.mxu0 %vm245_vm0, %v4778_v31 }
 0x184   : > { %3818 = vmatmul.msk.bf16.gmra.mxu2 %vm245_vm0, %v4797_v50  ;;  %3826 = vmatmul.msk.bf16.gmra.mxu3 %vm245_vm0, %v4797_v50 }
 0x185   : > { %2126 = vmatpush.bf16.msra.mxu1 %v4256_v52  ;;  %2243 = vmatpush.bf16.msra.mxu0 %v4261_v54 }
 0x187   : > { %v1292_v55 = vpop.f32.mrf.mxu2  ;;  %v1324_v58 = vpop.f32.mrf.mxu3 }
 0x188   : > { %v1299_v33 = vadd.f32 %v1292_v55, %v1150_v19  ;;  %v1331_v56 = vadd.f32 %v1324_v58, %v1182_v57  ;;  %v1257_v59 = vpop.f32.mrf.mxu1  ;;  %v1353_v61 = vpop.f32.mrf.mxu0  ;;  %v4263_v57 = vld [vmem:[%s5203_s1 + $0x198] sm:$0xff] }
 0x189   : > { %v1266_v0 = vadd.f32 %v1257_v59, %v1117_v22  ;;  %v1362_v1 = vadd.f32 %v1353_v61, %v1213_v25  ;;  %v4270_v59 = vld [vmem:[%s5203_s1 + $0x228] sm:$0xff] }
 0x18f   : > { %v1294_v43 = vpop.f32.mrf.mxu2  ;;  %v1326_v3 = vpop.f32.mrf.mxu3 }
 0x190   : > { %v1300_v4 = vadd.f32 %v1294_v43, %v1151_v27  ;;  %v1332_v53 = vadd.f32 %v1326_v3, %v1183_v28  ;;  %v1260_v6 = vpop.f32.mrf.mxu1  ;;  %v1356_v5 = vpop.f32.mrf.mxu0  ;;  %v4831_v28 = vld [vmem:[%s4405_s3 + $0x4c] sm:$0xff] }
 0x191   : > { %v1267_v8 = vadd.f32 %v1260_v6, %v1118_v34  ;;  %v1363_v9 = vadd.f32 %v1356_v5, %v1214_v11  ;;  %v4262_v34 = vld [vmem:[%s5203_s1 + $0x188] sm:$0xff]  ;;  %v4267_v11 = vld [vmem:[%s5203_s1 + $0x1f8] sm:$0xff] }
 0x193   : > { %3810 = vmatmul.msk.bf16.gmra.mxu1 %vm245_vm0, %v4797_v50  ;;  %3834 = vmatmul.msk.bf16.gmra.mxu0 %vm245_vm0, %v4797_v50 }
 0x194   : > { %3861 = vmatmul.msk.bf16.vlgmr.msra.gmra.mxu2 %vm245_vm0, %v4814_v60  ;;  %3869 = vmatmul.msk.bf16.vlgmr.msra.gmra.mxu3 %vm245_vm0, %v4814_v60 }
 0x195   : > { %2307 = vmatpush.bf16.msra.mxu2 %v4263_v57  ;;  %2339 = vmatpush.bf16.msra.mxu3 %v4264_v17 }
 0x197   : > { %v1436_v49 = vpop.f32.mrf.mxu2  ;;  %v1468_v12 = vpop.f32.mrf.mxu3 }
 0x198   : > { %v1446_v13 = vadd.f32 %v1436_v49, %v1297_v35  ;;  %v1478_v14 = vadd.f32 %v1468_v12, %v1329_v36  ;;  %v1262_v15 = vpop.f32.mrf.mxu1  ;;  %v1358_v62 = vpop.f32.mrf.mxu0 }
 0x199   : > { %v1268_v16 = vadd.f32 %v1262_v15, %v1119_v20  ;;  %v1364_v19 = vadd.f32 %v1358_v62, %v1215_v23 }
 0x19f   : > { %v1438_v21 = vpop.f32.mrf.mxu2  ;;  %v1470_v22 = vpop.f32.mrf.mxu3 }
 0x1a0   : > { %v1447_v25 = vadd.f32 %v1438_v21, %v1298_v44  ;;  %v1479_v26 = vadd.f32 %v1470_v22, %v1330_v46  ;;  %v1404_v63 = vpop.f32.mrf.mxu1  ;;  %v1500_v27 = vpop.f32.mrf.mxu0  ;;  %v4848_v46 = vld [vmem:[%s4405_s3 + $0x48] sm:$0xff] }
 0x1a1   : > { %v1414_v29 = vadd.f32 %v1404_v63, %v1265_v2  ;;  %v1510_v30 = vadd.f32 %v1500_v27, %v1361_v51 }
 0x1a3   : > { %3841 = vmatmul.msk.bf16.vlgmr.msrb.gmra.mxu1 %vm245_vm0, %v4778_v31  ;;  %3877 = vmatmul.msk.bf16.vlgmr.msrb.gmra.mxu0 %vm245_vm0, %v4814_v60 }
 0x1a4   : > { %3862 = vmatmul.msk.bf16.gmra.mxu2 %vm245_vm0, %v4831_v28  ;;  %3870 = vmatmul.msk.bf16.gmra.mxu3 %vm245_vm0, %v4831_v28 }
 0x1a5   : > { %2275 = vmatpush.bf16.msrb.mxu1 %v4262_v34  ;;  %2392 = vmatpush.bf16.msrb.mxu0 %v4267_v11 }
 0x1a7   : > { %v1441_v31 = vpop.f32.mrf.mxu2  ;;  %v1473_v7 = vpop.f32.mrf.mxu3 }
 0x1a8   : > { %v1448_v32 = vadd.f32 %v1441_v31, %v1299_v33  ;;  %v1480_v35 = vadd.f32 %v1473_v7, %v1331_v56  ;;  %v1406_v36 = vpop.f32.mrf.mxu1  ;;  %v1502_v39 = vpop.f32.mrf.mxu0 }
 0x1a9   : > { %v1415_v40 = vadd.f32 %v1406_v36, %v1266_v0  ;;  %v1511_v20 = vadd.f32 %v1502_v39, %v1362_v1 }
 0x1af   : > { %v1443_v23 = vpop.f32.mrf.mxu2  ;;  %v1475_v41 = vpop.f32.mrf.mxu3 }
 0x1b0   : > { %v1449_v42 = vadd.f32 %v1443_v23, %v1300_v4  ;;  %v1481_v10 = vadd.f32 %v1475_v41, %v1332_v53  ;;  %v1409_v37 = vpop.f32.mrf.mxu1  ;;  %v1505_v44 = vpop.f32.mrf.mxu0  ;;  %v4865_v53 = vld [vmem:[%s4405_s3 + $0x50] sm:$0xff] }
 0x1b1   : > { %v1416_v45 = vadd.f32 %v1409_v37, %v1267_v8  ;;  %v1512_v18 = vadd.f32 %v1505_v44, %v1363_v9  ;;  %v4268_v8 = vld [vmem:[%s5203_s1 + $0x208] sm:$0xff]  ;;  %v4271_v9 = vld [vmem:[%s5203_s1 + $0x238] sm:$0xff]  ;;  %v4274_v44 = vld [vmem:[%s5203_s1 + $0x50] sm:$0xff] }
 0x1b3   : > { %3842 = vmatmul.msk.bf16.gmra.mxu1 %vm245_vm0, %v4797_v50  ;;  %3878 = vmatmul.msk.bf16.gmra.mxu0 %vm245_vm0, %v4831_v28  ;;  %v4269_v50 = vld [vmem:[%s5203_s1 + $0x218] sm:$0xff] }
 0x1b4   : > { %3893 = vmatmul.msk.bf16.vlgmr.msrb.gmra.mxu2 %vm245_vm0, %v4814_v60  ;;  %3913 = vmatmul.msk.bf16.vlgmr.msrb.gmra.mxu3 %vm245_vm0, %v4848_v46 }
 0x1b5   : > { %2456 = vmatpush.bf16.msrb.mxu2 %v4269_v50  ;;  %2488 = vmatpush.bf16.msrb.mxu3 %v4270_v59  ;;  %v4266_v50 = vld [vmem:[%s4405_s3 + $0x54] sm:$0xff] }
 0x1b7   : > { %v1585_v2 = vpop.f32.mrf.mxu2  ;;  %v1617_v51 = vpop.f32.mrf.mxu3 }
 0x1b8   : > { %v1595_v52 = vadd.f32 %v1585_v2, %v1446_v13  ;;  %v1627_v54 = vadd.f32 %v1617_v51, %v1478_v14  ;;  %v1411_v55 = vpop.f32.mrf.mxu1  ;;  %v1507_v58 = vpop.f32.mrf.mxu0 }
 0x1b9   : > { %v1417_v33 = vadd.f32 %v1411_v55, %v1268_v16  ;;  %v1513_v56 = vadd.f32 %v1507_v58, %v1364_v19 }
 0x1bf   : > { %v1587_v61 = vpop.f32.mrf.mxu2  ;;  %v1619_v0 = vpop.f32.mrf.mxu3 }
 0x1c0   : > { %v1596_v1 = vadd.f32 %v1587_v61, %v1447_v25  ;;  %v1628_v43 = vadd.f32 %v1619_v0, %v1479_v26  ;;  %v1553_v3 = vpop.f32.mrf.mxu1  ;;  %v1649_v4 = vpop.f32.mrf.mxu0 }
 0x1c1   : > { %v1563_v6 = vadd.f32 %v1553_v3, %v1414_v29  ;;  %v1659_v5 = vadd.f32 %v1649_v4, %v1510_v30 }
 0x1c3   : > { %3885 = vmatmul.msk.bf16.vlgmr.msra.gmra.mxu1 %vm245_vm0, %v4814_v60  ;;  %3921 = vmatmul.msk.bf16.vlgmr.msra.gmra.mxu0 %vm245_vm0, %v4848_v46 }
 0x1c4   : > { %3894 = vmatmul.msk.bf16.gmra.mxu2 %vm245_vm0, %v4831_v28  ;;  %3914 = vmatmul.msk.bf16.gmra.mxu3 %vm245_vm0, %v4865_v53 }
 0x1c5   : > { %2424 = vmatpush.bf16.msra.mxu1 %v4268_v8  ;;  %2520 = vmatpush.bf16.msra.mxu0 %v4271_v9 }
 0x1c7   : > { %v1590_v60 = vpop.f32.mrf.mxu2  ;;  %v1622_v49 = vpop.f32.mrf.mxu3 }
 0x1c8   : > { %v1597_v12 = vadd.f32 %v1590_v60, %v1448_v32  ;;  %v1629_v13 = vadd.f32 %v1622_v49, %v1480_v35  ;;  %v1555_v14 = vpop.f32.mrf.mxu1  ;;  %v1651_v15 = vpop.f32.mrf.mxu0  ;;  %v4276_v35 = vld [vmem:[%s5203_s1 + $0x70] sm:$0xff] }
 0x1c9   : > { %v1564_v62 = vadd.f32 %v1555_v14, %v1415_v40  ;;  %v1660_v16 = vadd.f32 %v1651_v15, %v1511_v20  ;;  %v4265_v40 = vld [vmem:[%s4405_s3 + $0x4c] sm:$0xff] }
 0x1cf   : > { %v1592_v19 = vpop.f32.mrf.mxu2  ;;  %v1624_v57 = vpop.f32.mrf.mxu3 }
 0x1d0   : > { %v1598_v17 = vadd.f32 %v1592_v19, %v1449_v42  ;;  %v1630_v21 = vadd.f32 %v1624_v57, %v1481_v10  ;;  %v1558_v22 = vpop.f32.mrf.mxu1  ;;  %v1654_v25 = vpop.f32.mrf.mxu0 }
 0x1d1   : > { %v1565_v26 = vadd.f32 %v1558_v22, %v1416_v45  ;;  %v1661_v63 = vadd.f32 %v1654_v25, %v1512_v18  ;;  %v4277_v45 = vld [vmem:[%s5203_s1 + $0x80] sm:$0xff]  ;;  %v4283_v25 = vld [vmem:[%s5203_s1 + $0x110] sm:$0xff] }
 0x1d2   : > { %v4280_v22 = vld [vmem:[%s5203_s1 + $0xe0] sm:$0xff] }
 0x1d3   : > { %3886 = vmatmul.msk.bf16.gmra.mxu1 %vm245_vm0, %v4831_v28  ;;  %3922 = vmatmul.msk.bf16.gmra.mxu0 %vm245_vm0, %v4865_v53  ;;  %v4275_v28 = vld [vmem:[%s5203_s1 + $0x60] sm:$0xff] }
 0x1d4   : > { %3937 = vmatmul.msk.bf16.vlgmr.msra.gmra.mxu2 %vm245_vm0, %v4848_v46  ;;  %3945 = vmatmul.msk.bf16.vlgmr.msra.gmra.mxu3 %vm245_vm0, %v4848_v46 }
 0x1d5   : > { %2605 = vmatpush.bf16.msra.mxu2 %v4275_v28  ;;  %2637 = vmatpush.bf16.msra.mxu3 %v4276_v35 }
 0x1d7   : > { %v1734_v27 = vpop.f32.mrf.mxu2  ;;  %v1766_v29 = vpop.f32.mrf.mxu3 }
 0x1d8   : > { %v1744_v30 = vadd.f32 %v1734_v27, %v1595_v52  ;;  %v1776_v34 = vadd.f32 %v1766_v29, %v1627_v54  ;;  %v1560_v11 = vpop.f32.mrf.mxu1  ;;  %v1656_v31 = vpop.f32.mrf.mxu0 }
 0x1d9   : > { %v1566_v7 = vadd.f32 %v1560_v11, %v1417_v33  ;;  %v1662_v32 = vadd.f32 %v1656_v31, %v1513_v56 }
 0x1df   : > { %v1736_v36 = vpop.f32.mrf.mxu2  ;;  %v1768_v39 = vpop.f32.mrf.mxu3 }
 0x1e0   : > { %v1745_v20 = vadd.f32 %v1736_v36, %v1596_v1  ;;  %v1777_v23 = vadd.f32 %v1768_v39, %v1628_v43  ;;  %v1702_v41 = vpop.f32.mrf.mxu1  ;;  %v1798_v42 = vpop.f32.mrf.mxu0 }
 0x1e1   : > { %v1712_v10 = vadd.f32 %v1702_v41, %v1563_v6  ;;  %v1808_v37 = vadd.f32 %v1798_v42, %v1659_v5 }
 0x1e3   : > { %3929 = vmatmul.msk.bf16.vlgmr.msrb.gmra.mxu1 %vm245_vm0, %v4848_v46  ;;  %3965 = vmatmul.msk.bf16.vlgmr.msrb.gmra.mxu0 %vm245_vm0, %v4265_v40 }
 0x1e4   : > { %3938 = vmatmul.msk.bf16.gmra.mxu2 %vm245_vm0, %v4865_v53  ;;  %3946 = vmatmul.msk.bf16.gmra.mxu3 %vm245_vm0, %v4865_v53 }
 0x1e5   : > { %2573 = vmatpush.bf16.msrb.mxu1 %v4274_v44  ;;  %2669 = vmatpush.bf16.msrb.mxu0 %v4277_v45 }
 0x1e7   : > { %v1739_v46 = vpop.f32.mrf.mxu2  ;;  %v1771_v18 = vpop.f32.mrf.mxu3 }
 0x1e8   : > { %v1746_v2 = vadd.f32 %v1739_v46, %v1597_v12  ;;  %v1778_v51 = vadd.f32 %v1771_v18, %v1629_v13  ;;  %v1704_v52 = vpop.f32.mrf.mxu1  ;;  %v1800_v54 = vpop.f32.mrf.mxu0  ;;  %v4281_v13 = vld [vmem:[%s5203_s1 + $0xf0] sm:$0xff] }
 0x1e9   : > { %v1713_v55 = vadd.f32 %v1704_v52, %v1564_v62  ;;  %v1809_v58 = vadd.f32 %v1800_v54, %v1660_v16 }
 0x1ef   : > { %v1741_v33 = vpop.f32.mrf.mxu2  ;;  %v1773_v56 = vpop.f32.mrf.mxu3 }
 0x1f0   : > { %v1747_v59 = vadd.f32 %v1741_v33, %v1598_v17  ;;  %v1779_v61 = vadd.f32 %v1773_v56, %v1630_v21  ;;  %v1707_v0 = vpop.f32.mrf.mxu1  ;;  %v1803_v1 = vpop.f32.mrf.mxu0 }
 0x1f1   : > { %v1714_v43 = vadd.f32 %v1707_v0, %v1565_v26  ;;  %v1810_v3 = vadd.f32 %v1803_v1, %v1661_v63  ;;  %v4286_v0 = vld [vmem:[%s5203_s1 + $0x170] sm:$0xff]  ;;  %v4289_v1 = vld [vmem:[%s5203_s1 + $0x1a0] sm:$0xff] }
 0x1f3   : > { %3930 = vmatmul.msk.bf16.gmra.mxu1 %vm245_vm0, %v4865_v53  ;;  %3966 = vmatmul.msk.bf16.gmra.mxu0 %vm245_vm0, %v4266_v50  ;;  %v4282_v53 = vld [vmem:[%s5203_s1 + $0x100] sm:$0xff] }
 0x1f4   : > { %3981 = vmatmul.msk.bf16.vlgmr.msrb.gmra.mxu2 %vm245_vm0, %v4265_v40  ;;  %3989 = vmatmul.msk.bf16.vlgmr.msrb.gmra.mxu3 %vm245_vm0, %v4265_v40 }
 0x1f5   : > { %2754 = vmatpush.bf16.msrb.mxu2 %v4281_v13  ;;  %2786 = vmatpush.bf16.msrb.mxu3 %v4282_v53 }
 0x1f7   : > { %v1883_v4 = vpop.f32.mrf.mxu2  ;;  %v1915_v6 = vpop.f32.mrf.mxu3 }
 0x1f8   : > { %v1893_v5 = vadd.f32 %v1883_v4, %v1744_v30  ;;  %v4915_v8 = vadd.f32 %v1915_v6, %v1776_v34  ;;  %v1709_v9 = vpop.f32.mrf.mxu1  ;;  %v1805_v60 = vpop.f32.mrf.mxu0 }
 0x1f9   : > { %v1715_v49 = vadd.f32 %v1709_v9, %v1566_v7  ;;  %v1811_v12 = vadd.f32 %v1805_v60, %v1662_v32 }
 0x1ff   : > { %v1885_v14 = vpop.f32.mrf.mxu2  ;;  %v1917_v15 = vpop.f32.mrf.mxu3 }
 0x200   : > { %v1894_v62 = vadd.f32 %v1885_v14, %v1745_v20  ;;  %v4923_v16 = vadd.f32 %v1917_v15, %v1777_v23  ;;  %v1851_v19 = vpop.f32.mrf.mxu1  ;;  %v1947_v57 = vpop.f32.mrf.mxu0  ;;  %v4278_v15 = vld [vmem:[%s4405_s3 + $0x64] sm:$0xff] }
 0x201   : > { %v1861_v17 = vadd.f32 %v1851_v19, %v1712_v10  ;;  %v4925_v21 = vadd.f32 %v1947_v57, %v1808_v37 }
 0x203   : > { %3973 = vmatmul.msk.bf16.vlgmr.msra.gmra.mxu1 %vm245_vm0, %v4265_v40  ;;  %3997 = vmatmul.msk.bf16.vlgmr.msra.gmra.mxu0 %vm245_vm0, %v4265_v40  ;;  %v4272_v40 = vld [vmem:[%s4405_s3 + $0x60] sm:$0xff] }
 0x204   : > { %3982 = vmatmul.msk.bf16.gmra.mxu2 %vm245_vm0, %v4266_v50  ;;  %3990 = vmatmul.msk.bf16.gmra.mxu3 %vm245_vm0, %v4266_v50 }
 0x205   : > { %2722 = vmatpush.bf16.msra.mxu1 %v4280_v22  ;;  %2818 = vmatpush.bf16.msra.mxu0 %v4283_v25 }
 0x207   : > { %v1888_v26 = vpop.f32.mrf.mxu2  ;;  %v1920_v63 = vpop.f32.mrf.mxu3 }
 0x208   : > { %v1895_v27 = vadd.f32 %v1888_v26, %v1746_v2  ;;  %v4937_v29 = vadd.f32 %v1920_v63, %v1778_v51  ;;  %v1853_v30 = vpop.f32.mrf.mxu1  ;;  %v1949_v34 = vpop.f32.mrf.mxu0  ;;  %v4287_v2 = vld [vmem:[%s5203_s1 + $0x180] sm:$0xff]  ;;  %v4288_v51 = vld [vmem:[%s5203_s1 + $0x190] sm:$0xff] }
 0x209   : > { %v1862_v11 = vadd.f32 %v1853_v30, %v1713_v55  ;;  %v4939_v31 = vadd.f32 %v1949_v34, %v1809_v58  ;;  %v4293_v63 = vld [vmem:[%s5203_s1 + $0x210] sm:$0xff] }
 0x20f   : > { %v1890_v7 = vpop.f32.mrf.mxu2  ;;  %v1922_v32 = vpop.f32.mrf.mxu3 }
 0x210   : > { %v1896_v28 = vadd.f32 %v1890_v7, %v1747_v59  ;;  %v4941_v35 = vadd.f32 %v1922_v32, %v1779_v61  ;;  %v1856_v36 = vpop.f32.mrf.mxu1  ;;  %v1952_v39 = vpop.f32.mrf.mxu0  ;;  %v4279_v32 = vld [vmem:[%s4405_s3 + $0x6c] sm:$0xff] }
 0x211   : > { %v1863_v20 = vadd.f32 %v1856_v36, %v1714_v43  ;;  %v4944_v23 = vadd.f32 %v1952_v39, %v1810_v3  ;;  %v4292_v36 = vld [vmem:[%s5203_s1 + $0x200] sm:$0xff]  ;;  %v4295_v39 = vld [vmem:[%s5203_s1 + $0x230] sm:$0xff] }
 0x213   : > { %3974 = vmatmul.msk.bf16.gmra.mxu1 %vm245_vm0, %v4266_v50  ;;  %3998 = vmatmul.msk.bf16.gmra.mxu0 %vm245_vm0, %v4266_v50  ;;  %v4273_v50 = vld [vmem:[%s4405_s3 + $0x68] sm:$0xff] }
 0x214   : > { %4025 = vmatmul.msk.bf16.vlgmr.msra.gmra.mxu2 %vm245_vm0, %v4272_v40  ;;  %4033 = vmatmul.msk.bf16.vlgmr.msra.gmra.mxu3 %vm245_vm0, %v4272_v40 }
 0x215   : > { %2903 = vmatpush.bf16.msra.mxu2 %v4287_v2  ;;  %2935 = vmatpush.bf16.msra.mxu3 %v4288_v51 }
 0x217   : > { %v2032_v41 = vpop.f32.mrf.mxu2  ;;  %v2064_v42 = vpop.f32.mrf.mxu3 }
 0x218   : > { %v2042_v10 = vadd.f32 %v2032_v41, %v1861_v17  ;;  %v4950_v37 = vadd.f32 %v2064_v42, %v1893_v5  ;;  %v1858_v44 = vpop.f32.mrf.mxu1  ;;  %v1954_v45 = vpop.f32.mrf.mxu0 }
 0x219   : > { %v1864_v46 = vadd.f32 %v1858_v44, %v1715_v49  ;;  %v4952_v18 = vadd.f32 %v1954_v45, %v1811_v12 }
 0x21f   : > { %v2034_v52 = vpop.f32.mrf.mxu2  ;;  %v2066_v54 = vpop.f32.mrf.mxu3 }
 0x220   : > { %v2043_v55 = vadd.f32 %v2034_v52, %v1862_v11  ;;  %v4960_v58 = vadd.f32 %v2066_v54, %v1894_v62  ;;  %v1979_v33 = vpop.f32.mrf.mxu1  ;;  %v2096_v56 = vpop.f32.mrf.mxu0 }
 0x221   : > { %v1989_v59 = vadd.f32 %v1979_v33, %v4723_v38  ;;  %v4965_v61 = vadd.f32 %v2096_v56, %v4915_v8 }
 0x223   : > { %4017 = vmatmul.msk.bf16.vlgmr.msrb.gmra.mxu1 %vm245_vm0, %v4272_v40  ;;  %4041 = vmatmul.msk.bf16.vlgmr.msrb.gmra.mxu0 %vm245_vm0, %v4272_v40 }
 0x224   : > { %4026 = vmatmul.msk.bf16.gmra.mxu2 %vm245_vm0, %v4273_v50  ;;  %4034 = vmatmul.msk.bf16.gmra.mxu3 %vm245_vm0, %v4273_v50 }
 0x225   : > { %2871 = vmatpush.bf16.msrb.mxu1 %v4286_v0  ;;  %2967 = vmatpush.bf16.msrb.mxu0 %v4289_v1 }
 0x227   : > { %v2037_v38 = vpop.f32.mrf.mxu2  ;;  %v2069_v43 = vpop.f32.mrf.mxu3 }
 0x228   : > { %v2044_v3 = vadd.f32 %v2037_v38, %v1863_v20  ;;  %v4977_v4 = vadd.f32 %v2069_v43, %v1895_v27  ;;  %v1981_v6 = vpop.f32.mrf.mxu1  ;;  %v2098_v5 = vpop.f32.mrf.mxu0  ;;  %v4294_v27 = vld [vmem:[%s5203_s1 + $0x220] sm:$0xff] }
 0x229   : > { %v1990_v8 = vadd.f32 %v1981_v6, %v4739_v48  ;;  %v4981_v9 = vadd.f32 %v2098_v5, %v4923_v16 }
 0x22f   : > { %v2039_v60 = vpop.f32.mrf.mxu2  ;;  %v2071_v49 = vpop.f32.mrf.mxu3 }
 0x230   : > { %v2045_v12 = vadd.f32 %v2039_v60, %v1864_v46  ;;  %v4983_v13 = vadd.f32 %v2071_v49, %v1896_v28  ;;  %v1984_v53 = vpop.f32.mrf.mxu1  ;;  %v2101_v14 = vpop.f32.mrf.mxu0  ;;  %v4285_v60 = vld [vmem:[%s4405_s3 + $0x70] sm:$0xff] }
 0x231   : > { %v1991_v62 = vadd.f32 %v1984_v53, %v4746_v24  ;;  %v4988_v19 = vadd.f32 %v2101_v14, %v4937_v29 }
 0x233   : > { %4018 = vmatmul.msk.bf16.gmra.mxu1 %vm245_vm0, %v4273_v50  ;;  %4042 = vmatmul.msk.bf16.gmra.mxu0 %vm245_vm0, %v4273_v50 }
 0x234   : > { %4069 = vmatmul.msk.bf16.vlgmr.msrb.gmra.mxu2 %vm245_vm0, %v4278_v15  ;;  %4077 = vmatmul.msk.bf16.vlgmr.msrb.gmra.mxu3 %vm245_vm0, %v4278_v15 }
 0x235   : > { %3052 = vmatpush.bf16.msrb.mxu2 %v4293_v63  ;;  %3084 = vmatpush.bf16.msrb.mxu3 %v4294_v27  ;;  %v4290_v63 = vld [vmem:[%s4405_s3 + $0x6c] sm:$0xff] }
 0x237   : > { %v2160_v48 = vpop.f32.mrf.mxu2  ;;  %v2213_v16 = vpop.f32.mrf.mxu3 }
 0x238   : > { %v2170_v57 = vadd.f32 %v2160_v48, %v1989_v59  ;;  %v4994_v17 = vadd.f32 %v2213_v16, %v2042_v10  ;;  %v1986_v22 = vpop.f32.mrf.mxu1  ;;  %v2103_v25 = vpop.f32.mrf.mxu0 }
 0x239   : > { %v1992_v24 = vadd.f32 %v1986_v22, %v4754_v47  ;;  %v4998_v26 = vadd.f32 %v2103_v25, %v4941_v35 }
 0x23f   : > { %v2162_v29 = vpop.f32.mrf.mxu2  ;;  %v2215_v30 = vpop.f32.mrf.mxu3 }
 0x240   : > { %v2171_v34 = vadd.f32 %v2162_v29, %v1990_v8  ;;  %v5006_v11 = vadd.f32 %v2215_v30, %v2043_v55  ;;  %v2128_v7 = vpop.f32.mrf.mxu1  ;;  %v2245_v47 = vpop.f32.mrf.mxu0  ;;  %v4284_v55 = vld [vmem:[%s4405_s3 + $0x68] sm:$0xff] }
 0x241   : > { %v2138_v28 = vadd.f32 %v2128_v7, %v4925_v21  ;;  %v5011_v35 = vadd.f32 %v2245_v47, %v4950_v37 }
 0x243   : > { %4061 = vmatmul.msk.bf16.vlgmr.msra.gmra.mxu1 %vm245_vm0, %v4278_v15  ;;  %4085 = vmatmul.msk.bf16.vlgmr.msra.gmra.mxu0 %vm245_vm0, %v4278_v15 }
 0x244   : > { %4070 = vmatmul.msk.bf16.gmra.mxu2 %vm245_vm0, %v4279_v32  ;;  %4078 = vmatmul.msk.bf16.gmra.mxu3 %vm245_vm0, %v4279_v32 }
 0x245   : > { %3020 = vmatpush.bf16.msra.mxu1 %v4292_v36  ;;  %3116 = vmatpush.bf16.msra.mxu0 %v4295_v39 }
 0x247   : > { %v2165_v21 = vpop.f32.mrf.mxu2  ;;  %v2218_v40 = vpop.f32.mrf.mxu3 }
 0x248   : > { %v2172_v20 = vadd.f32 %v2165_v21, %v1991_v62  ;;  %v2225_v41 = vadd.f32 %v2218_v40, %v2044_v3  ;;  %v2130_v42 = vpop.f32.mrf.mxu1  ;;  %v2247_v10 = vpop.f32.mrf.mxu0 }
 0x249   : > { %v2139_v37 = vadd.f32 %v2130_v42, %v4939_v31  ;;  %v5025_v44 = vadd.f32 %v2247_v10, %v4960_v58 }
 0x24f   : > { %v2167_v45 = vpop.f32.mrf.mxu2  ;;  %v2220_v46 = vpop.f32.mrf.mxu3 }
 0x250   : > { %v2173_v2 = vadd.f32 %v2167_v45, %v1992_v24  ;;  %v2226_v51 = vadd.f32 %v2220_v46, %v2045_v12  ;;  %v2133_v52 = vpop.f32.mrf.mxu1  ;;  %v2250_v54 = vpop.f32.mrf.mxu0 }
 0x251   : > { %v2140_v33 = vadd.f32 %v2133_v52, %v4944_v23  ;;  %v5030_v56 = vadd.f32 %v2250_v54, %v4977_v4 }
 0x253   : > { %4062 = vmatmul.msk.bf16.gmra.mxu1 %vm245_vm0, %v4279_v32  ;;  %4086 = vmatmul.msk.bf16.gmra.mxu0 %vm245_vm0, %v4279_v32 }
 0x254   : > { %4113 = vmatmul.msk.bf16.vlgmr.msra.gmra.mxu2 %vm245_vm0, %v4284_v55  ;;  %4121 = vmatmul.msk.bf16.vlgmr.msra.gmra.mxu3 %vm245_vm0, %v4284_v55 }
 0x257   : > { %v2309_v31 = vpop.f32.mrf.mxu2  ;;  %v2341_v58 = vpop.f32.mrf.mxu3 }
 0x258   : > { %v2319_v50 = vadd.f32 %v2309_v31, %v2138_v28  ;;  %v2351_v59 = vadd.f32 %v2341_v58, %v2170_v57  ;;  %v2135_v0 = vpop.f32.mrf.mxu1  ;;  %v2252_v1 = vpop.f32.mrf.mxu0 }
 0x259   : > { %v2141_v23 = vadd.f32 %v2135_v0, %v4952_v18  ;;  %v5038_v38 = vadd.f32 %v2252_v1, %v4983_v13 }
 0x25f   : > { %v2311_v43 = vpop.f32.mrf.mxu2  ;;  %v2343_v3 = vpop.f32.mrf.mxu3 }
 0x260   : > { %v2320_v4 = vadd.f32 %v2311_v43, %v2139_v37  ;;  %v2352_v6 = vadd.f32 %v2343_v3, %v2171_v34  ;;  %v2277_v5 = vpop.f32.mrf.mxu1  ;;  %v2394_v8 = vpop.f32.mrf.mxu0 }
 0x261   : > { %v2287_v49 = vadd.f32 %v2277_v5, %v4965_v61  ;;  %v5043_v12 = vadd.f32 %v2394_v8, %v4994_v17 }
 0x263   : > { %4105 = vmatmul.msk.bf16.vlgmr.msrb.gmra.mxu1 %vm245_vm0, %v4284_v55  ;;  %4129 = vmatmul.msk.bf16.vlgmr.msrb.gmra.mxu0 %vm245_vm0, %v4284_v55 }
 0x264   : > { %4114 = vmatmul.msk.bf16.gmra.mxu2 %vm245_vm0, %v4285_v60  ;;  %4122 = vmatmul.msk.bf16.gmra.mxu3 %vm245_vm0, %v4285_v60 }
 0x267   : > { %v2314_v18 = vpop.f32.mrf.mxu2  ;;  %v2346_v13 = vpop.f32.mrf.mxu3 }
 0x268   : > { %v2321_v53 = vadd.f32 %v2314_v18, %v2140_v33  ;;  %v2353_v14 = vadd.f32 %v2346_v13, %v2172_v20  ;;  %v2279_v15 = vpop.f32.mrf.mxu1  ;;  %v2396_v62 = vpop.f32.mrf.mxu0 }
 0x269   : > { %v2288_v61 = vadd.f32 %v2279_v15, %v4981_v9  ;;  %v5051_v48 = vadd.f32 %v2396_v62, %v5006_v11 }
 0x26f   : > { %v2316_v16 = vpop.f32.mrf.mxu2  ;;  %v2348_v57 = vpop.f32.mrf.mxu3 }
 0x270   : > { %v2322_v17 = vadd.f32 %v2316_v16, %v2141_v23  ;;  %v2354_v22 = vadd.f32 %v2348_v57, %v2173_v2  ;;  %v2282_v25 = vpop.f32.mrf.mxu1  ;;  %v2399_v24 = vpop.f32.mrf.mxu0 }
 0x271   : > { %v2289_v27 = vadd.f32 %v2282_v25, %v4988_v19  ;;  %v5055_v29 = vadd.f32 %v2399_v24, %v2225_v41  ;;  %v4291_v41 = vld [vmem:[%s4405_s3 + $0x74] sm:$0xff]  ;;  %s4178_s3 = sshll.u32 %s5224_s9, 4 }
 0x272   : > { %s5159_s20 = scalar_lea.vmem %s5204_s2, %s4178_s3 }
 0x273   : > { %4106 = vmatmul.msk.bf16.gmra.mxu1 %vm245_vm0, %v4285_v60  ;;  %4130 = vmatmul.msk.bf16.gmra.mxu0 %vm245_vm0, %v4285_v60 }
 0x274   : > { %4157 = vmatmul.msk.bf16.vlgmr.msrb.gmra.mxu2 %vm245_vm0, %v4290_v63  ;;  %4165 = vmatmul.msk.bf16.vlgmr.msrb.gmra.mxu3 %vm245_vm0, %v4290_v63 }
 0x277   : > { %v2458_v9 = vpop.f32.mrf.mxu2  ;;  %v2490_v30 = vpop.f32.mrf.mxu3 }
 0x278   : > { %v2468_v34 = vadd.f32 %v2458_v9, %v2287_v49  ;;  %v2500_v11 = vadd.f32 %v2490_v30, %v2319_v50  ;;  %v2284_v7 = vpop.f32.mrf.mxu1  ;;  %v2401_v47 = vpop.f32.mrf.mxu0 }
 0x279   : > { %v2290_v32 = vadd.f32 %v2284_v7, %v4998_v26  ;;  %v5062_v19 = vadd.f32 %v2401_v47, %v2226_v51 }
 0x27f   : > { %v2460_v28 = vpop.f32.mrf.mxu2  ;;  %v2492_v36 = vpop.f32.mrf.mxu3 }
 0x280   : > { %v2469_v39 = vadd.f32 %v2460_v28, %v2288_v61  ;;  %v2501_v21 = vadd.f32 %v2492_v36, %v2320_v4  ;;  %v2426_v40 = vpop.f32.mrf.mxu1  ;;  %v2522_v20 = vpop.f32.mrf.mxu0 }
 0x281   : > { %v2436_v42 = vadd.f32 %v2426_v40, %v5011_v35  ;;  %v5066_v10 = vadd.f32 %v2522_v20, %v2351_v59 }
 0x283   : > { %4149 = vmatmul.msk.bf16.vlgmr.msra.gmra.mxu1 %vm245_vm0, %v4290_v63  ;;  %4173 = vmatmul.msk.bf16.vlgmr.msra.gmra.mxu0 %vm245_vm0, %v4290_v63 }
 0x284   : > { %4158 = vmatmul.msk.bf16.gmra.mxu2 %vm245_vm0, %v4291_v41  ;;  %4166 = vmatmul.msk.bf16.gmra.mxu3 %vm245_vm0, %v4291_v41 }
 0x287   : > { %v2463_v26 = vpop.f32.mrf.mxu2  ;;  %v2495_v37 = vpop.f32.mrf.mxu3 }
 0x288   : > { %v2470_v45 = vadd.f32 %v2463_v26, %v2289_v27  ;;  %v2502_v46 = vadd.f32 %v2495_v37, %v2321_v53  ;;  %v2428_v2 = vpop.f32.mrf.mxu1  ;;  %v2524_v51 = vpop.f32.mrf.mxu0 }
 0x289   : > { %v2437_v52 = vadd.f32 %v2428_v2, %v5025_v44  ;;  %v5073_v54 = vadd.f32 %v2524_v51, %v2352_v6 }
 0x28f   : > { %v2465_v35 = vpop.f32.mrf.mxu2  ;;  %v2497_v55 = vpop.f32.mrf.mxu3 }
 0x290   : > { %v2471_v33 = vadd.f32 %v2465_v35, %v2290_v32  ;;  %v2503_v31 = vadd.f32 %v2497_v55, %v2322_v17  ;;  %v2431_v58 = vpop.f32.mrf.mxu1  ;;  %v2527_v50 = vpop.f32.mrf.mxu0 }
 0x291   : > { %v2438_v59 = vadd.f32 %v2431_v58, %v5030_v56  ;;  %v5076_v0 = vadd.f32 %v2527_v50, %v2353_v14 }
 0x293   : > { %5205 = vst [vmem:[#allocation2_spill] sm:$0xff] %v5076_v0  ;;  %4150 = vmatmul.msk.bf16.gmra.mxu1 %vm245_vm0, %v4291_v41  ;;  %4174 = vmatmul.msk.bf16.gmra.mxu0 %vm245_vm0, %v4291_v41 }
 0x297   : > { %v2607_v1 = vpop.f32.mrf.mxu2  ;;  %v2639_v23 = vpop.f32.mrf.mxu3 }
 0x298   : > { %v5080_v43 = vadd.f32 %v2607_v1, %v2436_v42  ;;  %v5082_v44 = vadd.f32 %v2639_v23, %v2468_v34  ;;  %v2433_v3 = vpop.f32.mrf.mxu1  ;;  %v2529_v4 = vpop.f32.mrf.mxu0 }
 0x299   : > { %v2439_v6 = vadd.f32 %v2433_v3, %v5038_v38  ;;  %v5085_v5 = vadd.f32 %v2529_v4, %v2354_v22 }
 0x29b   : > { %5206 = vst [vmem:[#allocation3_spill] sm:$0xff] %v5085_v5 }
 0x29f   : > { %v2609_v8 = vpop.f32.mrf.mxu2  ;;  %v2641_v56 = vpop.f32.mrf.mxu3 }
 0x2a0   : > { %v5087_v60 = vadd.f32 %v2609_v8, %v2437_v52  ;;  %v5089_v49 = vadd.f32 %v2641_v56, %v2469_v39  ;;  %v2575_v18 = vpop.f32.mrf.mxu1  ;;  %v2671_v13 = vpop.f32.mrf.mxu0 }
 0x2a1   : > { %v2585_v53 = vadd.f32 %v2575_v18, %v5043_v12  ;;  %v2681_v14 = vadd.f32 %v2671_v13, %v2500_v11 }
 0x2a7   : > { %v2612_v15 = vpop.f32.mrf.mxu2  ;;  %v2644_v62 = vpop.f32.mrf.mxu3 }
 0x2a8   : > { %v5092_v61 = vadd.f32 %v2612_v15, %v2438_v59  ;;  %v5094_v16 = vadd.f32 %v2644_v62, %v2470_v45  ;;  %v2577_v38 = vpop.f32.mrf.mxu1  ;;  %v2673_v57 = vpop.f32.mrf.mxu0 }
 0x2a9   : > { %v5097_v17 = vadd.f32 %v2577_v38, %v5051_v48  ;;  %v5099_v22 = vadd.f32 %v2673_v57, %v2501_v21 }
 0x2af   : > { %v2614_v25 = vpop.f32.mrf.mxu2  ;;  %v2646_v24 = vpop.f32.mrf.mxu3 }
 0x2b0   : > { %v5101_v63 = vadd.f32 %v2614_v25, %v2439_v6  ;;  %v5103_v27 = vadd.f32 %v2646_v24, %v2471_v33  ;;  %v2580_v12 = vpop.f32.mrf.mxu1  ;;  %v2676_v9 = vpop.f32.mrf.mxu0 }
 0x2b1   : > { %v5106_v30 = vadd.f32 %v2580_v12, %v5055_v29  ;;  %v5108_v34 = vadd.f32 %v2676_v9, %v2502_v46 }
 0x2b7   : > { %v2756_v11 = vpop.f32.mrf.mxu2  ;;  %v2788_v7 = vpop.f32.mrf.mxu3 }
 0x2b8   : > { %v2582_v47 = vpop.f32.mrf.mxu1  ;;  %v2678_v48 = vpop.f32.mrf.mxu0  ;;  %v2766_v15 = vadd.f32 %v2756_v11, %v5080_v43  ;;  %v2798_v62 = vadd.f32 %v2788_v7, %v5082_v44 }
 0x2b9   : > { %v5111_v32 = vadd.f32 %v2582_v47, %v5062_v19  ;;  %v5113_v28 = vadd.f32 %v2678_v48, %v2503_v31 }
 0x2bf   : > { %v2758_v36 = vpop.f32.mrf.mxu2  ;;  %v2790_v39 = vpop.f32.mrf.mxu3 }
 0x2c0   : > { %v2724_v21 = vpop.f32.mrf.mxu1  ;;  %v2820_v40 = vpop.f32.mrf.mxu0  ;;  %v2799_v11 = vadd.f32 %v2790_v39, %v5089_v49 }
 0x2c1   : > { %v2734_v57 = vadd.f32 %v2724_v21, %v2585_v53  ;;  %v2830_v25 = vadd.f32 %v2820_v40, %v2681_v14 }
 0x2c7   : > { %v5115_v20 = vpop.f32.mrf.mxu2  ;;  %v5117_v41 = vpop.f32.mrf.mxu3 }
 0x2c8   : > { %v2726_v29 = vpop.f32.mrf.mxu1  ;;  %v2822_v42 = vpop.f32.mrf.mxu0  ;;  %v2768_v49 = vadd.f32 %v5115_v20, %v5092_v61 }
 0x2c9   : > { %v2735_v21 = vadd.f32 %v2726_v29, %v5097_v17  ;;  %v2831_v40 = vadd.f32 %v2822_v42, %v5099_v22 }
 0x2cf   : > { %v5119_v26 = vpop.f32.mrf.mxu2  ;;  %v5121_v37 = vpop.f32.mrf.mxu3 }
 0x2d0   : > { %v5123_v45 = vpop.f32.mrf.mxu1  ;;  %v5125_v19 = vpop.f32.mrf.mxu0 }
 0x2d1   : > { %v2736_v20 = vadd.f32 %v5123_v45, %v5106_v30  ;;  %v2769_v30 = vadd.f32 %v5119_v26, %v5101_v63 }
 0x2d7   : > { %v2905_v46 = vpop.f32.mrf.mxu2  ;;  %v2937_v2 = vpop.f32.mrf.mxu3 }
 0x2d8   : > { %v5127_v51 = vpop.f32.mrf.mxu1  ;;  %v5129_v52 = vpop.f32.mrf.mxu0  ;;  %v2915_v38 = vadd.f32 %v2905_v46, %v2766_v15  ;;  %v2947_v24 = vadd.f32 %v2937_v2, %v2798_v62  ;;  %v3185_v62 = vrot.slane %v5073_v54, 4  ;;  %v2801_v54 = vadd.f32 %v5121_v37, %v5103_v27  ;;  %v5213_v27 = vld [vmem:[#allocation2_spill] sm:$0xff] }
 0x2d9   : > { %5207 = vst [vmem:[#allocation4_spill] sm:$0xff] %v5129_v52  ;;  %v3186_v37 = vrot.slane %v5213_v27, 4 }
 0x2df   : > { %v2907_v35 = vpop.f32.mrf.mxu2  ;;  %v2939_v55 = vpop.f32.mrf.mxu3 }
 0x2e0   : > { %v2873_v33 = vpop.f32.mrf.mxu1  ;;  %v2969_v31 = vpop.f32.mrf.mxu0  ;;  %v2948_v46 = vadd.f32 %v2939_v55, %v2799_v11  ;;  %v2832_v55 = vadd.f32 %v5125_v19, %v5108_v34  ;;  %v5211_v63 = vld [vmem:[#allocation4_spill] sm:$0xff] }
 0x2e1   : > { %v2883_v9 = vadd.f32 %v2873_v33, %v2734_v57  ;;  %v2979_v47 = vadd.f32 %v2969_v31, %v2830_v25  ;;  %v2833_v26 = vadd.f32 %v5211_v63, %v5113_v28 }
 0x2e7   : > { %v2910_v58 = vpop.f32.mrf.mxu2  ;;  %v5131_v50 = vpop.f32.mrf.mxu3 }
 0x2e8   : > { %v2875_v59 = vpop.f32.mrf.mxu1  ;;  %v2971_v1 = vpop.f32.mrf.mxu0 }
 0x2ef   : > { %v5133_v23 = vpop.f32.mrf.mxu2  ;;  %v5135_v3 = vpop.f32.mrf.mxu3 }
 0x2f0   : > { %5208 = vst [vmem:[#allocation5_spill] sm:$0xff] %v5135_v3  ;;  %v5137_v4 = vpop.f32.mrf.mxu1  ;;  %v5139_v6 = vpop.f32.mrf.mxu0 }
 0x2f7   : > { %v3054_v8 = vpop.f32.mrf.mxu2  ;;  %v3086_v56 = vpop.f32.mrf.mxu3 }
 0x2f8   : > { %v5141_v18 = vpop.f32.mrf.mxu1  ;;  %v5143_v13 = vpop.f32.mrf.mxu0  ;;  %v3064_v12 = vadd.f32 %v3054_v8, %v2915_v38  ;;  %v3096_v48 = vadd.f32 %v3086_v56, %v2947_v24 }
 0x2f9   : > { %5209 = vst [vmem:[#allocation6_spill] sm:$0xff] %v5141_v18 }
 0x2fa   : > { %5210 = vst [vmem:[#allocation7_spill] sm:$0xff] %v5143_v13  ;;  %v2767_v13 = vadd.f32 %v2758_v36, %v5087_v60  ;;  %v3136_v52 = vrot.slane %v3064_v12, 1  ;;  %v3152_v14 = vrot.slane %v3096_v48, 2  ;;  %v3184_v60 = vrot.slane %v5066_v10, 4  ;;  %v5212_v48 = vld [vmem:[#allocation5_spill] sm:$0xff] }
 0x2fb   : > { %v2884_v36 = vadd.f32 %v2875_v59, %v2735_v21  ;;  %v2918_v12 = vadd.f32 %v5133_v23, %v2769_v30 }
 0x2fc   : > { %v2916_v53 = vadd.f32 %v2907_v35, %v2767_v13 }
 0x2ff   : > { %v3056_v5 = vpop.f32.mrf.mxu2  ;;  %v3088_v0 = vpop.f32.mrf.mxu3 }
 0x300   : > { %v3022_v3 = vpop.f32.mrf.mxu1  ;;  %v3118_v18 = vpop.f32.mrf.mxu0  ;;  %v3065_v2 = vadd.f32 %v3056_v5, %v2916_v53  ;;  %v3097_v8 = vadd.f32 %v3088_v0, %v2948_v46  ;;  %v2800_v0 = vadd.f32 %v5117_v41, %v5094_v16  ;;  %v2885_v16 = vadd.f32 %v5137_v4, %v2736_v20  ;;  %v5214_v23 = vld [vmem:[#allocation6_spill] sm:$0xff] }
 0x301   : > { %v3032_v43 = vadd.f32 %v3022_v3, %v2883_v9  ;;  %v3128_v44 = vadd.f32 %v3118_v18, %v2979_v47  ;;  %v2980_v3 = vadd.f32 %v2971_v1, %v2831_v40  ;;  %v2981_v41 = vadd.f32 %v5139_v6, %v2832_v55 }
 0x302   : > { %v3137_v22 = vrot.slane %v3065_v2, 1  ;;  %v3153_v35 = vrot.slane %v3097_v8, 2  ;;  %v2949_v59 = vadd.f32 %v5131_v50, %v2800_v0  ;;  %v2737_v9 = vadd.f32 %v5127_v51, %v5111_v32 }
 0x303   : > { %v3144_v7 = vadd.f32 %v3136_v52, %v3032_v43  ;;  %v3168_v31 = vrot.slane %v3128_v44, 3  ;;  %v2917_v52 = vadd.f32 %v2910_v58, %v2768_v49  ;;  %v2950_v43 = vadd.f32 %v5212_v48, %v2801_v54 }
 0x305   : > { %v3160_v33 = vadd.f32 %v3152_v14, %v3144_v7  ;;  %v2886_v14 = vadd.f32 %v5214_v23, %v2737_v9  ;;  %v5215_v7 = vld [vmem:[#allocation7_spill] sm:$0xff] }
 0x306   : > { %v2982_v21 = vadd.f32 %v5215_v7, %v2833_v26 }
 0x307   : > { %v3176_v56 = vadd.f32 %v3168_v31, %v3160_v33  ;;  %v3059_v18 = vpop.f32.mrf.mxu2  ;;  %v3091_v42 = vpop.f32.mrf.mxu3 }
 0x308   : > { %v3024_v5 = vpop.f32.mrf.mxu1  ;;  %v3120_v17 = vpop.f32.mrf.mxu0  ;;  %v3066_v1 = vadd.f32 %v3059_v18, %v2917_v52  ;;  %v3098_v58 = vadd.f32 %v3091_v42, %v2949_v59 }
 0x309   : > { %v3192_v39 = vadd.f32 %v3184_v60, %v3176_v56  ;;  %v3033_v10 = vadd.f32 %v3024_v5, %v2884_v36  ;;  %v3129_v29 = vadd.f32 %v3120_v17, %v2980_v3  ;;  %v5216_v56 = vld [vmem:[#allocation3_spill] sm:$0xff] }
 0x30a   : > { %v3138_v34 = vrot.slane %v3066_v1, 1  ;;  %v3154_v4 = vrot.slane %v3098_v58, 2  ;;  %v3187_v18 = vrot.slane %v5216_v56, 4 }
 0x30b   : > { %3197 = vst.msk [vmem:[%s5159_s20] sm:$0xf] %vm3196_vm1, %v3192_v39  ;;  %v3145_v61 = vadd.f32 %v3137_v22, %v3033_v10  ;;  %v3169_v15 = vrot.slane %v3129_v29, 3 }
 0x30d   : > { %v3161_v13 = vadd.f32 %v3153_v35, %v3145_v61 }
 0x30f   : > { %v3177_v38 = vadd.f32 %v3169_v15, %v3161_v13  ;;  %v3061_v24 = vpop.f32.mrf.mxu2  ;;  %v3093_v47 = vpop.f32.mrf.mxu3 }
 0x310   : > { %v3027_v45 = vpop.f32.mrf.mxu1  ;;  %v3123_v57 = vpop.f32.mrf.mxu0  ;;  %v3067_v44 = vadd.f32 %v3061_v24, %v2918_v12  ;;  %v3099_v40 = vadd.f32 %v3093_v47, %v2950_v43 }
 0x311   : > { %v3193_v19 = vadd.f32 %v3185_v62, %v3177_v38  ;;  %v3034_v50 = vadd.f32 %v3027_v45, %v2885_v16  ;;  %v3130_v25 = vadd.f32 %v3123_v57, %v2981_v41 }
 0x312   : > { %v3139_v2 = vrot.slane %v3067_v44, 1  ;;  %v3155_v60 = vrot.slane %v3099_v40, 2 }
 0x313   : > { %3198 = vst.msk [vmem:[%s5159_s20 + $0x4] sm:$0xf] %vm3196_vm1, %v3193_v19  ;;  %v3146_v6 = vadd.f32 %v3138_v34, %v3034_v50  ;;  %v3170_v53 = vrot.slane %v3130_v25, 3 }
 0x315   : > { %v3162_v11 = vadd.f32 %v3154_v4, %v3146_v6 }
 0x317   : > { %v3178_v46 = vadd.f32 %v3170_v53, %v3162_v11 }
 0x318   : > { %v3029_v32 = vpop.f32.mrf.mxu1  ;;  %v3125_v51 = vpop.f32.mrf.mxu0 }
 0x319   : > { %v3194_v28 = vadd.f32 %v3186_v37, %v3178_v46  ;;  %v3035_v33 = vadd.f32 %v3029_v32, %v2886_v14  ;;  %v3131_v31 = vadd.f32 %v3125_v51, %v2982_v21 }
 0x31b   : > { %3199 = vst.msk [vmem:[%s5159_s20 + $0x8] sm:$0xf] %vm3196_vm1, %v3194_v28  ;;  %v3147_v36 = vadd.f32 %v3139_v2, %v3035_v33  ;;  %v3171_v8 = vrot.slane %v3131_v31, 3 }
 0x31d   : > { %v3163_v3 = vadd.f32 %v3155_v60, %v3147_v36 }
 0x31f   : > { %v3179_v49 = vadd.f32 %v3171_v8, %v3163_v3 }
 0x321   : > { %v3195_v5 = vadd.f32 %v3187_v18, %v3179_v49 }
 0x323   : > { %3200 = vst.msk [vmem:[%s5159_s20 + $0xc] sm:$0xf] %vm3196_vm1, %v3195_v5 }
 0x324 PF: > { %s12_s11 = sadd.s32 1, %s4343_s11   ;;  %s5217_s9 = smov %s4339_s10 }
 0x325   : > { %p9_p6 = scmp.ge.s32.totalorder %s12_s11, 4   ;;  %s5218_s10 = smov %s5220_s12 }
 0x327   :  { %11 = sbr.rel (!%p9_p6) target bundleno = 2 (0x2), region = 158 }

</bundles_post_ra>
